<compile_context>
chip_gen: v7x
topology: tpu7x:2x2x1
jax: 0.10.0
libtpu: 0.0.40
codegen_flags: <defaults>
</compile_context>

<pallas_src>
import functools
import math

import jax
import jax.numpy as jnp
from jax import lax
from jax.experimental import pallas as pl
from jax.experimental.pallas import tpu as pltpu

# ---------------- synthetic config ----------------
VOCAB = 100
HIDDEN = 32
NUM_HEADS = 4
HEAD_DIM = HIDDEN // NUM_HEADS
NUM_LAYERS = 2
INTERMEDIATE = 64
MAX_POS = 16
LATENT = 16
BATCH = 2
SEQ = 8
LN_EPS_BERT = 1e-12   # BERT internal LayerNorm eps
LN_EPS_HEAD = 1e-5    # nn.LayerNorm default eps (top-level layer_norm)
OUT_LANES = 128       # lane-dense packed output slab: [pooled | lat | text | pad]


# ---------------- in-kernel helpers ----------------
def _ln(x, g, b, eps):
    mu = jnp.mean(x, axis=-1, keepdims=True)
    var = jnp.mean((x - mu) ** 2, axis=-1, keepdims=True)
    return (x - mu) * lax.rsqrt(var + eps) * g + b


def _gelu(x):
    # tanh-approx GELU (BERT's erf GELU is numerically ~identical)
    return jax.nn.gelu(x, approximate=True)


# ---------------- fused forward kernel ----------------
def fused_encoder_kernel(
    # scalar-prefetch operands (SMEM)
    ids_ref, tt_ref,
    # VMEM inputs
    amask_ref,
    wemb_ref, pemb_ref, temb_ref, elng_ref, elnb_ref,
    wq_ref, bq_ref, wk_ref, bk_ref, wv_ref, bv_ref,
    wo_ref, bo_ref, ln1g_ref, ln1b_ref,
    wi_ref, bi_ref, wo2_ref, bo2_ref, ln2g_ref, ln2b_ref,
    wp_ref, bp_ref, lng_ref, lnb_ref, wl_ref, wm_ref, bm_ref,
    # output
    out_ref,
    # scratch
    emb_ref,
    *, seq, hidden, num_heads, num_layers, latent):
    S, H, NH = seq, hidden, num_heads
    hd = H // NH
    scale = 1.0 / math.sqrt(hd)
    b = pl.program_id(0)          # one sequence per grid step ("parallel")
    off = b * S

    # ---- embeddings: row gather driven by SMEM-resident ids (no one-hot) ----
    # NOTE: out-of-range token ids are not range-checked (nn.Embedding would
    # raise); position ids are the static arange used by BertModel.
    for i in range(S):
        tok = ids_ref[off + i]
        tt = tt_ref[off + i]
        emb_ref[pl.ds(i, 1), :] = (wemb_ref[tok]      # [1, H] dynamic row gather
                                   + pemb_ref[i]      # static position row
                                   + temb_ref[tt])    # token-type row
    x = _ln(emb_ref[...], elng_ref[...], elnb_ref[...], LN_EPS_BERT)   # [S, H]

    # ---- additive attention mask, hoisted once; broadcasts over heads/queries ----
    mask_add = (1.0 - amask_ref[...]) * (-1e9)        # [1, 1, S]

    # ---- transformer layers (static loop over stacked head-major weights) ----
    for l in range(num_layers):
        # heads live on the leading batch axis of the weight stacks; x is
        # broadcast (cheap, leading dim) so every matmul is a batched einsum
        # with a leading batch dim and there is never a lane-slice/concat.
        xb = jnp.broadcast_to(x, (NH, S, H))                            # [NH, S, H]
        q = jnp.einsum('nsd,ndk->nsk', xb, wq_ref[l],
                       preferred_element_type=jnp.float32) + bq_ref[l]  # [NH, S, hd]
        k = jnp.einsum('nsd,ndk->nsk', xb, wk_ref[l],
                       preferred_element_type=jnp.float32) + bk_ref[l]
        v = jnp.einsum('nsd,ndk->nsk', xb, wv_ref[l],
                       preferred_element_type=jnp.float32) + bv_ref[l]

        scores = jnp.einsum('nqd,nkd->nqk', q, k,
                            preferred_element_type=jnp.float32) * scale
        scores = scores + mask_add                                      # [NH, S, S]
        m = jnp.max(scores, axis=-1, keepdims=True)
        e = jnp.exp(scores - m)
        probs = e / jnp.sum(e, axis=-1, keepdims=True)                  # exact softmax
        ctx = jnp.einsum('nqk,nkd->nqd', probs, v,
                         preferred_element_type=jnp.float32)            # [NH, S, hd]

        # per-head output projection, then reduce over heads (no lane regroup)
        attn = jnp.sum(
            jnp.einsum('nsd,ndh->nsh', ctx, wo_ref[l],
                       preferred_element_type=jnp.float32),
            axis=0) + bo_ref[l]                                         # [S, H]
        h1 = _ln(attn + x, ln1g_ref[l], ln1b_ref[l], LN_EPS_BERT)

        inter = _gelu(jnp.dot(h1, wi_ref[l],
                              preferred_element_type=jnp.float32) + bi_ref[l])
        ffn = jnp.dot(inter, wo2_ref[l],
                      preferred_element_type=jnp.float32) + bo2_ref[l]
        x = _ln(ffn + h1, ln2g_ref[l], ln2b_ref[l], LN_EPS_BERT)

    # ---- head: pooler(tanh) -> LayerNorm -> latent linear -> mu -> projection ----
    cls = x[0:1, :]                                                     # [1, H]
    p = jnp.tanh(jnp.dot(cls, wp_ref[...],
                         preferred_element_type=jnp.float32) + bp_ref[...])
    p = _ln(p, lng_ref[...], lnb_ref[...], LN_EPS_HEAD)
    lat = jnp.dot(p, wl_ref[...], preferred_element_type=jnp.float32)   # [1, 2*latent]
    mu = lat[:, :latent]
    text = jnp.dot(mu, wm_ref[...],
                   preferred_element_type=jnp.float32) + bm_ref[...]    # [1, latent]
    # TODO(synk): nn.Dropout(0.1) is identity in eval mode; not applied here.

    # ---- lane-dense output slab, direct slice stores (no pad+concat) ----
    out_ref[...] = jnp.zeros_like(out_ref)
    out_ref[:, :, 0:H] = p.reshape(1, 1, H)
    out_ref[:, :, H:H + 2 * latent] = lat.reshape(1, 1, 2 * latent)
    out_ref[:, :, H + 2 * latent:H + 3 * latent] = text.reshape(1, 1, latent)


# ---------------- pallas_call wrapper ----------------
def _full_block(a):
    nd = a.ndim
    # index_map receives (grid_idx, *scalar_prefetch_refs)
    return pl.BlockSpec(a.shape, lambda b, ids, tt, _nd=nd: (0,) * _nd)


@functools.partial(jax.jit, static_argnames=('return_latent_params',))
def larimar_text_encoder_forward(params, input_ids, attention_mask,
                                 token_type_ids, return_latent_params=True):
    B, S = input_ids.shape
    H, NH, hd, L = HIDDEN, NUM_HEADS, HEAD_DIM, NUM_LAYERS

    ids_flat = input_ids.reshape(-1).astype(jnp.int32)       # SMEM (scalar prefetch)
    tt_flat = token_type_ids.reshape(-1).astype(jnp.int32)   # SMEM (scalar prefetch)
    amask3 = attention_mask.astype(jnp.float32).reshape(B, 1, S)

    lp, hp = params['layers'], params['head']

    # Head-major weight layout: per-head slices become leading-(batch)-dim
    # slices so the kernel never lane-slices or concatenates along lanes.
    def hm_w(w):   # [L, H, H]  -> [L, NH, H, hd]
        return w.reshape(L, H, NH, hd).transpose(0, 2, 1, 3)

    def hm_b(bb):  # [L, 1, H]  -> [L, NH, 1, hd]
        return bb.reshape(L, NH, hd)[:, :, None, :]

    wqkv, bqkv = lp['wqkv'], lp['bqkv']
    wq, bq = hm_w(wqkv[:, :, 0 * H:1 * H]), hm_b(bqkv[:, :, 0 * H:1 * H])
    wk, bk = hm_w(wqkv[:, :, 1 * H:2 * H]), hm_b(bqkv[:, :, 1 * H:2 * H])
    wv, bv = hm_w(wqkv[:, :, 2 * H:3 * H]), hm_b(bqkv[:, :, 2 * H:3 * H])
    wo_h = lp['wo'].reshape(L, NH, hd, H)

    # Embedding tables as [rows, 1, H] so the in-kernel gather is a dynamic
    # index on an untiled leading axis.  (At real vocab scale, keep the table
    # in HBM (memory_space=pl.ANY) and DMA-gather rows instead.)
    wemb3 = params['word_emb'][:, None, :]
    pemb3 = params['pos_emb'][:, None, :]
    temb3 = params['type_emb'][:, None, :]

    args = (amask3, wemb3, pemb3, temb3,
            params['emb_lng'], params['emb_lnb'],
            wq, bq, wk, bk, wv, bv, wo_h, lp['bo'], lp['ln1g'], lp['ln1b'],
            lp['wi'], lp['bi'], lp['wo2'], lp['bo2'], lp['ln2g'], lp['ln2b'],
            hp['wp'], hp['bp'], hp['lng'], hp['lnb'],
            hp['wl'], hp['wm'], hp['bm'])

    in_specs = ([pl.BlockSpec((1, 1, S), lambda b, ids, tt: (b, 0, 0))]
                + [_full_block(a) for a in args[1:]])

    # NOTE(scale-up): at real BERT size, also grid over a B*S row tile (keep
    # >=128 rows per step), stream stacked layer weights (pl.Buffered /
    # emit_pipeline) instead of keeping all L layers VMEM-resident (v7x has
    # 64 MiB), and raise vmem_limit_bytes accordingly.
    grid_spec = pltpu.PrefetchScalarGridSpec(
        num_scalar_prefetch=2,
        grid=(B,),
        in_specs=in_specs,
        out_specs=pl.BlockSpec((1, 1, OUT_LANES), lambda b, ids, tt: (b, 0, 0)),
        scratch_shapes=[pltpu.VMEM((S, H), jnp.float32)],
    )

    out = pl.pallas_call(
        functools.partial(fused_encoder_kernel, seq=S, hidden=H,
                          num_heads=NH, num_layers=L, latent=LATENT),
        grid_spec=grid_spec,
        out_shape=jax.ShapeDtypeStruct((B, 1, OUT_LANES), jnp.float32),
        compiler_params=pltpu.CompilerParams(
            dimension_semantics=("parallel",),          # v7x: shard batch over 2 TCs
            vmem_limit_bytes=32 * 1024 * 1024),
    )(ids_flat, tt_flat, *args)

    out2 = out[:, 0, :]
    latent_params = out2[:, H:H + 2 * LATENT]
    text_features = out2[:, H + 2 * LATENT:H + 3 * LATENT]
    if return_latent_params:
        return text_features, latent_params
    return text_features, None


# ---------------- parameter init (deterministic, synthetic) ----------------
def init_params(key):
    ks = iter(jax.random.split(key, 64))

    def dense(*shape):
        return jax.random.normal(next(ks), shape, jnp.float32) * 0.02

    def bias(*shape):
        return jax.random.normal(next(ks), shape, jnp.float32) * 0.01

    L = NUM_LAYERS
    return {
        'word_emb': dense(VOCAB, HIDDEN),
        'pos_emb': dense(MAX_POS, HIDDEN),
        'type_emb': dense(2, HIDDEN),
        'emb_lng': jnp.ones((1, HIDDEN), jnp.float32),
        'emb_lnb': jnp.zeros((1, HIDDEN), jnp.float32),
        'layers': {
            'wqkv': dense(L, HIDDEN, 3 * HIDDEN), 'bqkv': bias(L, 1, 3 * HIDDEN),
            'wo': dense(L, HIDDEN, HIDDEN), 'bo': bias(L, 1, HIDDEN),
            'ln1g': jnp.ones((L, 1, HIDDEN), jnp.float32),
            'ln1b': jnp.zeros((L, 1, HIDDEN), jnp.float32),
            'wi': dense(L, HIDDEN, INTERMEDIATE), 'bi': bias(L, 1, INTERMEDIATE),
            'wo2': dense(L, INTERMEDIATE, HIDDEN), 'bo2': bias(L, 1, HIDDEN),
            'ln2g': jnp.ones((L, 1, HIDDEN), jnp.float32),
            'ln2b': jnp.zeros((L, 1, HIDDEN), jnp.float32),
        },
        'head': {
            'wp': dense(HIDDEN, HIDDEN), 'bp': bias(1, HIDDEN),
            'lng': jnp.ones((1, HIDDEN), jnp.float32),
            'lnb': jnp.zeros((1, HIDDEN), jnp.float32),
            'wl': dense(HIDDEN, 2 * LATENT),            # linear (bias=False)
            'wm': dense(LATENT, LATENT), 'bm': bias(1, LATENT),
        },
    }


# ---------------- pure-JAX reference (sanity check) ----------------
def _ref_forward(params, input_ids, attention_mask, token_type_ids):
    B, S = input_ids.shape
    pos_ids = jnp.arange(S, dtype=jnp.int32)
    x = (jnp.take(params['word_emb'], input_ids, axis=0)
         + params['pos_emb'][pos_ids][None, :, :]
         + jnp.take(params['type_emb'], token_type_ids, axis=0))
    x = _ln(x, params['emb_lng'][0], params['emb_lnb'][0], LN_EPS_BERT)
    mask_add = (1.0 - attention_mask.astype(jnp.float32)) * (-1e9)
    lp = params['layers']
    for l in range(NUM_LAYERS):
        qkv = jnp.einsum('bsh,hd->bsd', x, lp['wqkv'][l]) + lp['bqkv'][l, 0]
        q, k, v = jnp.split(qkv, 3, axis=-1)
        q = q.reshape(B, S, NUM_HEADS, HEAD_DIM)
        k = k.reshape(B, S, NUM_HEADS, HEAD_DIM)
        v = v.reshape(B, S, NUM_HEADS, HEAD_DIM)
        s = jnp.einsum('bqnd,bknd->bnqk', q, k) / math.sqrt(HEAD_DIM)
        s = s + mask_add[:, None, None, :]
        p = jax.nn.softmax(s, axis=-1)
        ctx = jnp.einsum('bnqk,bknd->bqnd', p, v).reshape(B, S, HIDDEN)
        attn = jnp.einsum('bsh,hd->bsd', ctx, lp['wo'][l]) + lp['bo'][l, 0]
        h1 = _ln(attn + x, lp['ln1g'][l, 0], lp['ln1b'][l, 0], LN_EPS_BERT)
        inter = _gelu(jnp.einsum('bsh,hi->bsi', h1, lp['wi'][l]) + lp['bi'][l, 0])
        ffn = jnp.einsum('bsi,ih->bsh', inter, lp['wo2'][l]) + lp['bo2'][l, 0]
        x = _ln(ffn + h1, lp['ln2g'][l, 0], lp['ln2b'][l, 0], LN_EPS_BERT)
    hp = params['head']
    pooled = jnp.tanh(x[:, 0, :] @ hp['wp'] + hp['bp'][0])
    pooled = _ln(pooled, hp['lng'][0], hp['lnb'][0], LN_EPS_HEAD)
    lat = pooled @ hp['wl']
    mu = lat[:, :LATENT]
    text = mu @ hp['wm'] + hp['bm'][0]
    return text, lat


if __name__ == "__main__":
    key = jax.random.PRNGKey(0)
    k_param, k_ids = jax.random.split(key)

    params = init_params(k_param)
    input_ids = jax.random.randint(k_ids, (BATCH, SEQ), 0, VOCAB, dtype=jnp.int32)
    attention_mask = jnp.ones((BATCH, SEQ), jnp.int32).at[1, SEQ - 2:].set(0)
    token_type_ids = jnp.zeros((BATCH, SEQ), jnp.int32)

    text_features, latent_params = larimar_text_encoder_forward(
        params, input_ids, attention_mask, token_type_ids,
        return_latent_params=True)
    jax.block_until_ready((text_features, latent_params))

    # sanity check against pure-JAX reference (tolerance covers MXU f32
    # matmul rounding differences between the two op decompositions)
    ref_text, ref_lat = _ref_forward(params, input_ids, attention_mask,
                                     token_type_ids)
    assert text_features.shape == (BATCH, LATENT)
    assert latent_params.shape == (BATCH, 2 * LATENT)
    assert jnp.allclose(text_features, ref_text, atol=2e-3, rtol=2e-3)
    assert jnp.allclose(latent_params, ref_lat, atol=2e-3, rtol=2e-3)

    print("KERNEL_OK")
</pallas_src>

<mosaic_0001>
module attributes {stable_mosaic.version = 11 : i64} {
  func.func @fused_encoder_kernel(%arg0: i32, %arg1: memref<16xi32, #tpu.memory_space<smem>>, %arg2: memref<16xi32, #tpu.memory_space<smem>>, %arg3: memref<1x1x8xf32, #tpu.memory_space<vmem>>, %arg4: memref<100x1x32xf32, #tpu.memory_space<vmem>>, %arg5: memref<16x1x32xf32, #tpu.memory_space<vmem>>, %arg6: memref<2x1x32xf32, #tpu.memory_space<vmem>>, %arg7: memref<1x32xf32, #tpu.memory_space<vmem>>, %arg8: memref<1x32xf32, #tpu.memory_space<vmem>>, %arg9: memref<2x4x32x8xf32, #tpu.memory_space<vmem>>, %arg10: memref<2x4x1x8xf32, #tpu.memory_space<vmem>>, %arg11: memref<2x4x32x8xf32, #tpu.memory_space<vmem>>, %arg12: memref<2x4x1x8xf32, #tpu.memory_space<vmem>>, %arg13: memref<2x4x32x8xf32, #tpu.memory_space<vmem>>, %arg14: memref<2x4x1x8xf32, #tpu.memory_space<vmem>>, %arg15: memref<2x4x8x32xf32, #tpu.memory_space<vmem>>, %arg16: memref<2x1x32xf32, #tpu.memory_space<vmem>>, %arg17: memref<2x1x32xf32, #tpu.memory_space<vmem>>, %arg18: memref<2x1x32xf32, #tpu.memory_space<vmem>>, %arg19: memref<2x32x64xf32, #tpu.memory_space<vmem>>, %arg20: memref<2x1x64xf32, #tpu.memory_space<vmem>>, %arg21: memref<2x64x32xf32, #tpu.memory_space<vmem>>, %arg22: memref<2x1x32xf32, #tpu.memory_space<vmem>>, %arg23: memref<2x1x32xf32, #tpu.memory_space<vmem>>, %arg24: memref<2x1x32xf32, #tpu.memory_space<vmem>>, %arg25: memref<32x32xf32, #tpu.memory_space<vmem>>, %arg26: memref<1x32xf32, #tpu.memory_space<vmem>>, %arg27: memref<1x32xf32, #tpu.memory_space<vmem>>, %arg28: memref<1x32xf32, #tpu.memory_space<vmem>>, %arg29: memref<32x32xf32, #tpu.memory_space<vmem>>, %arg30: memref<16x16xf32, #tpu.memory_space<vmem>>, %arg31: memref<1x16xf32, #tpu.memory_space<vmem>>, %arg32: memref<1x1x128xf32, #tpu.memory_space<vmem>>, %arg33: memref<8x32xf32, #tpu.memory_space<vmem>>) attributes {dimension_semantics = [#tpu.dimension_semantics<parallel>], iteration_bounds = array<i64: 2>, scalar_prefetch = 2 : i64, scratch_operands = 1 : i64, tpu.core_type = #tpu.core_type<tc>, window_params = [{transform_indices = @transform_0, window_bounds = array<i64: 1, 1, 8>}, {pipeline_mode = #tpu.pipeline_mode<synchronous>, transform_indices = @transform_1, window_bounds = array<i64: 100, 1, 32>}, {pipeline_mode = #tpu.pipeline_mode<synchronous>, transform_indices = @transform_2, window_bounds = array<i64: 16, 1, 32>}, {pipeline_mode = #tpu.pipeline_mode<synchronous>, transform_indices = @transform_3, window_bounds = array<i64: 2, 1, 32>}, {pipeline_mode = #tpu.pipeline_mode<synchronous>, transform_indices = @transform_4, window_bounds = array<i64: 1, 32>}, {pipeline_mode = #tpu.pipeline_mode<synchronous>, transform_indices = @transform_5, window_bounds = array<i64: 1, 32>}, {pipeline_mode = #tpu.pipeline_mode<synchronous>, transform_indices = @transform_6, window_bounds = array<i64: 2, 4, 32, 8>}, {pipeline_mode = #tpu.pipeline_mode<synchronous>, transform_indices = @transform_7, window_bounds = array<i64: 2, 4, 1, 8>}, {pipeline_mode = #tpu.pipeline_mode<synchronous>, transform_indices = @transform_8, window_bounds = array<i64: 2, 4, 32, 8>}, {pipeline_mode = #tpu.pipeline_mode<synchronous>, transform_indices = @transform_9, window_bounds = array<i64: 2, 4, 1, 8>}, {pipeline_mode = #tpu.pipeline_mode<synchronous>, transform_indices = @transform_10, window_bounds = array<i64: 2, 4, 32, 8>}, {pipeline_mode = #tpu.pipeline_mode<synchronous>, transform_indices = @transform_11, window_bounds = array<i64: 2, 4, 1, 8>}, {pipeline_mode = #tpu.pipeline_mode<synchronous>, transform_indices = @transform_12, window_bounds = array<i64: 2, 4, 8, 32>}, {pipeline_mode = #tpu.pipeline_mode<synchronous>, transform_indices = @transform_13, window_bounds = array<i64: 2, 1, 32>}, {pipeline_mode = #tpu.pipeline_mode<synchronous>, transform_indices = @transform_14, window_bounds = array<i64: 2, 1, 32>}, {pipeline_mode = #tpu.pipeline_mode<synchronous>, transform_indices = @transform_15, window_bounds = array<i64: 2, 1, 32>}, {pipeline_mode = #tpu.pipeline_mode<synchronous>, transform_indices = @transform_16, window_bounds = array<i64: 2, 32, 64>}, {pipeline_mode = #tpu.pipeline_mode<synchronous>, transform_indices = @transform_17, window_bounds = array<i64: 2, 1, 64>}, {pipeline_mode = #tpu.pipeline_mode<synchronous>, transform_indices = @transform_18, window_bounds = array<i64: 2, 64, 32>}, {pipeline_mode = #tpu.pipeline_mode<synchronous>, transform_indices = @transform_19, window_bounds = array<i64: 2, 1, 32>}, {pipeline_mode = #tpu.pipeline_mode<synchronous>, transform_indices = @transform_20, window_bounds = array<i64: 2, 1, 32>}, {pipeline_mode = #tpu.pipeline_mode<synchronous>, transform_indices = @transform_21, window_bounds = array<i64: 2, 1, 32>}, {pipeline_mode = #tpu.pipeline_mode<synchronous>, transform_indices = @transform_22, window_bounds = array<i64: 32, 32>}, {pipeline_mode = #tpu.pipeline_mode<synchronous>, transform_indices = @transform_23, window_bounds = array<i64: 1, 32>}, {pipeline_mode = #tpu.pipeline_mode<synchronous>, transform_indices = @transform_24, window_bounds = array<i64: 1, 32>}, {pipeline_mode = #tpu.pipeline_mode<synchronous>, transform_indices = @transform_25, window_bounds = array<i64: 1, 32>}, {pipeline_mode = #tpu.pipeline_mode<synchronous>, transform_indices = @transform_26, window_bounds = array<i64: 32, 32>}, {pipeline_mode = #tpu.pipeline_mode<synchronous>, transform_indices = @transform_27, window_bounds = array<i64: 16, 16>}, {pipeline_mode = #tpu.pipeline_mode<synchronous>, transform_indices = @transform_28, window_bounds = array<i64: 1, 16>}, {transform_indices = @transform_29, window_bounds = array<i64: 1, 1, 128>}]} {
    %c8_i32 = arith.constant 8 : i32
    %0 = arith.muli %arg0, %c8_i32 : i32
    %c0_i32 = arith.constant 0 : i32
    %1 = arith.addi %0, %c0_i32 : i32
    %2 = arith.index_cast %1 : i32 to index
    %3 = memref.load %arg1[%2] : memref<16xi32, #tpu.memory_space<smem>>
    %c0_i32_0 = arith.constant 0 : i32
    %4 = arith.addi %0, %c0_i32_0 : i32
    %5 = arith.index_cast %4 : i32 to index
    %6 = memref.load %arg2[%5] : memref<16xi32, #tpu.memory_space<smem>>
    %7 = arith.index_cast %3 : i32 to index
    %c0 = arith.constant 0 : index
    %c0_1 = arith.constant 0 : index
    %8 = vector.load %arg4[%7, %c0, %c0_1] : memref<100x1x32xf32, #tpu.memory_space<vmem>>, vector<1x1x32xf32>
    %9 = vector.shape_cast %8 : vector<1x1x32xf32> to vector<1x32xf32>
    %c0_2 = arith.constant 0 : index
    %c0_3 = arith.constant 0 : index
    %c0_4 = arith.constant 0 : index
    %10 = vector.load %arg5[%c0_2, %c0_3, %c0_4] : memref<16x1x32xf32, #tpu.memory_space<vmem>>, vector<1x1x32xf32>
    %11 = vector.shape_cast %10 : vector<1x1x32xf32> to vector<1x32xf32>
    %12 = arith.addf %9, %11 : vector<1x32xf32>
    %13 = arith.index_cast %6 : i32 to index
    %c0_5 = arith.constant 0 : index
    %c0_6 = arith.constant 0 : index
    %14 = vector.load %arg6[%13, %c0_5, %c0_6] : memref<2x1x32xf32, #tpu.memory_space<vmem>>, vector<1x1x32xf32>
    %15 = vector.shape_cast %14 : vector<1x1x32xf32> to vector<1x32xf32>
    %16 = arith.addf %12, %15 : vector<1x32xf32>
    %c0_7 = arith.constant 0 : index
    %c0_8 = arith.constant 0 : index
    %17 = vector.load %arg33[%c0_7, %c0_8] : memref<8x32xf32, #tpu.memory_space<vmem>>, vector<1x32xf32>
    tpu.vector_store %arg33[%c0_7, %c0_8], %16 {strides = array<i32>} : memref<8x32xf32, #tpu.memory_space<vmem>>, vector<1x32xf32>,
    %c1_i32 = arith.constant 1 : i32
    %18 = arith.addi %0, %c1_i32 : i32
    %19 = arith.index_cast %18 : i32 to index
    %20 = memref.load %arg1[%19] : memref<16xi32, #tpu.memory_space<smem>>
    %c1_i32_9 = arith.constant 1 : i32
    %21 = arith.addi %0, %c1_i32_9 : i32
    %22 = arith.index_cast %21 : i32 to index
    %23 = memref.load %arg2[%22] : memref<16xi32, #tpu.memory_space<smem>>
    %24 = arith.index_cast %20 : i32 to index
    %c0_10 = arith.constant 0 : index
    %c0_11 = arith.constant 0 : index
    %25 = vector.load %arg4[%24, %c0_10, %c0_11] : memref<100x1x32xf32, #tpu.memory_space<vmem>>, vector<1x1x32xf32>
    %26 = vector.shape_cast %25 : vector<1x1x32xf32> to vector<1x32xf32>
    %c1 = arith.constant 1 : index
    %c0_12 = arith.constant 0 : index
    %c0_13 = arith.constant 0 : index
    %27 = vector.load %arg5[%c1, %c0_12, %c0_13] : memref<16x1x32xf32, #tpu.memory_space<vmem>>, vector<1x1x32xf32>
    %28 = vector.shape_cast %27 : vector<1x1x32xf32> to vector<1x32xf32>
    %29 = arith.addf %26, %28 : vector<1x32xf32>
    %30 = arith.index_cast %23 : i32 to index
    %c0_14 = arith.constant 0 : index
    %c0_15 = arith.constant 0 : index
    %31 = vector.load %arg6[%30, %c0_14, %c0_15] : memref<2x1x32xf32, #tpu.memory_space<vmem>>, vector<1x1x32xf32>
    %32 = vector.shape_cast %31 : vector<1x1x32xf32> to vector<1x32xf32>
    %33 = arith.addf %29, %32 : vector<1x32xf32>
    %c1_16 = arith.constant 1 : index
    %c0_17 = arith.constant 0 : index
    %34 = vector.load %arg33[%c1_16, %c0_17] : memref<8x32xf32, #tpu.memory_space<vmem>>, vector<1x32xf32>
    tpu.vector_store %arg33[%c1_16, %c0_17], %33 {strides = array<i32>} : memref<8x32xf32, #tpu.memory_space<vmem>>, vector<1x32xf32>,
    %c2_i32 = arith.constant 2 : i32
    %35 = arith.addi %0, %c2_i32 : i32
    %36 = arith.index_cast %35 : i32 to index
    %37 = memref.load %arg1[%36] : memref<16xi32, #tpu.memory_space<smem>>
    %c2_i32_18 = arith.constant 2 : i32
    %38 = arith.addi %0, %c2_i32_18 : i32
    %39 = arith.index_cast %38 : i32 to index
    %40 = memref.load %arg2[%39] : memref<16xi32, #tpu.memory_space<smem>>
    %41 = arith.index_cast %37 : i32 to index
    %c0_19 = arith.constant 0 : index
    %c0_20 = arith.constant 0 : index
    %42 = vector.load %arg4[%41, %c0_19, %c0_20] : memref<100x1x32xf32, #tpu.memory_space<vmem>>, vector<1x1x32xf32>
    %43 = vector.shape_cast %42 : vector<1x1x32xf32> to vector<1x32xf32>
    %c2 = arith.constant 2 : index
    %c0_21 = arith.constant 0 : index
    %c0_22 = arith.constant 0 : index
    %44 = vector.load %arg5[%c2, %c0_21, %c0_22] : memref<16x1x32xf32, #tpu.memory_space<vmem>>, vector<1x1x32xf32>
    %45 = vector.shape_cast %44 : vector<1x1x32xf32> to vector<1x32xf32>
    %46 = arith.addf %43, %45 : vector<1x32xf32>
    %47 = arith.index_cast %40 : i32 to index
    %c0_23 = arith.constant 0 : index
    %c0_24 = arith.constant 0 : index
    %48 = vector.load %arg6[%47, %c0_23, %c0_24] : memref<2x1x32xf32, #tpu.memory_space<vmem>>, vector<1x1x32xf32>
    %49 = vector.shape_cast %48 : vector<1x1x32xf32> to vector<1x32xf32>
    %50 = arith.addf %46, %49 : vector<1x32xf32>
    %c2_25 = arith.constant 2 : index
    %c0_26 = arith.constant 0 : index
    %51 = vector.load %arg33[%c2_25, %c0_26] : memref<8x32xf32, #tpu.memory_space<vmem>>, vector<1x32xf32>
    tpu.vector_store %arg33[%c2_25, %c0_26], %50 {strides = array<i32>} : memref<8x32xf32, #tpu.memory_space<vmem>>, vector<1x32xf32>,
    %c3_i32 = arith.constant 3 : i32
    %52 = arith.addi %0, %c3_i32 : i32
    %53 = arith.index_cast %52 : i32 to index
    %54 = memref.load %arg1[%53] : memref<16xi32, #tpu.memory_space<smem>>
    %c3_i32_27 = arith.constant 3 : i32
    %55 = arith.addi %0, %c3_i32_27 : i32
    %56 = arith.index_cast %55 : i32 to index
    %57 = memref.load %arg2[%56] : memref<16xi32, #tpu.memory_space<smem>>
    %58 = arith.index_cast %54 : i32 to index
    %c0_28 = arith.constant 0 : index
    %c0_29 = arith.constant 0 : index
    %59 = vector.load %arg4[%58, %c0_28, %c0_29] : memref<100x1x32xf32, #tpu.memory_space<vmem>>, vector<1x1x32xf32>
    %60 = vector.shape_cast %59 : vector<1x1x32xf32> to vector<1x32xf32>
    %c3 = arith.constant 3 : index
    %c0_30 = arith.constant 0 : index
    %c0_31 = arith.constant 0 : index
    %61 = vector.load %arg5[%c3, %c0_30, %c0_31] : memref<16x1x32xf32, #tpu.memory_space<vmem>>, vector<1x1x32xf32>
    %62 = vector.shape_cast %61 : vector<1x1x32xf32> to vector<1x32xf32>
    %63 = arith.addf %60, %62 : vector<1x32xf32>
    %64 = arith.index_cast %57 : i32 to index
    %c0_32 = arith.constant 0 : index
    %c0_33 = arith.constant 0 : index
    %65 = vector.load %arg6[%64, %c0_32, %c0_33] : memref<2x1x32xf32, #tpu.memory_space<vmem>>, vector<1x1x32xf32>
    %66 = vector.shape_cast %65 : vector<1x1x32xf32> to vector<1x32xf32>
    %67 = arith.addf %63, %66 : vector<1x32xf32>
    %c3_34 = arith.constant 3 : index
    %c0_35 = arith.constant 0 : index
    %68 = vector.load %arg33[%c3_34, %c0_35] : memref<8x32xf32, #tpu.memory_space<vmem>>, vector<1x32xf32>
    tpu.vector_store %arg33[%c3_34, %c0_35], %67 {strides = array<i32>} : memref<8x32xf32, #tpu.memory_space<vmem>>, vector<1x32xf32>,
    %c4_i32 = arith.constant 4 : i32
    %69 = arith.addi %0, %c4_i32 : i32
    %70 = arith.index_cast %69 : i32 to index
    %71 = memref.load %arg1[%70] : memref<16xi32, #tpu.memory_space<smem>>
    %c4_i32_36 = arith.constant 4 : i32
    %72 = arith.addi %0, %c4_i32_36 : i32
    %73 = arith.index_cast %72 : i32 to index
    %74 = memref.load %arg2[%73] : memref<16xi32, #tpu.memory_space<smem>>
    %75 = arith.index_cast %71 : i32 to index
    %c0_37 = arith.constant 0 : index
    %c0_38 = arith.constant 0 : index
    %76 = vector.load %arg4[%75, %c0_37, %c0_38] : memref<100x1x32xf32, #tpu.memory_space<vmem>>, vector<1x1x32xf32>
    %77 = vector.shape_cast %76 : vector<1x1x32xf32> to vector<1x32xf32>
    %c4 = arith.constant 4 : index
    %c0_39 = arith.constant 0 : index
    %c0_40 = arith.constant 0 : index
    %78 = vector.load %arg5[%c4, %c0_39, %c0_40] : memref<16x1x32xf32, #tpu.memory_space<vmem>>, vector<1x1x32xf32>
    %79 = vector.shape_cast %78 : vector<1x1x32xf32> to vector<1x32xf32>
    %80 = arith.addf %77, %79 : vector<1x32xf32>
    %81 = arith.index_cast %74 : i32 to index
    %c0_41 = arith.constant 0 : index
    %c0_42 = arith.constant 0 : index
    %82 = vector.load %arg6[%81, %c0_41, %c0_42] : memref<2x1x32xf32, #tpu.memory_space<vmem>>, vector<1x1x32xf32>
    %83 = vector.shape_cast %82 : vector<1x1x32xf32> to vector<1x32xf32>
    %84 = arith.addf %80, %83 : vector<1x32xf32>
    %c4_43 = arith.constant 4 : index
    %c0_44 = arith.constant 0 : index
    %85 = vector.load %arg33[%c4_43, %c0_44] : memref<8x32xf32, #tpu.memory_space<vmem>>, vector<1x32xf32>
    tpu.vector_store %arg33[%c4_43, %c0_44], %84 {strides = array<i32>} : memref<8x32xf32, #tpu.memory_space<vmem>>, vector<1x32xf32>,
    %c5_i32 = arith.constant 5 : i32
    %86 = arith.addi %0, %c5_i32 : i32
    %87 = arith.index_cast %86 : i32 to index
    %88 = memref.load %arg1[%87] : memref<16xi32, #tpu.memory_space<smem>>
    %c5_i32_45 = arith.constant 5 : i32
    %89 = arith.addi %0, %c5_i32_45 : i32
    %90 = arith.index_cast %89 : i32 to index
    %91 = memref.load %arg2[%90] : memref<16xi32, #tpu.memory_space<smem>>
    %92 = arith.index_cast %88 : i32 to index
    %c0_46 = arith.constant 0 : index
    %c0_47 = arith.constant 0 : index
    %93 = vector.load %arg4[%92, %c0_46, %c0_47] : memref<100x1x32xf32, #tpu.memory_space<vmem>>, vector<1x1x32xf32>
    %94 = vector.shape_cast %93 : vector<1x1x32xf32> to vector<1x32xf32>
    %c5 = arith.constant 5 : index
    %c0_48 = arith.constant 0 : index
    %c0_49 = arith.constant 0 : index
    %95 = vector.load %arg5[%c5, %c0_48, %c0_49] : memref<16x1x32xf32, #tpu.memory_space<vmem>>, vector<1x1x32xf32>
    %96 = vector.shape_cast %95 : vector<1x1x32xf32> to vector<1x32xf32>
    %97 = arith.addf %94, %96 : vector<1x32xf32>
    %98 = arith.index_cast %91 : i32 to index
    %c0_50 = arith.constant 0 : index
    %c0_51 = arith.constant 0 : index
    %99 = vector.load %arg6[%98, %c0_50, %c0_51] : memref<2x1x32xf32, #tpu.memory_space<vmem>>, vector<1x1x32xf32>
    %100 = vector.shape_cast %99 : vector<1x1x32xf32> to vector<1x32xf32>
    %101 = arith.addf %97, %100 : vector<1x32xf32>
    %c5_52 = arith.constant 5 : index
    %c0_53 = arith.constant 0 : index
    %102 = vector.load %arg33[%c5_52, %c0_53] : memref<8x32xf32, #tpu.memory_space<vmem>>, vector<1x32xf32>
    tpu.vector_store %arg33[%c5_52, %c0_53], %101 {strides = array<i32>} : memref<8x32xf32, #tpu.memory_space<vmem>>, vector<1x32xf32>,
    %c6_i32 = arith.constant 6 : i32
    %103 = arith.addi %0, %c6_i32 : i32
    %104 = arith.index_cast %103 : i32 to index
    %105 = memref.load %arg1[%104] : memref<16xi32, #tpu.memory_space<smem>>
    %c6_i32_54 = arith.constant 6 : i32
    %106 = arith.addi %0, %c6_i32_54 : i32
    %107 = arith.index_cast %106 : i32 to index
    %108 = memref.load %arg2[%107] : memref<16xi32, #tpu.memory_space<smem>>
    %109 = arith.index_cast %105 : i32 to index
    %c0_55 = arith.constant 0 : index
    %c0_56 = arith.constant 0 : index
    %110 = vector.load %arg4[%109, %c0_55, %c0_56] : memref<100x1x32xf32, #tpu.memory_space<vmem>>, vector<1x1x32xf32>
    %111 = vector.shape_cast %110 : vector<1x1x32xf32> to vector<1x32xf32>
    %c6 = arith.constant 6 : index
    %c0_57 = arith.constant 0 : index
    %c0_58 = arith.constant 0 : index
    %112 = vector.load %arg5[%c6, %c0_57, %c0_58] : memref<16x1x32xf32, #tpu.memory_space<vmem>>, vector<1x1x32xf32>
    %113 = vector.shape_cast %112 : vector<1x1x32xf32> to vector<1x32xf32>
    %114 = arith.addf %111, %113 : vector<1x32xf32>
    %115 = arith.index_cast %108 : i32 to index
    %c0_59 = arith.constant 0 : index
    %c0_60 = arith.constant 0 : index
    %116 = vector.load %arg6[%115, %c0_59, %c0_60] : memref<2x1x32xf32, #tpu.memory_space<vmem>>, vector<1x1x32xf32>
    %117 = vector.shape_cast %116 : vector<1x1x32xf32> to vector<1x32xf32>
    %118 = arith.addf %114, %117 : vector<1x32xf32>
    %c6_61 = arith.constant 6 : index
    %c0_62 = arith.constant 0 : index
    %119 = vector.load %arg33[%c6_61, %c0_62] : memref<8x32xf32, #tpu.memory_space<vmem>>, vector<1x32xf32>
    tpu.vector_store %arg33[%c6_61, %c0_62], %118 {strides = array<i32>} : memref<8x32xf32, #tpu.memory_space<vmem>>, vector<1x32xf32>,
    %c7_i32 = arith.constant 7 : i32
    %120 = arith.addi %0, %c7_i32 : i32
    %121 = arith.index_cast %120 : i32 to index
    %122 = memref.load %arg1[%121] : memref<16xi32, #tpu.memory_space<smem>>
    %c7_i32_63 = arith.constant 7 : i32
    %123 = arith.addi %0, %c7_i32_63 : i32
    %124 = arith.index_cast %123 : i32 to index
    %125 = memref.load %arg2[%124] : memref<16xi32, #tpu.memory_space<smem>>
    %126 = arith.index_cast %122 : i32 to index
    %c0_64 = arith.constant 0 : index
    %c0_65 = arith.constant 0 : index
    %127 = vector.load %arg4[%126, %c0_64, %c0_65] : memref<100x1x32xf32, #tpu.memory_space<vmem>>, vector<1x1x32xf32>
    %128 = vector.shape_cast %127 : vector<1x1x32xf32> to vector<1x32xf32>
    %c7 = arith.constant 7 : index
    %c0_66 = arith.constant 0 : index
    %c0_67 = arith.constant 0 : index
    %129 = vector.load %arg5[%c7, %c0_66, %c0_67] : memref<16x1x32xf32, #tpu.memory_space<vmem>>, vector<1x1x32xf32>
    %130 = vector.shape_cast %129 : vector<1x1x32xf32> to vector<1x32xf32>
    %131 = arith.addf %128, %130 : vector<1x32xf32>
    %132 = arith.index_cast %125 : i32 to index
    %c0_68 = arith.constant 0 : index
    %c0_69 = arith.constant 0 : index
    %133 = vector.load %arg6[%132, %c0_68, %c0_69] : memref<2x1x32xf32, #tpu.memory_space<vmem>>, vector<1x1x32xf32>
    %134 = vector.shape_cast %133 : vector<1x1x32xf32> to vector<1x32xf32>
    %135 = arith.addf %131, %134 : vector<1x32xf32>
    %c7_70 = arith.constant 7 : index
    %c0_71 = arith.constant 0 : index
    %136 = vector.load %arg33[%c7_70, %c0_71] : memref<8x32xf32, #tpu.memory_space<vmem>>, vector<1x32xf32>
    tpu.vector_store %arg33[%c7_70, %c0_71], %135 {strides = array<i32>} : memref<8x32xf32, #tpu.memory_space<vmem>>, vector<1x32xf32>,
    %c0_72 = arith.constant 0 : index
    %c0_73 = arith.constant 0 : index
    %137 = vector.load %arg33[%c0_72, %c0_73] : memref<8x32xf32, #tpu.memory_space<vmem>>, vector<8x32xf32>
    %c0_74 = arith.constant 0 : index
    %c0_75 = arith.constant 0 : index
    %138 = vector.load %arg7[%c0_74, %c0_75] : memref<1x32xf32, #tpu.memory_space<vmem>>, vector<1x32xf32>
    %c0_76 = arith.constant 0 : index
    %c0_77 = arith.constant 0 : index
    %139 = vector.load %arg8[%c0_76, %c0_77] : memref<1x32xf32, #tpu.memory_space<vmem>>, vector<1x32xf32>
    %cst = arith.constant dense<0.000000e+00> : vector<8xf32>
    %140 = vector.multi_reduction <add>, %137, %cst [1] : vector<8x32xf32> to vector<8xf32>
    %141 = vector.shape_cast %140 : vector<8xf32> to vector<8x1xf32>
    %cst_78 = arith.constant 3.200000e+01 : f32
    %142 = vector.broadcast %cst_78 : f32 to vector<8x1xf32>
    %143 = arith.divf %141, %142 : vector<8x1xf32>
    %144 = vector.broadcast %143 : vector<8x1xf32> to vector<8x32xf32>
    %145 = arith.subf %137, %144 : vector<8x32xf32>
    %146 = arith.mulf %145, %145 : vector<8x32xf32>
    %cst_79 = arith.constant dense<0.000000e+00> : vector<8xf32>
    %147 = vector.multi_reduction <add>, %146, %cst_79 [1] : vector<8x32xf32> to vector<8xf32>
    %148 = vector.shape_cast %147 : vector<8xf32> to vector<8x1xf32>
    %cst_80 = arith.constant 3.200000e+01 : f32
    %149 = vector.broadcast %cst_80 : f32 to vector<8x1xf32>
    %150 = arith.divf %148, %149 : vector<8x1xf32>
    %151 = vector.broadcast %143 : vector<8x1xf32> to vector<8x32xf32>
    %152 = arith.subf %137, %151 : vector<8x32xf32>
    %cst_81 = arith.constant 9.99999996E-13 : f32
    %153 = vector.broadcast %cst_81 : f32 to vector<8x1xf32>
    %154 = arith.addf %150, %153 : vector<8x1xf32>
    %155 = math.rsqrt %154 : vector<8x1xf32>
    %156 = vector.broadcast %155 : vector<8x1xf32> to vector<8x32xf32>
    %157 = arith.mulf %152, %156 : vector<8x32xf32>
    %158 = vector.broadcast %138 : vector<1x32xf32> to vector<8x32xf32>
    %159 = arith.mulf %157, %158 : vector<8x32xf32>
    %160 = vector.broadcast %139 : vector<1x32xf32> to vector<8x32xf32>
    %161 = arith.addf %159, %160 : vector<8x32xf32>
    %c0_82 = arith.constant 0 : index
    %c0_83 = arith.constant 0 : index
    %c0_84 = arith.constant 0 : index
    %162 = vector.load %arg3[%c0_82, %c0_83, %c0_84] : memref<1x1x8xf32, #tpu.memory_space<vmem>>, vector<1x1x8xf32>
    %cst_85 = arith.constant 1.000000e+00 : f32
    %163 = vector.broadcast %cst_85 : f32 to vector<1x1x8xf32>
    %164 = arith.subf %163, %162 : vector<1x1x8xf32>
    %cst_86 = arith.constant -1.000000e+09 : f32
    %165 = vector.broadcast %cst_86 : f32 to vector<1x1x8xf32>
    %166 = arith.mulf %164, %165 : vector<1x1x8xf32>
    %167 = vector.shape_cast %161 : vector<8x32xf32> to vector<1x8x32xf32>
    %168 = vector.broadcast %167 : vector<1x8x32xf32> to vector<4x8x32xf32>
    %c0_87 = arith.constant 0 : index
    %c0_88 = arith.constant 0 : index
    %c0_89 = arith.constant 0 : index
    %c0_90 = arith.constant 0 : index
    %169 = vector.load %arg9[%c0_87, %c0_88, %c0_89, %c0_90] : memref<2x4x32x8xf32, #tpu.memory_space<vmem>>, vector<1x4x32x8xf32>
    %170 = vector.shape_cast %169 : vector<1x4x32x8xf32> to vector<4x32x8xf32>
    "tpu.trace_start"() <{level = 10 : i32, message = "nsd,ndk->nsk"}> : () -> ()
    %cst_91 = arith.constant dense<0.000000e+00> : vector<4x8x8xf32>
    %171 = tpu.matmul %168, %170, %cst_91 {dimension_numbers = #tpu.dot_dimension_numbers<[2], [1], [1], [2], [0, 0, 0, 1, 1, 2], [0], [0]>} : vector<4x8x32xf32>, vector<4x32x8xf32>, vector<4x8x8xf32> -> vector<4x8x8xf32>
    "tpu.trace_stop"() : () -> ()
    %c0_92 = arith.constant 0 : index
    %c0_93 = arith.constant 0 : index
    %c0_94 = arith.constant 0 : index
    %c0_95 = arith.constant 0 : index
    %172 = vector.load %arg10[%c0_92, %c0_93, %c0_94, %c0_95] : memref<2x4x1x8xf32, #tpu.memory_space<vmem>>, vector<1x4x1x8xf32>
    %173 = vector.shape_cast %172 : vector<1x4x1x8xf32> to vector<4x1x8xf32>
    %174 = vector.broadcast %173 : vector<4x1x8xf32> to vector<4x8x8xf32>
    %175 = arith.addf %171, %174 : vector<4x8x8xf32>
    %c0_96 = arith.constant 0 : index
    %c0_97 = arith.constant 0 : index
    %c0_98 = arith.constant 0 : index
    %c0_99 = arith.constant 0 : index
    %176 = vector.load %arg11[%c0_96, %c0_97, %c0_98, %c0_99] : memref<2x4x32x8xf32, #tpu.memory_space<vmem>>, vector<1x4x32x8xf32>
    %177 = vector.shape_cast %176 : vector<1x4x32x8xf32> to vector<4x32x8xf32>
    "tpu.trace_start"() <{level = 10 : i32, message = "nsd,ndk->nsk"}> : () -> ()
    %cst_100 = arith.constant dense<0.000000e+00> : vector<4x8x8xf32>
    %178 = tpu.matmul %168, %177, %cst_100 {dimension_numbers = #tpu.dot_dimension_numbers<[2], [1], [1], [2], [0, 0, 0, 1, 1, 2], [0], [0]>} : vector<4x8x32xf32>, vector<4x32x8xf32>, vector<4x8x8xf32> -> vector<4x8x8xf32>
    "tpu.trace_stop"() : () -> ()
    %c0_101 = arith.constant 0 : index
    %c0_102 = arith.constant 0 : index
    %c0_103 = arith.constant 0 : index
    %c0_104 = arith.constant 0 : index
    %179 = vector.load %arg12[%c0_101, %c0_102, %c0_103, %c0_104] : memref<2x4x1x8xf32, #tpu.memory_space<vmem>>, vector<1x4x1x8xf32>
    %180 = vector.shape_cast %179 : vector<1x4x1x8xf32> to vector<4x1x8xf32>
    %181 = vector.broadcast %180 : vector<4x1x8xf32> to vector<4x8x8xf32>
    %182 = arith.addf %178, %181 : vector<4x8x8xf32>
    %c0_105 = arith.constant 0 : index
    %c0_106 = arith.constant 0 : index
    %c0_107 = arith.constant 0 : index
    %c0_108 = arith.constant 0 : index
    %183 = vector.load %arg13[%c0_105, %c0_106, %c0_107, %c0_108] : memref<2x4x32x8xf32, #tpu.memory_space<vmem>>, vector<1x4x32x8xf32>
    %184 = vector.shape_cast %183 : vector<1x4x32x8xf32> to vector<4x32x8xf32>
    "tpu.trace_start"() <{level = 10 : i32, message = "nsd,ndk->nsk"}> : () -> ()
    %cst_109 = arith.constant dense<0.000000e+00> : vector<4x8x8xf32>
    %185 = tpu.matmul %168, %184, %cst_109 {dimension_numbers = #tpu.dot_dimension_numbers<[2], [1], [1], [2], [0, 0, 0, 1, 1, 2], [0], [0]>} : vector<4x8x32xf32>, vector<4x32x8xf32>, vector<4x8x8xf32> -> vector<4x8x8xf32>
    "tpu.trace_stop"() : () -> ()
    %c0_110 = arith.constant 0 : index
    %c0_111 = arith.constant 0 : index
    %c0_112 = arith.constant 0 : index
    %c0_113 = arith.constant 0 : index
    %186 = vector.load %arg14[%c0_110, %c0_111, %c0_112, %c0_113] : memref<2x4x1x8xf32, #tpu.memory_space<vmem>>, vector<1x4x1x8xf32>
    %187 = vector.shape_cast %186 : vector<1x4x1x8xf32> to vector<4x1x8xf32>
    %188 = vector.broadcast %187 : vector<4x1x8xf32> to vector<4x8x8xf32>
    %189 = arith.addf %185, %188 : vector<4x8x8xf32>
    "tpu.trace_start"() <{level = 10 : i32, message = "nqd,nkd->nqk"}> : () -> ()
    %cst_114 = arith.constant dense<0.000000e+00> : vector<4x8x8xf32>
    %190 = tpu.matmul %175, %182, %cst_114 {dimension_numbers = #tpu.dot_dimension_numbers<[2], [2], [1], [1], [0, 0, 0, 1, 1, 1], [0], [0]>} : vector<4x8x8xf32>, vector<4x8x8xf32>, vector<4x8x8xf32> -> vector<4x8x8xf32>
    "tpu.trace_stop"() : () -> ()
    %cst_115 = arith.constant 0.353553385 : f32
    %191 = vector.broadcast %cst_115 : f32 to vector<4x8x8xf32>
    %192 = arith.mulf %190, %191 : vector<4x8x8xf32>
    %193 = vector.broadcast %166 : vector<1x1x8xf32> to vector<4x8x8xf32>
    %194 = arith.addf %192, %193 : vector<4x8x8xf32>
    %cst_116 = arith.constant dense<0xFF800000> : vector<4x8xf32>
    %195 = vector.multi_reduction <maximumf>, %194, %cst_116 [2] : vector<4x8x8xf32> to vector<4x8xf32>
    %196 = vector.shape_cast %195 : vector<4x8xf32> to vector<4x8x1xf32>
    %197 = vector.broadcast %196 : vector<4x8x1xf32> to vector<4x8x8xf32>
    %198 = arith.subf %194, %197 : vector<4x8x8xf32>
    %199 = math.exp %198 : vector<4x8x8xf32>
    %cst_117 = arith.constant dense<0.000000e+00> : vector<4x8xf32>
    %200 = vector.multi_reduction <add>, %199, %cst_117 [2] : vector<4x8x8xf32> to vector<4x8xf32>
    %201 = vector.shape_cast %200 : vector<4x8xf32> to vector<4x8x1xf32>
    %202 = vector.broadcast %201 : vector<4x8x1xf32> to vector<4x8x8xf32>
    %203 = arith.divf %199, %202 : vector<4x8x8xf32>
    "tpu.trace_start"() <{level = 10 : i32, message = "nqk,nkd->nqd"}> : () -> ()
    %cst_118 = arith.constant dense<0.000000e+00> : vector<4x8x8xf32>
    %204 = tpu.matmul %203, %189, %cst_118 {dimension_numbers = #tpu.dot_dimension_numbers<[2], [1], [1], [2], [0, 0, 0, 1, 1, 2], [0], [0]>} : vector<4x8x8xf32>, vector<4x8x8xf32>, vector<4x8x8xf32> -> vector<4x8x8xf32>
    "tpu.trace_stop"() : () -> ()
    %c0_119 = arith.constant 0 : index
    %c0_120 = arith.constant 0 : index
    %c0_121 = arith.constant 0 : index
    %c0_122 = arith.constant 0 : index
    %205 = vector.load %arg15[%c0_119, %c0_120, %c0_121, %c0_122] : memref<2x4x8x32xf32, #tpu.memory_space<vmem>>, vector<1x4x8x32xf32>
    %206 = vector.shape_cast %205 : vector<1x4x8x32xf32> to vector<4x8x32xf32>
    "tpu.trace_start"() <{level = 10 : i32, message = "nsd,ndh->nsh"}> : () -> ()
    %cst_123 = arith.constant dense<0.000000e+00> : vector<4x8x32xf32>
    %207 = tpu.matmul %204, %206, %cst_123 {dimension_numbers = #tpu.dot_dimension_numbers<[2], [1], [1], [2], [0, 0, 0, 1, 1, 2], [0], [0]>} : vector<4x8x8xf32>, vector<4x8x32xf32>, vector<4x8x32xf32> -> vector<4x8x32xf32>
    "tpu.trace_stop"() : () -> ()
    %cst_124 = arith.constant dense<0.000000e+00> : vector<8x32xf32>
    %208 = vector.multi_reduction <add>, %207, %cst_124 [0] : vector<4x8x32xf32> to vector<8x32xf32>
    %c0_125 = arith.constant 0 : index
    %c0_126 = arith.constant 0 : index
    %c0_127 = arith.constant 0 : index
    %209 = vector.load %arg16[%c0_125, %c0_126, %c0_127] : memref<2x1x32xf32, #tpu.memory_space<vmem>>, vector<1x1x32xf32>
    %210 = vector.shape_cast %209 : vector<1x1x32xf32> to vector<1x32xf32>
    %211 = vector.broadcast %210 : vector<1x32xf32> to vector<8x32xf32>
    %212 = arith.addf %208, %211 : vector<8x32xf32>
    %213 = arith.addf %212, %161 : vector<8x32xf32>
    %c0_128 = arith.constant 0 : index
    %c0_129 = arith.constant 0 : index
    %c0_130 = arith.constant 0 : index
    %214 = vector.load %arg17[%c0_128, %c0_129, %c0_130] : memref<2x1x32xf32, #tpu.memory_space<vmem>>, vector<1x1x32xf32>
    %215 = vector.shape_cast %214 : vector<1x1x32xf32> to vector<1x32xf32>
    %c0_131 = arith.constant 0 : index
    %c0_132 = arith.constant 0 : index
    %c0_133 = arith.constant 0 : index
    %216 = vector.load %arg18[%c0_131, %c0_132, %c0_133] : memref<2x1x32xf32, #tpu.memory_space<vmem>>, vector<1x1x32xf32>
    %217 = vector.shape_cast %216 : vector<1x1x32xf32> to vector<1x32xf32>
    %cst_134 = arith.constant dense<0.000000e+00> : vector<8xf32>
    %218 = vector.multi_reduction <add>, %213, %cst_134 [1] : vector<8x32xf32> to vector<8xf32>
    %219 = vector.shape_cast %218 : vector<8xf32> to vector<8x1xf32>
    %cst_135 = arith.constant 3.200000e+01 : f32
    %220 = vector.broadcast %cst_135 : f32 to vector<8x1xf32>
    %221 = arith.divf %219, %220 : vector<8x1xf32>
    %222 = vector.broadcast %221 : vector<8x1xf32> to vector<8x32xf32>
    %223 = arith.subf %213, %222 : vector<8x32xf32>
    %224 = arith.mulf %223, %223 : vector<8x32xf32>
    %cst_136 = arith.constant dense<0.000000e+00> : vector<8xf32>
    %225 = vector.multi_reduction <add>, %224, %cst_136 [1] : vector<8x32xf32> to vector<8xf32>
    %226 = vector.shape_cast %225 : vector<8xf32> to vector<8x1xf32>
    %cst_137 = arith.constant 3.200000e+01 : f32
    %227 = vector.broadcast %cst_137 : f32 to vector<8x1xf32>
    %228 = arith.divf %226, %227 : vector<8x1xf32>
    %229 = vector.broadcast %221 : vector<8x1xf32> to vector<8x32xf32>
    %230 = arith.subf %213, %229 : vector<8x32xf32>
    %cst_138 = arith.constant 9.99999996E-13 : f32
    %231 = vector.broadcast %cst_138 : f32 to vector<8x1xf32>
    %232 = arith.addf %228, %231 : vector<8x1xf32>
    %233 = math.rsqrt %232 : vector<8x1xf32>
    %234 = vector.broadcast %233 : vector<8x1xf32> to vector<8x32xf32>
    %235 = arith.mulf %230, %234 : vector<8x32xf32>
    %236 = vector.broadcast %215 : vector<1x32xf32> to vector<8x32xf32>
    %237 = arith.mulf %235, %236 : vector<8x32xf32>
    %238 = vector.broadcast %217 : vector<1x32xf32> to vector<8x32xf32>
    %239 = arith.addf %237, %238 : vector<8x32xf32>
    %c0_139 = arith.constant 0 : index
    %c0_140 = arith.constant 0 : index
    %c0_141 = arith.constant 0 : index
    %240 = vector.load %arg19[%c0_139, %c0_140, %c0_141] : memref<2x32x64xf32, #tpu.memory_space<vmem>>, vector<1x32x64xf32>
    %241 = vector.shape_cast %240 : vector<1x32x64xf32> to vector<32x64xf32>
    %cst_142 = arith.constant dense<0.000000e+00> : vector<8x64xf32>
    %242 = tpu.matmul %239, %241, %cst_142 {dimension_numbers = #tpu.dot_dimension_numbers<[1], [0], [0], [1], [0, 0, 1, 1], [], []>} : vector<8x32xf32>, vector<32x64xf32>, vector<8x64xf32> -> vector<8x64xf32>
    %c0_143 = arith.constant 0 : index
    %c0_144 = arith.constant 0 : index
    %c0_145 = arith.constant 0 : index
    %243 = vector.load %arg20[%c0_143, %c0_144, %c0_145] : memref<2x1x64xf32, #tpu.memory_space<vmem>>, vector<1x1x64xf32>
    %244 = vector.shape_cast %243 : vector<1x1x64xf32> to vector<1x64xf32>
    %245 = vector.broadcast %244 : vector<1x64xf32> to vector<8x64xf32>
    %246 = arith.addf %242, %245 : vector<8x64xf32>
    %247 = arith.mulf %246, %246 : vector<8x64xf32>
    %248 = arith.mulf %246, %247 : vector<8x64xf32>
    %cst_146 = arith.constant 4.471500e-02 : f32
    %249 = vector.broadcast %cst_146 : f32 to vector<8x64xf32>
    %250 = arith.mulf %249, %248 : vector<8x64xf32>
    %251 = arith.addf %246, %250 : vector<8x64xf32>
    %cst_147 = arith.constant 0.797884583 : f32
    %252 = vector.broadcast %cst_147 : f32 to vector<8x64xf32>
    %253 = arith.mulf %252, %251 : vector<8x64xf32>
    %254 = math.tanh %253 : vector<8x64xf32>
    %cst_148 = arith.constant 1.000000e+00 : f32
    %255 = vector.broadcast %cst_148 : f32 to vector<8x64xf32>
    %256 = arith.addf %255, %254 : vector<8x64xf32>
    %cst_149 = arith.constant 5.000000e-01 : f32
    %257 = vector.broadcast %cst_149 : f32 to vector<8x64xf32>
    %258 = arith.mulf %257, %256 : vector<8x64xf32>
    %259 = arith.mulf %246, %258 : vector<8x64xf32>
    %c0_150 = arith.constant 0 : index
    %c0_151 = arith.constant 0 : index
    %c0_152 = arith.constant 0 : index
    %260 = vector.load %arg21[%c0_150, %c0_151, %c0_152] : memref<2x64x32xf32, #tpu.memory_space<vmem>>, vector<1x64x32xf32>
    %261 = vector.shape_cast %260 : vector<1x64x32xf32> to vector<64x32xf32>
    %cst_153 = arith.constant dense<0.000000e+00> : vector<8x32xf32>
    %262 = tpu.matmul %259, %261, %cst_153 {dimension_numbers = #tpu.dot_dimension_numbers<[1], [0], [0], [1], [0, 0, 1, 1], [], []>} : vector<8x64xf32>, vector<64x32xf32>, vector<8x32xf32> -> vector<8x32xf32>
    %c0_154 = arith.constant 0 : index
    %c0_155 = arith.constant 0 : index
    %c0_156 = arith.constant 0 : index
    %263 = vector.load %arg22[%c0_154, %c0_155, %c0_156] : memref<2x1x32xf32, #tpu.memory_space<vmem>>, vector<1x1x32xf32>
    %264 = vector.shape_cast %263 : vector<1x1x32xf32> to vector<1x32xf32>
    %265 = vector.broadcast %264 : vector<1x32xf32> to vector<8x32xf32>
    %266 = arith.addf %262, %265 : vector<8x32xf32>
    %267 = arith.addf %266, %239 : vector<8x32xf32>
    %c0_157 = arith.constant 0 : index
    %c0_158 = arith.constant 0 : index
    %c0_159 = arith.constant 0 : index
    %268 = vector.load %arg23[%c0_157, %c0_158, %c0_159] : memref<2x1x32xf32, #tpu.memory_space<vmem>>, vector<1x1x32xf32>
    %269 = vector.shape_cast %268 : vector<1x1x32xf32> to vector<1x32xf32>
    %c0_160 = arith.constant 0 : index
    %c0_161 = arith.constant 0 : index
    %c0_162 = arith.constant 0 : index
    %270 = vector.load %arg24[%c0_160, %c0_161, %c0_162] : memref<2x1x32xf32, #tpu.memory_space<vmem>>, vector<1x1x32xf32>
    %271 = vector.shape_cast %270 : vector<1x1x32xf32> to vector<1x32xf32>
    %cst_163 = arith.constant dense<0.000000e+00> : vector<8xf32>
    %272 = vector.multi_reduction <add>, %267, %cst_163 [1] : vector<8x32xf32> to vector<8xf32>
    %273 = vector.shape_cast %272 : vector<8xf32> to vector<8x1xf32>
    %cst_164 = arith.constant 3.200000e+01 : f32
    %274 = vector.broadcast %cst_164 : f32 to vector<8x1xf32>
    %275 = arith.divf %273, %274 : vector<8x1xf32>
    %276 = vector.broadcast %275 : vector<8x1xf32> to vector<8x32xf32>
    %277 = arith.subf %267, %276 : vector<8x32xf32>
    %278 = arith.mulf %277, %277 : vector<8x32xf32>
    %cst_165 = arith.constant dense<0.000000e+00> : vector<8xf32>
    %279 = vector.multi_reduction <add>, %278, %cst_165 [1] : vector<8x32xf32> to vector<8xf32>
    %280 = vector.shape_cast %279 : vector<8xf32> to vector<8x1xf32>
    %cst_166 = arith.constant 3.200000e+01 : f32
    %281 = vector.broadcast %cst_166 : f32 to vector<8x1xf32>
    %282 = arith.divf %280, %281 : vector<8x1xf32>
    %283 = vector.broadcast %275 : vector<8x1xf32> to vector<8x32xf32>
    %284 = arith.subf %267, %283 : vector<8x32xf32>
    %cst_167 = arith.constant 9.99999996E-13 : f32
    %285 = vector.broadcast %cst_167 : f32 to vector<8x1xf32>
    %286 = arith.addf %282, %285 : vector<8x1xf32>
    %287 = math.rsqrt %286 : vector<8x1xf32>
    %288 = vector.broadcast %287 : vector<8x1xf32> to vector<8x32xf32>
    %289 = arith.mulf %284, %288 : vector<8x32xf32>
    %290 = vector.broadcast %269 : vector<1x32xf32> to vector<8x32xf32>
    %291 = arith.mulf %289, %290 : vector<8x32xf32>
    %292 = vector.broadcast %271 : vector<1x32xf32> to vector<8x32xf32>
    %293 = arith.addf %291, %292 : vector<8x32xf32>
    %294 = vector.shape_cast %293 : vector<8x32xf32> to vector<1x8x32xf32>
    %295 = vector.broadcast %294 : vector<1x8x32xf32> to vector<4x8x32xf32>
    %c1_168 = arith.constant 1 : index
    %c0_169 = arith.constant 0 : index
    %c0_170 = arith.constant 0 : index
    %c0_171 = arith.constant 0 : index
    %296 = vector.load %arg9[%c1_168, %c0_169, %c0_170, %c0_171] : memref<2x4x32x8xf32, #tpu.memory_space<vmem>>, vector<1x4x32x8xf32>
    %297 = vector.shape_cast %296 : vector<1x4x32x8xf32> to vector<4x32x8xf32>
    "tpu.trace_start"() <{level = 10 : i32, message = "nsd,ndk->nsk"}> : () -> ()
    %cst_172 = arith.constant dense<0.000000e+00> : vector<4x8x8xf32>
    %298 = tpu.matmul %295, %297, %cst_172 {dimension_numbers = #tpu.dot_dimension_numbers<[2], [1], [1], [2], [0, 0, 0, 1, 1, 2], [0], [0]>} : vector<4x8x32xf32>, vector<4x32x8xf32>, vector<4x8x8xf32> -> vector<4x8x8xf32>
    "tpu.trace_stop"() : () -> ()
    %c1_173 = arith.constant 1 : index
    %c0_174 = arith.constant 0 : index
    %c0_175 = arith.constant 0 : index
    %c0_176 = arith.constant 0 : index
    %299 = vector.load %arg10[%c1_173, %c0_174, %c0_175, %c0_176] : memref<2x4x1x8xf32, #tpu.memory_space<vmem>>, vector<1x4x1x8xf32>
    %300 = vector.shape_cast %299 : vector<1x4x1x8xf32> to vector<4x1x8xf32>
    %301 = vector.broadcast %300 : vector<4x1x8xf32> to vector<4x8x8xf32>
    %302 = arith.addf %298, %301 : vector<4x8x8xf32>
    %c1_177 = arith.constant 1 : index
    %c0_178 = arith.constant 0 : index
    %c0_179 = arith.constant 0 : index
    %c0_180 = arith.constant 0 : index
    %303 = vector.load %arg11[%c1_177, %c0_178, %c0_179, %c0_180] : memref<2x4x32x8xf32, #tpu.memory_space<vmem>>, vector<1x4x32x8xf32>
    %304 = vector.shape_cast %303 : vector<1x4x32x8xf32> to vector<4x32x8xf32>
    "tpu.trace_start"() <{level = 10 : i32, message = "nsd,ndk->nsk"}> : () -> ()
    %cst_181 = arith.constant dense<0.000000e+00> : vector<4x8x8xf32>
    %305 = tpu.matmul %295, %304, %cst_181 {dimension_numbers = #tpu.dot_dimension_numbers<[2], [1], [1], [2], [0, 0, 0, 1, 1, 2], [0], [0]>} : vector<4x8x32xf32>, vector<4x32x8xf32>, vector<4x8x8xf32> -> vector<4x8x8xf32>
    "tpu.trace_stop"() : () -> ()
    %c1_182 = arith.constant 1 : index
    %c0_183 = arith.constant 0 : index
    %c0_184 = arith.constant 0 : index
    %c0_185 = arith.constant 0 : index
    %306 = vector.load %arg12[%c1_182, %c0_183, %c0_184, %c0_185] : memref<2x4x1x8xf32, #tpu.memory_space<vmem>>, vector<1x4x1x8xf32>
    %307 = vector.shape_cast %306 : vector<1x4x1x8xf32> to vector<4x1x8xf32>
    %308 = vector.broadcast %307 : vector<4x1x8xf32> to vector<4x8x8xf32>
    %309 = arith.addf %305, %308 : vector<4x8x8xf32>
    %c1_186 = arith.constant 1 : index
    %c0_187 = arith.constant 0 : index
    %c0_188 = arith.constant 0 : index
    %c0_189 = arith.constant 0 : index
    %310 = vector.load %arg13[%c1_186, %c0_187, %c0_188, %c0_189] : memref<2x4x32x8xf32, #tpu.memory_space<vmem>>, vector<1x4x32x8xf32>
    %311 = vector.shape_cast %310 : vector<1x4x32x8xf32> to vector<4x32x8xf32>
    "tpu.trace_start"() <{level = 10 : i32, message = "nsd,ndk->nsk"}> : () -> ()
    %cst_190 = arith.constant dense<0.000000e+00> : vector<4x8x8xf32>
    %312 = tpu.matmul %295, %311, %cst_190 {dimension_numbers = #tpu.dot_dimension_numbers<[2], [1], [1], [2], [0, 0, 0, 1, 1, 2], [0], [0]>} : vector<4x8x32xf32>, vector<4x32x8xf32>, vector<4x8x8xf32> -> vector<4x8x8xf32>
    "tpu.trace_stop"() : () -> ()
    %c1_191 = arith.constant 1 : index
    %c0_192 = arith.constant 0 : index
    %c0_193 = arith.constant 0 : index
    %c0_194 = arith.constant 0 : index
    %313 = vector.load %arg14[%c1_191, %c0_192, %c0_193, %c0_194] : memref<2x4x1x8xf32, #tpu.memory_space<vmem>>, vector<1x4x1x8xf32>
    %314 = vector.shape_cast %313 : vector<1x4x1x8xf32> to vector<4x1x8xf32>
    %315 = vector.broadcast %314 : vector<4x1x8xf32> to vector<4x8x8xf32>
    %316 = arith.addf %312, %315 : vector<4x8x8xf32>
    "tpu.trace_start"() <{level = 10 : i32, message = "nqd,nkd->nqk"}> : () -> ()
    %cst_195 = arith.constant dense<0.000000e+00> : vector<4x8x8xf32>
    %317 = tpu.matmul %302, %309, %cst_195 {dimension_numbers = #tpu.dot_dimension_numbers<[2], [2], [1], [1], [0, 0, 0, 1, 1, 1], [0], [0]>} : vector<4x8x8xf32>, vector<4x8x8xf32>, vector<4x8x8xf32> -> vector<4x8x8xf32>
    "tpu.trace_stop"() : () -> ()
    %cst_196 = arith.constant 0.353553385 : f32
    %318 = vector.broadcast %cst_196 : f32 to vector<4x8x8xf32>
    %319 = arith.mulf %317, %318 : vector<4x8x8xf32>
    %320 = vector.broadcast %166 : vector<1x1x8xf32> to vector<4x8x8xf32>
    %321 = arith.addf %319, %320 : vector<4x8x8xf32>
    %cst_197 = arith.constant dense<0xFF800000> : vector<4x8xf32>
    %322 = vector.multi_reduction <maximumf>, %321, %cst_197 [2] : vector<4x8x8xf32> to vector<4x8xf32>
    %323 = vector.shape_cast %322 : vector<4x8xf32> to vector<4x8x1xf32>
    %324 = vector.broadcast %323 : vector<4x8x1xf32> to vector<4x8x8xf32>
    %325 = arith.subf %321, %324 : vector<4x8x8xf32>
    %326 = math.exp %325 : vector<4x8x8xf32>
    %cst_198 = arith.constant dense<0.000000e+00> : vector<4x8xf32>
    %327 = vector.multi_reduction <add>, %326, %cst_198 [2] : vector<4x8x8xf32> to vector<4x8xf32>
    %328 = vector.shape_cast %327 : vector<4x8xf32> to vector<4x8x1xf32>
    %329 = vector.broadcast %328 : vector<4x8x1xf32> to vector<4x8x8xf32>
    %330 = arith.divf %326, %329 : vector<4x8x8xf32>
    "tpu.trace_start"() <{level = 10 : i32, message = "nqk,nkd->nqd"}> : () -> ()
    %cst_199 = arith.constant dense<0.000000e+00> : vector<4x8x8xf32>
    %331 = tpu.matmul %330, %316, %cst_199 {dimension_numbers = #tpu.dot_dimension_numbers<[2], [1], [1], [2], [0, 0, 0, 1, 1, 2], [0], [0]>} : vector<4x8x8xf32>, vector<4x8x8xf32>, vector<4x8x8xf32> -> vector<4x8x8xf32>
    "tpu.trace_stop"() : () -> ()
    %c1_200 = arith.constant 1 : index
    %c0_201 = arith.constant 0 : index
    %c0_202 = arith.constant 0 : index
    %c0_203 = arith.constant 0 : index
    %332 = vector.load %arg15[%c1_200, %c0_201, %c0_202, %c0_203] : memref<2x4x8x32xf32, #tpu.memory_space<vmem>>, vector<1x4x8x32xf32>
    %333 = vector.shape_cast %332 : vector<1x4x8x32xf32> to vector<4x8x32xf32>
    "tpu.trace_start"() <{level = 10 : i32, message = "nsd,ndh->nsh"}> : () -> ()
    %cst_204 = arith.constant dense<0.000000e+00> : vector<4x8x32xf32>
    %334 = tpu.matmul %331, %333, %cst_204 {dimension_numbers = #tpu.dot_dimension_numbers<[2], [1], [1], [2], [0, 0, 0, 1, 1, 2], [0], [0]>} : vector<4x8x8xf32>, vector<4x8x32xf32>, vector<4x8x32xf32> -> vector<4x8x32xf32>
    "tpu.trace_stop"() : () -> ()
    %cst_205 = arith.constant dense<0.000000e+00> : vector<8x32xf32>
    %335 = vector.multi_reduction <add>, %334, %cst_205 [0] : vector<4x8x32xf32> to vector<8x32xf32>
    %c1_206 = arith.constant 1 : index
    %c0_207 = arith.constant 0 : index
    %c0_208 = arith.constant 0 : index
    %336 = vector.load %arg16[%c1_206, %c0_207, %c0_208] : memref<2x1x32xf32, #tpu.memory_space<vmem>>, vector<1x1x32xf32>
    %337 = vector.shape_cast %336 : vector<1x1x32xf32> to vector<1x32xf32>
    %338 = vector.broadcast %337 : vector<1x32xf32> to vector<8x32xf32>
    %339 = arith.addf %335, %338 : vector<8x32xf32>
    %340 = arith.addf %339, %293 : vector<8x32xf32>
    %c1_209 = arith.constant 1 : index
    %c0_210 = arith.constant 0 : index
    %c0_211 = arith.constant 0 : index
    %341 = vector.load %arg17[%c1_209, %c0_210, %c0_211] : memref<2x1x32xf32, #tpu.memory_space<vmem>>, vector<1x1x32xf32>
    %342 = vector.shape_cast %341 : vector<1x1x32xf32> to vector<1x32xf32>
    %c1_212 = arith.constant 1 : index
    %c0_213 = arith.constant 0 : index
    %c0_214 = arith.constant 0 : index
    %343 = vector.load %arg18[%c1_212, %c0_213, %c0_214] : memref<2x1x32xf32, #tpu.memory_space<vmem>>, vector<1x1x32xf32>
    %344 = vector.shape_cast %343 : vector<1x1x32xf32> to vector<1x32xf32>
    %cst_215 = arith.constant dense<0.000000e+00> : vector<8xf32>
    %345 = vector.multi_reduction <add>, %340, %cst_215 [1] : vector<8x32xf32> to vector<8xf32>
    %346 = vector.shape_cast %345 : vector<8xf32> to vector<8x1xf32>
    %cst_216 = arith.constant 3.200000e+01 : f32
    %347 = vector.broadcast %cst_216 : f32 to vector<8x1xf32>
    %348 = arith.divf %346, %347 : vector<8x1xf32>
    %349 = vector.broadcast %348 : vector<8x1xf32> to vector<8x32xf32>
    %350 = arith.subf %340, %349 : vector<8x32xf32>
    %351 = arith.mulf %350, %350 : vector<8x32xf32>
    %cst_217 = arith.constant dense<0.000000e+00> : vector<8xf32>
    %352 = vector.multi_reduction <add>, %351, %cst_217 [1] : vector<8x32xf32> to vector<8xf32>
    %353 = vector.shape_cast %352 : vector<8xf32> to vector<8x1xf32>
    %cst_218 = arith.constant 3.200000e+01 : f32
    %354 = vector.broadcast %cst_218 : f32 to vector<8x1xf32>
    %355 = arith.divf %353, %354 : vector<8x1xf32>
    %356 = vector.broadcast %348 : vector<8x1xf32> to vector<8x32xf32>
    %357 = arith.subf %340, %356 : vector<8x32xf32>
    %cst_219 = arith.constant 9.99999996E-13 : f32
    %358 = vector.broadcast %cst_219 : f32 to vector<8x1xf32>
    %359 = arith.addf %355, %358 : vector<8x1xf32>
    %360 = math.rsqrt %359 : vector<8x1xf32>
    %361 = vector.broadcast %360 : vector<8x1xf32> to vector<8x32xf32>
    %362 = arith.mulf %357, %361 : vector<8x32xf32>
    %363 = vector.broadcast %342 : vector<1x32xf32> to vector<8x32xf32>
    %364 = arith.mulf %362, %363 : vector<8x32xf32>
    %365 = vector.broadcast %344 : vector<1x32xf32> to vector<8x32xf32>
    %366 = arith.addf %364, %365 : vector<8x32xf32>
    %c1_220 = arith.constant 1 : index
    %c0_221 = arith.constant 0 : index
    %c0_222 = arith.constant 0 : index
    %367 = vector.load %arg19[%c1_220, %c0_221, %c0_222] : memref<2x32x64xf32, #tpu.memory_space<vmem>>, vector<1x32x64xf32>
    %368 = vector.shape_cast %367 : vector<1x32x64xf32> to vector<32x64xf32>
    %cst_223 = arith.constant dense<0.000000e+00> : vector<8x64xf32>
    %369 = tpu.matmul %366, %368, %cst_223 {dimension_numbers = #tpu.dot_dimension_numbers<[1], [0], [0], [1], [0, 0, 1, 1], [], []>} : vector<8x32xf32>, vector<32x64xf32>, vector<8x64xf32> -> vector<8x64xf32>
    %c1_224 = arith.constant 1 : index
    %c0_225 = arith.constant 0 : index
    %c0_226 = arith.constant 0 : index
    %370 = vector.load %arg20[%c1_224, %c0_225, %c0_226] : memref<2x1x64xf32, #tpu.memory_space<vmem>>, vector<1x1x64xf32>
    %371 = vector.shape_cast %370 : vector<1x1x64xf32> to vector<1x64xf32>
    %372 = vector.broadcast %371 : vector<1x64xf32> to vector<8x64xf32>
    %373 = arith.addf %369, %372 : vector<8x64xf32>
    %374 = arith.mulf %373, %373 : vector<8x64xf32>
    %375 = arith.mulf %373, %374 : vector<8x64xf32>
    %cst_227 = arith.constant 4.471500e-02 : f32
    %376 = vector.broadcast %cst_227 : f32 to vector<8x64xf32>
    %377 = arith.mulf %376, %375 : vector<8x64xf32>
    %378 = arith.addf %373, %377 : vector<8x64xf32>
    %cst_228 = arith.constant 0.797884583 : f32
    %379 = vector.broadcast %cst_228 : f32 to vector<8x64xf32>
    %380 = arith.mulf %379, %378 : vector<8x64xf32>
    %381 = math.tanh %380 : vector<8x64xf32>
    %cst_229 = arith.constant 1.000000e+00 : f32
    %382 = vector.broadcast %cst_229 : f32 to vector<8x64xf32>
    %383 = arith.addf %382, %381 : vector<8x64xf32>
    %cst_230 = arith.constant 5.000000e-01 : f32
    %384 = vector.broadcast %cst_230 : f32 to vector<8x64xf32>
    %385 = arith.mulf %384, %383 : vector<8x64xf32>
    %386 = arith.mulf %373, %385 : vector<8x64xf32>
    %c1_231 = arith.constant 1 : index
    %c0_232 = arith.constant 0 : index
    %c0_233 = arith.constant 0 : index
    %387 = vector.load %arg21[%c1_231, %c0_232, %c0_233] : memref<2x64x32xf32, #tpu.memory_space<vmem>>, vector<1x64x32xf32>
    %388 = vector.shape_cast %387 : vector<1x64x32xf32> to vector<64x32xf32>
    %cst_234 = arith.constant dense<0.000000e+00> : vector<8x32xf32>
    %389 = tpu.matmul %386, %388, %cst_234 {dimension_numbers = #tpu.dot_dimension_numbers<[1], [0], [0], [1], [0, 0, 1, 1], [], []>} : vector<8x64xf32>, vector<64x32xf32>, vector<8x32xf32> -> vector<8x32xf32>
    %c1_235 = arith.constant 1 : index
    %c0_236 = arith.constant 0 : index
    %c0_237 = arith.constant 0 : index
    %390 = vector.load %arg22[%c1_235, %c0_236, %c0_237] : memref<2x1x32xf32, #tpu.memory_space<vmem>>, vector<1x1x32xf32>
    %391 = vector.shape_cast %390 : vector<1x1x32xf32> to vector<1x32xf32>
    %392 = vector.broadcast %391 : vector<1x32xf32> to vector<8x32xf32>
    %393 = arith.addf %389, %392 : vector<8x32xf32>
    %394 = arith.addf %393, %366 : vector<8x32xf32>
    %c1_238 = arith.constant 1 : index
    %c0_239 = arith.constant 0 : index
    %c0_240 = arith.constant 0 : index
    %395 = vector.load %arg23[%c1_238, %c0_239, %c0_240] : memref<2x1x32xf32, #tpu.memory_space<vmem>>, vector<1x1x32xf32>
    %396 = vector.shape_cast %395 : vector<1x1x32xf32> to vector<1x32xf32>
    %c1_241 = arith.constant 1 : index
    %c0_242 = arith.constant 0 : index
    %c0_243 = arith.constant 0 : index
    %397 = vector.load %arg24[%c1_241, %c0_242, %c0_243] : memref<2x1x32xf32, #tpu.memory_space<vmem>>, vector<1x1x32xf32>
    %398 = vector.shape_cast %397 : vector<1x1x32xf32> to vector<1x32xf32>
    %cst_244 = arith.constant dense<0.000000e+00> : vector<8xf32>
    %399 = vector.multi_reduction <add>, %394, %cst_244 [1] : vector<8x32xf32> to vector<8xf32>
    %400 = vector.shape_cast %399 : vector<8xf32> to vector<8x1xf32>
    %cst_245 = arith.constant 3.200000e+01 : f32
    %401 = vector.broadcast %cst_245 : f32 to vector<8x1xf32>
    %402 = arith.divf %400, %401 : vector<8x1xf32>
    %403 = vector.broadcast %402 : vector<8x1xf32> to vector<8x32xf32>
    %404 = arith.subf %394, %403 : vector<8x32xf32>
    %405 = arith.mulf %404, %404 : vector<8x32xf32>
    %cst_246 = arith.constant dense<0.000000e+00> : vector<8xf32>
    %406 = vector.multi_reduction <add>, %405, %cst_246 [1] : vector<8x32xf32> to vector<8xf32>
    %407 = vector.shape_cast %406 : vector<8xf32> to vector<8x1xf32>
    %cst_247 = arith.constant 3.200000e+01 : f32
    %408 = vector.broadcast %cst_247 : f32 to vector<8x1xf32>
    %409 = arith.divf %407, %408 : vector<8x1xf32>
    %410 = vector.broadcast %402 : vector<8x1xf32> to vector<8x32xf32>
    %411 = arith.subf %394, %410 : vector<8x32xf32>
    %cst_248 = arith.constant 9.99999996E-13 : f32
    %412 = vector.broadcast %cst_248 : f32 to vector<8x1xf32>
    %413 = arith.addf %409, %412 : vector<8x1xf32>
    %414 = math.rsqrt %413 : vector<8x1xf32>
    %415 = vector.broadcast %414 : vector<8x1xf32> to vector<8x32xf32>
    %416 = arith.mulf %411, %415 : vector<8x32xf32>
    %417 = vector.broadcast %396 : vector<1x32xf32> to vector<8x32xf32>
    %418 = arith.mulf %416, %417 : vector<8x32xf32>
    %419 = vector.broadcast %398 : vector<1x32xf32> to vector<8x32xf32>
    %420 = arith.addf %418, %419 : vector<8x32xf32>
    %421 = vector.extract_strided_slice %420 {offsets = [0, 0], sizes = [1, 32], strides = [1, 1]} : vector<8x32xf32> to vector<1x32xf32>
    %c0_249 = arith.constant 0 : index
    %c0_250 = arith.constant 0 : index
    %422 = vector.load %arg25[%c0_249, %c0_250] : memref<32x32xf32, #tpu.memory_space<vmem>>, vector<32x32xf32>
    %cst_251 = arith.constant dense<0.000000e+00> : vector<1x32xf32>
    %423 = tpu.matmul %421, %422, %cst_251 {dimension_numbers = #tpu.dot_dimension_numbers<[1], [0], [0], [1], [0, 0, 1, 1], [], []>} : vector<1x32xf32>, vector<32x32xf32>, vector<1x32xf32> -> vector<1x32xf32>
    %c0_252 = arith.constant 0 : index
    %c0_253 = arith.constant 0 : index
    %424 = vector.load %arg26[%c0_252, %c0_253] : memref<1x32xf32, #tpu.memory_space<vmem>>, vector<1x32xf32>
    %425 = arith.addf %423, %424 : vector<1x32xf32>
    %426 = math.tanh %425 : vector<1x32xf32>
    %c0_254 = arith.constant 0 : index
    %c0_255 = arith.constant 0 : index
    %427 = vector.load %arg27[%c0_254, %c0_255] : memref<1x32xf32, #tpu.memory_space<vmem>>, vector<1x32xf32>
    %c0_256 = arith.constant 0 : index
    %c0_257 = arith.constant 0 : index
    %428 = vector.load %arg28[%c0_256, %c0_257] : memref<1x32xf32, #tpu.memory_space<vmem>>, vector<1x32xf32>
    %cst_258 = arith.constant dense<0.000000e+00> : vector<1xf32>
    %429 = vector.multi_reduction <add>, %426, %cst_258 [1] : vector<1x32xf32> to vector<1xf32>
    %430 = vector.shape_cast %429 : vector<1xf32> to vector<1x1xf32>
    %cst_259 = arith.constant 3.200000e+01 : f32
    %431 = vector.broadcast %cst_259 : f32 to vector<1x1xf32>
    %432 = arith.divf %430, %431 : vector<1x1xf32>
    %433 = vector.broadcast %432 : vector<1x1xf32> to vector<1x32xf32>
    %434 = arith.subf %426, %433 : vector<1x32xf32>
    %435 = arith.mulf %434, %434 : vector<1x32xf32>
    %cst_260 = arith.constant dense<0.000000e+00> : vector<1xf32>
    %436 = vector.multi_reduction <add>, %435, %cst_260 [1] : vector<1x32xf32> to vector<1xf32>
    %437 = vector.shape_cast %436 : vector<1xf32> to vector<1x1xf32>
    %cst_261 = arith.constant 3.200000e+01 : f32
    %438 = vector.broadcast %cst_261 : f32 to vector<1x1xf32>
    %439 = arith.divf %437, %438 : vector<1x1xf32>
    %440 = vector.broadcast %432 : vector<1x1xf32> to vector<1x32xf32>
    %441 = arith.subf %426, %440 : vector<1x32xf32>
    %cst_262 = arith.constant 9.99999974E-6 : f32
    %442 = vector.broadcast %cst_262 : f32 to vector<1x1xf32>
    %443 = arith.addf %439, %442 : vector<1x1xf32>
    %444 = math.rsqrt %443 : vector<1x1xf32>
    %445 = vector.broadcast %444 : vector<1x1xf32> to vector<1x32xf32>
    %446 = arith.mulf %441, %445 : vector<1x32xf32>
    %447 = arith.mulf %446, %427 : vector<1x32xf32>
    %448 = arith.addf %447, %428 : vector<1x32xf32>
    %c0_263 = arith.constant 0 : index
    %c0_264 = arith.constant 0 : index
    %449 = vector.load %arg29[%c0_263, %c0_264] : memref<32x32xf32, #tpu.memory_space<vmem>>, vector<32x32xf32>
    %cst_265 = arith.constant dense<0.000000e+00> : vector<1x32xf32>
    %450 = tpu.matmul %448, %449, %cst_265 {dimension_numbers = #tpu.dot_dimension_numbers<[1], [0], [0], [1], [0, 0, 1, 1], [], []>} : vector<1x32xf32>, vector<32x32xf32>, vector<1x32xf32> -> vector<1x32xf32>
    %451 = vector.extract_strided_slice %450 {offsets = [0, 0], sizes = [1, 16], strides = [1, 1]} : vector<1x32xf32> to vector<1x16xf32>
    %c0_266 = arith.constant 0 : index
    %c0_267 = arith.constant 0 : index
    %452 = vector.load %arg30[%c0_266, %c0_267] : memref<16x16xf32, #tpu.memory_space<vmem>>, vector<16x16xf32>
    %cst_268 = arith.constant dense<0.000000e+00> : vector<1x16xf32>
    %453 = tpu.matmul %451, %452, %cst_268 {dimension_numbers = #tpu.dot_dimension_numbers<[1], [0], [0], [1], [0, 0, 1, 1], [], []>} : vector<1x16xf32>, vector<16x16xf32>, vector<1x16xf32> -> vector<1x16xf32>
    %c0_269 = arith.constant 0 : index
    %c0_270 = arith.constant 0 : index
    %454 = vector.load %arg31[%c0_269, %c0_270] : memref<1x16xf32, #tpu.memory_space<vmem>>, vector<1x16xf32>
    %455 = arith.addf %453, %454 : vector<1x16xf32>
    %cst_271 = arith.constant 0.000000e+00 : f32
    %456 = vector.broadcast %cst_271 : f32 to vector<1x1x128xf32>
    %c0_272 = arith.constant 0 : index
    %c0_273 = arith.constant 0 : index
    %c0_274 = arith.constant 0 : index
    %457 = vector.load %arg32[%c0_272, %c0_273, %c0_274] : memref<1x1x128xf32, #tpu.memory_space<vmem>>, vector<1x1x128xf32>
    tpu.vector_store %arg32[%c0_272, %c0_273, %c0_274], %456 {strides = array<i32>} : memref<1x1x128xf32, #tpu.memory_space<vmem>>, vector<1x1x128xf32>,
    %458 = vector.shape_cast %448 : vector<1x32xf32> to vector<1x1x32xf32>
    %c0_275 = arith.constant 0 : index
    %c0_276 = arith.constant 0 : index
    %c0_277 = arith.constant 0 : index
    %459 = vector.load %arg32[%c0_275, %c0_276, %c0_277] : memref<1x1x128xf32, #tpu.memory_space<vmem>>, vector<1x1x32xf32>
    tpu.vector_store %arg32[%c0_275, %c0_276, %c0_277], %458 {strides = array<i32>} : memref<1x1x128xf32, #tpu.memory_space<vmem>>, vector<1x1x32xf32>,
    %460 = vector.shape_cast %450 : vector<1x32xf32> to vector<1x1x32xf32>
    %c0_278 = arith.constant 0 : index
    %c0_279 = arith.constant 0 : index
    %c32 = arith.constant 32 : index
    %461 = vector.load %arg32[%c0_278, %c0_279, %c32] : memref<1x1x128xf32, #tpu.memory_space<vmem>>, vector<1x1x32xf32>
    tpu.vector_store %arg32[%c0_278, %c0_279, %c32], %460 {strides = array<i32>} : memref<1x1x128xf32, #tpu.memory_space<vmem>>, vector<1x1x32xf32>,
    %462 = vector.shape_cast %455 : vector<1x16xf32> to vector<1x1x16xf32>
    %c0_280 = arith.constant 0 : index
    %c0_281 = arith.constant 0 : index
    %c64 = arith.constant 64 : index
    %463 = vector.load %arg32[%c0_280, %c0_281, %c64] : memref<1x1x128xf32, #tpu.memory_space<vmem>>, vector<1x1x16xf32>
    tpu.vector_store %arg32[%c0_280, %c0_281, %c64], %462 {strides = array<i32>} : memref<1x1x128xf32, #tpu.memory_space<vmem>>, vector<1x1x16xf32>,
    return
  }
  func.func @transform_0(%arg0: i32, %arg1: memref<16xi32, #tpu.memory_space<smem>>, %arg2: memref<16xi32, #tpu.memory_space<smem>>) -> (i32, i32, i32) {
    %c0_i32 = arith.constant 0 : i32
    %c0_i32_0 = arith.constant 0 : i32
    %c0_i32_1 = arith.constant 0 : i32
    return %arg0, %c0_i32, %c0_i32_0 : i32, i32, i32
  }
  func.func @transform_1(%arg0: i32, %arg1: memref<16xi32, #tpu.memory_space<smem>>, %arg2: memref<16xi32, #tpu.memory_space<smem>>) -> (i32, i32, i32) {
    %c0_i32 = arith.constant 0 : i32
    %c0_i32_0 = arith.constant 0 : i32
    %c0_i32_1 = arith.constant 0 : i32
    %c0_i32_2 = arith.constant 0 : i32
    return %c0_i32, %c0_i32_0, %c0_i32_1 : i32, i32, i32
  }
  func.func @transform_2(%arg0: i32, %arg1: memref<16xi32, #tpu.memory_space<smem>>, %arg2: memref<16xi32, #tpu.memory_space<smem>>) -> (i32, i32, i32) {
    %c0_i32 = arith.constant 0 : i32
    %c0_i32_0 = arith.constant 0 : i32
    %c0_i32_1 = arith.constant 0 : i32
    %c0_i32_2 = arith.constant 0 : i32
    return %c0_i32, %c0_i32_0, %c0_i32_1 : i32, i32, i32
  }
  func.func @transform_3(%arg0: i32, %arg1: memref<16xi32, #tpu.memory_space<smem>>, %arg2: memref<16xi32, #tpu.memory_space<smem>>) -> (i32, i32, i32) {
    %c0_i32 = arith.constant 0 : i32
    %c0_i32_0 = arith.constant 0 : i32
    %c0_i32_1 = arith.constant 0 : i32
    %c0_i32_2 = arith.constant 0 : i32
    return %c0_i32, %c0_i32_0, %c0_i32_1 : i32, i32, i32
  }
  func.func @transform_4(%arg0: i32, %arg1: memref<16xi32, #tpu.memory_space<smem>>, %arg2: memref<16xi32, #tpu.memory_space<smem>>) -> (i32, i32) {
    %c0_i32 = arith.constant 0 : i32
    %c0_i32_0 = arith.constant 0 : i32
    %c0_i32_1 = arith.constant 0 : i32
    return %c0_i32, %c0_i32_0 : i32, i32
  }
  func.func @transform_5(%arg0: i32, %arg1: memref<16xi32, #tpu.memory_space<smem>>, %arg2: memref<16xi32, #tpu.memory_space<smem>>) -> (i32, i32) {
    %c0_i32 = arith.constant 0 : i32
    %c0_i32_0 = arith.constant 0 : i32
    %c0_i32_1 = arith.constant 0 : i32
    return %c0_i32, %c0_i32_0 : i32, i32
  }
  func.func @transform_6(%arg0: i32, %arg1: memref<16xi32, #tpu.memory_space<smem>>, %arg2: memref<16xi32, #tpu.memory_space<smem>>) -> (i32, i32, i32, i32) {
    %c0_i32 = arith.constant 0 : i32
    %c0_i32_0 = arith.constant 0 : i32
    %c0_i32_1 = arith.constant 0 : i32
    %c0_i32_2 = arith.constant 0 : i32
    %c0_i32_3 = arith.constant 0 : i32
    return %c0_i32, %c0_i32_0, %c0_i32_1, %c0_i32_2 : i32, i32, i32, i32
  }
  func.func @transform_7(%arg0: i32, %arg1: memref<16xi32, #tpu.memory_space<smem>>, %arg2: memref<16xi32, #tpu.memory_space<smem>>) -> (i32, i32, i32, i32) {
    %c0_i32 = arith.constant 0 : i32
    %c0_i32_0 = arith.constant 0 : i32
    %c0_i32_1 = arith.constant 0 : i32
    %c0_i32_2 = arith.constant 0 : i32
    %c0_i32_3 = arith.constant 0 : i32
    return %c0_i32, %c0_i32_0, %c0_i32_1, %c0_i32_2 : i32, i32, i32, i32
  }
  func.func @transform_8(%arg0: i32, %arg1: memref<16xi32, #tpu.memory_space<smem>>, %arg2: memref<16xi32, #tpu.memory_space<smem>>) -> (i32, i32, i32, i32) {
    %c0_i32 = arith.constant 0 : i32
    %c0_i32_0 = arith.constant 0 : i32
    %c0_i32_1 = arith.constant 0 : i32
    %c0_i32_2 = arith.constant 0 : i32
    %c0_i32_3 = arith.constant 0 : i32
    return %c0_i32, %c0_i32_0, %c0_i32_1, %c0_i32_2 : i32, i32, i32, i32
  }
  func.func @transform_9(%arg0: i32, %arg1: memref<16xi32, #tpu.memory_space<smem>>, %arg2: memref<16xi32, #tpu.memory_space<smem>>) -> (i32, i32, i32, i32) {
    %c0_i32 = arith.constant 0 : i32
    %c0_i32_0 = arith.constant 0 : i32
    %c0_i32_1 = arith.constant 0 : i32
    %c0_i32_2 = arith.constant 0 : i32
    %c0_i32_3 = arith.constant 0 : i32
    return %c0_i32, %c0_i32_0, %c0_i32_1, %c0_i32_2 : i32, i32, i32, i32
  }
  func.func @transform_10(%arg0: i32, %arg1: memref<16xi32, #tpu.memory_space<smem>>, %arg2: memref<16xi32, #tpu.memory_space<smem>>) -> (i32, i32, i32, i32) {
    %c0_i32 = arith.constant 0 : i32
    %c0_i32_0 = arith.constant 0 : i32
    %c0_i32_1 = arith.constant 0 : i32
    %c0_i32_2 = arith.constant 0 : i32
    %c0_i32_3 = arith.constant 0 : i32
    return %c0_i32, %c0_i32_0, %c0_i32_1, %c0_i32_2 : i32, i32, i32, i32
  }
  func.func @transform_11(%arg0: i32, %arg1: memref<16xi32, #tpu.memory_space<smem>>, %arg2: memref<16xi32, #tpu.memory_space<smem>>) -> (i32, i32, i32, i32) {
    %c0_i32 = arith.constant 0 : i32
    %c0_i32_0 = arith.constant 0 : i32
    %c0_i32_1 = arith.constant 0 : i32
    %c0_i32_2 = arith.constant 0 : i32
    %c0_i32_3 = arith.constant 0 : i32
    return %c0_i32, %c0_i32_0, %c0_i32_1, %c0_i32_2 : i32, i32, i32, i32
  }
  func.func @transform_12(%arg0: i32, %arg1: memref<16xi32, #tpu.memory_space<smem>>, %arg2: memref<16xi32, #tpu.memory_space<smem>>) -> (i32, i32, i32, i32) {
    %c0_i32 = arith.constant 0 : i32
    %c0_i32_0 = arith.constant 0 : i32
    %c0_i32_1 = arith.constant 0 : i32
    %c0_i32_2 = arith.constant 0 : i32
    %c0_i32_3 = arith.constant 0 : i32
    return %c0_i32, %c0_i32_0, %c0_i32_1, %c0_i32_2 : i32, i32, i32, i32
  }
  func.func @transform_13(%arg0: i32, %arg1: memref<16xi32, #tpu.memory_space<smem>>, %arg2: memref<16xi32, #tpu.memory_space<smem>>) -> (i32, i32, i32) {
    %c0_i32 = arith.constant 0 : i32
    %c0_i32_0 = arith.constant 0 : i32
    %c0_i32_1 = arith.constant 0 : i32
    %c0_i32_2 = arith.constant 0 : i32
    return %c0_i32, %c0_i32_0, %c0_i32_1 : i32, i32, i32
  }
  func.func @transform_14(%arg0: i32, %arg1: memref<16xi32, #tpu.memory_space<smem>>, %arg2: memref<16xi32, #tpu.memory_space<smem>>) -> (i32, i32, i32) {
    %c0_i32 = arith.constant 0 : i32
    %c0_i32_0 = arith.constant 0 : i32
    %c0_i32_1 = arith.constant 0 : i32
    %c0_i32_2 = arith.constant 0 : i32
    return %c0_i32, %c0_i32_0, %c0_i32_1 : i32, i32, i32
  }
  func.func @transform_15(%arg0: i32, %arg1: memref<16xi32, #tpu.memory_space<smem>>, %arg2: memref<16xi32, #tpu.memory_space<smem>>) -> (i32, i32, i32) {
    %c0_i32 = arith.constant 0 : i32
    %c0_i32_0 = arith.constant 0 : i32
    %c0_i32_1 = arith.constant 0 : i32
    %c0_i32_2 = arith.constant 0 : i32
    return %c0_i32, %c0_i32_0, %c0_i32_1 : i32, i32, i32
  }
  func.func @transform_16(%arg0: i32, %arg1: memref<16xi32, #tpu.memory_space<smem>>, %arg2: memref<16xi32, #tpu.memory_space<smem>>) -> (i32, i32, i32) {
    %c0_i32 = arith.constant 0 : i32
    %c0_i32_0 = arith.constant 0 : i32
    %c0_i32_1 = arith.constant 0 : i32
    %c0_i32_2 = arith.constant 0 : i32
    return %c0_i32, %c0_i32_0, %c0_i32_1 : i32, i32, i32
  }
  func.func @transform_17(%arg0: i32, %arg1: memref<16xi32, #tpu.memory_space<smem>>, %arg2: memref<16xi32, #tpu.memory_space<smem>>) -> (i32, i32, i32) {
    %c0_i32 = arith.constant 0 : i32
    %c0_i32_0 = arith.constant 0 : i32
    %c0_i32_1 = arith.constant 0 : i32
    %c0_i32_2 = arith.constant 0 : i32
    return %c0_i32, %c0_i32_0, %c0_i32_1 : i32, i32, i32
  }
  func.func @transform_18(%arg0: i32, %arg1: memref<16xi32, #tpu.memory_space<smem>>, %arg2: memref<16xi32, #tpu.memory_space<smem>>) -> (i32, i32, i32) {
    %c0_i32 = arith.constant 0 : i32
    %c0_i32_0 = arith.constant 0 : i32
    %c0_i32_1 = arith.constant 0 : i32
    %c0_i32_2 = arith.constant 0 : i32
    return %c0_i32, %c0_i32_0, %c0_i32_1 : i32, i32, i32
  }
  func.func @transform_19(%arg0: i32, %arg1: memref<16xi32, #tpu.memory_space<smem>>, %arg2: memref<16xi32, #tpu.memory_space<smem>>) -> (i32, i32, i32) {
    %c0_i32 = arith.constant 0 : i32
    %c0_i32_0 = arith.constant 0 : i32
    %c0_i32_1 = arith.constant 0 : i32
    %c0_i32_2 = arith.constant 0 : i32
    return %c0_i32, %c0_i32_0, %c0_i32_1 : i32, i32, i32
  }
  func.func @transform_20(%arg0: i32, %arg1: memref<16xi32, #tpu.memory_space<smem>>, %arg2: memref<16xi32, #tpu.memory_space<smem>>) -> (i32, i32, i32) {
    %c0_i32 = arith.constant 0 : i32
    %c0_i32_0 = arith.constant 0 : i32
    %c0_i32_1 = arith.constant 0 : i32
    %c0_i32_2 = arith.constant 0 : i32
    return %c0_i32, %c0_i32_0, %c0_i32_1 : i32, i32, i32
  }
  func.func @transform_21(%arg0: i32, %arg1: memref<16xi32, #tpu.memory_space<smem>>, %arg2: memref<16xi32, #tpu.memory_space<smem>>) -> (i32, i32, i32) {
    %c0_i32 = arith.constant 0 : i32
    %c0_i32_0 = arith.constant 0 : i32
    %c0_i32_1 = arith.constant 0 : i32
    %c0_i32_2 = arith.constant 0 : i32
    return %c0_i32, %c0_i32_0, %c0_i32_1 : i32, i32, i32
  }
  func.func @transform_22(%arg0: i32, %arg1: memref<16xi32, #tpu.memory_space<smem>>, %arg2: memref<16xi32, #tpu.memory_space<smem>>) -> (i32, i32) {
    %c0_i32 = arith.constant 0 : i32
    %c0_i32_0 = arith.constant 0 : i32
    %c0_i32_1 = arith.constant 0 : i32
    return %c0_i32, %c0_i32_0 : i32, i32
  }
  func.func @transform_23(%arg0: i32, %arg1: memref<16xi32, #tpu.memory_space<smem>>, %arg2: memref<16xi32, #tpu.memory_space<smem>>) -> (i32, i32) {
    %c0_i32 = arith.constant 0 : i32
    %c0_i32_0 = arith.constant 0 : i32
    %c0_i32_1 = arith.constant 0 : i32
    return %c0_i32, %c0_i32_0 : i32, i32
  }
  func.func @transform_24(%arg0: i32, %arg1: memref<16xi32, #tpu.memory_space<smem>>, %arg2: memref<16xi32, #tpu.memory_space<smem>>) -> (i32, i32) {
    %c0_i32 = arith.constant 0 : i32
    %c0_i32_0 = arith.constant 0 : i32
    %c0_i32_1 = arith.constant 0 : i32
    return %c0_i32, %c0_i32_0 : i32, i32
  }
  func.func @transform_25(%arg0: i32, %arg1: memref<16xi32, #tpu.memory_space<smem>>, %arg2: memref<16xi32, #tpu.memory_space<smem>>) -> (i32, i32) {
    %c0_i32 = arith.constant 0 : i32
    %c0_i32_0 = arith.constant 0 : i32
    %c0_i32_1 = arith.constant 0 : i32
    return %c0_i32, %c0_i32_0 : i32, i32
  }
  func.func @transform_26(%arg0: i32, %arg1: memref<16xi32, #tpu.memory_space<smem>>, %arg2: memref<16xi32, #tpu.memory_space<smem>>) -> (i32, i32) {
    %c0_i32 = arith.constant 0 : i32
    %c0_i32_0 = arith.constant 0 : i32
    %c0_i32_1 = arith.constant 0 : i32
    return %c0_i32, %c0_i32_0 : i32, i32
  }
  func.func @transform_27(%arg0: i32, %arg1: memref<16xi32, #tpu.memory_space<smem>>, %arg2: memref<16xi32, #tpu.memory_space<smem>>) -> (i32, i32) {
    %c0_i32 = arith.constant 0 : i32
    %c0_i32_0 = arith.constant 0 : i32
    %c0_i32_1 = arith.constant 0 : i32
    return %c0_i32, %c0_i32_0 : i32, i32
  }
  func.func @transform_28(%arg0: i32, %arg1: memref<16xi32, #tpu.memory_space<smem>>, %arg2: memref<16xi32, #tpu.memory_space<smem>>) -> (i32, i32) {
    %c0_i32 = arith.constant 0 : i32
    %c0_i32_0 = arith.constant 0 : i32
    %c0_i32_1 = arith.constant 0 : i32
    return %c0_i32, %c0_i32_0 : i32, i32
  }
  func.func @transform_29(%arg0: i32, %arg1: memref<16xi32, #tpu.memory_space<smem>>, %arg2: memref<16xi32, #tpu.memory_space<smem>>) -> (i32, i32, i32) {
    %c0_i32 = arith.constant 0 : i32
    %c0_i32_0 = arith.constant 0 : i32
    %c0_i32_1 = arith.constant 0 : i32
    return %arg0, %c0_i32, %c0_i32_0 : i32, i32, i32
  }
}

</mosaic_0001>

<bundles_post_ra>
// kernel: larimar_text_encoder_forward.1
= control target key start
LH: loop header
LB: loop body
LE: loop exit
PB: predicated region body
PF: predicated region fallthrough
CT: control target
= control target key end

     0   :  { %s6974_s6 = smov 2   ;;  %s6975_s10 = smov 3   ;;  %s7792_s0 = inlined_call_operand.smem [shape: u32[32], index: -1, kind: input, shape index: {}] }
   0x1   :  { %s7020_s5 = sld [smem:[%s7792_s0]]   ;;  %s6976_s14 = smov 4  }
   0x2   :  { %s7025_s9 = sld [smem:[%s7792_s0 + %s6974_s6]]   ;;  %s6977_s18 = smov 5  }
   0x3   :  { %s7030_s13 = sld [smem:[%s7792_s0 + %s6975_s10]]   ;;  %s6978_s22 = smov 6  }
   0x4   :  { %s7035_s17 = sld [smem:[%s7792_s0 + %s6976_s14]]   ;;  %s6979_s26 = smov 7  }
   0x5   :  { %s7040_s21 = sld [smem:[%s7792_s0 + %s6977_s18]]   ;;  %s6980_s30 = smov 8  }
   0x6   :  { %s7045_s25 = sld [smem:[%s7792_s0 + %s6978_s22]]   ;;  %s6981_s4 = smov 9  }
   0x7   :  { %s7050_s29 = sld [smem:[%s7792_s0 + %s6979_s26]]   ;;  %s6982_s10 = smov 10  }
   0x8   :  { %s7055_s3 = sld [smem:[%s7792_s0 + %s6980_s30]]   ;;  %s6983_s15 = smov 11  }
   0x9   :  { %s7060_s8 = sld [smem:[%s7792_s0 + %s6981_s4]]   ;;  %s6984_s20 = smov 12  }
   0xa   :  { %s7065_s14 = sld [smem:[%s7792_s0 + %s6982_s10]]   ;;  %s6985_s26 = smov 13  }
   0xb   :  { %s7070_s19 = sld [smem:[%s7792_s0 + %s6983_s15]]   ;;  %s6986_s1 = smov 14  }
   0xc   :  { %s7075_s24 = sld [smem:[%s7792_s0 + %s6984_s20]]   ;;  %s6987_s7 = smov 15  }
   0xd   :  { %s7080_s30 = sld [smem:[%s7792_s0 + %s6985_s26]]   ;;  %s6988_s15 = smov 16  }
   0xe   :  { %s7085_s6 = sld [smem:[%s7792_s0 + %s6986_s1]]   ;;  %s6989_s22 = smov 17  }
   0xf   :  { %s7090_s12 = sld [smem:[%s7792_s0 + %s6987_s7]]   ;;  %s6990_s28 = smov 18  }
  0x10   :  { %s7095_s20 = sld [smem:[%s7792_s0 + %s6988_s15]]   ;;  %s6991_s7 = smov 19  }
  0x11   :  { %s7100_s27 = sld [smem:[%s7792_s0 + %s6989_s22]]   ;;  %s6992_s15 = smov 20  }
  0x12   :  { %s7105_s4 = sld [smem:[%s7792_s0 + %s6990_s28]]   ;;  %s6993_s22 = smov 21  }
  0x13   :  { %s6994_s28 = smov 22  }
  0x15   :  { %7805 = sst [smem:[#allocation7_spill]] %s7090_s12 }
  0x16   :  { %7806 = sst [smem:[#allocation8_spill]] %s7095_s20 }
  0x17   :  { %7807 = sst [smem:[#allocation9_spill]] %s7100_s27 }
  0x18   :  { %7808 = sst [smem:[#allocation10_spill]] %s7105_s4 }
  0x19   :  { %s7110_s12 = sld [smem:[%s7792_s0 + %s6991_s7]]   ;;  %s6995_s7 = smov 23  }
  0x1a   :  { %s7115_s20 = sld [smem:[%s7792_s0 + %s6992_s15]]   ;;  %s6996_s15 = smov 24  }
  0x1b   :  { %s7120_s27 = sld [smem:[%s7792_s0 + %s6993_s22]]   ;;  %s6997_s22 = smov 25  }
  0x1c   :  { %s7125_s4 = sld [smem:[%s7792_s0 + %s6994_s28]]   ;;  %s6998_s28 = smov 26  }
  0x1d   :  { %s7135_s23 = sld [smem:[%s7792_s0 + %s6996_s15]]   ;;  %s7000_s15 = smov 28  }
  0x1e   :  { %s7140_s1 = sld [smem:[%s7792_s0 + %s6997_s22]]  }
  0x1f   :  { %7809 = sst [smem:[#allocation11_spill]] %s7110_s12 }
  0x20   :  { %7810 = sst [smem:[#allocation12_spill]] %s7115_s20 }
  0x21   :  { %7811 = sst [smem:[#allocation13_spill]] %s7120_s27  ;;  %s7001_s27 = smov 29  }
  0x22   :  { %7812 = sst [smem:[#allocation14_spill]] %s7125_s4  ;;  %s7002_s4 = smov 30  }
  0x23   :  { %s7130_s12 = sld [smem:[%s7792_s0 + %s6995_s7]]   ;;  %s6999_s7 = smov 27  }
  0x24   :  { %7814 = sst [smem:[#allocation16_spill]] %s7135_s23  ;;  %s68_s23 = sshll.u32 %s7020_s5, 4  ;;  %s69_s23 = int_to_ptr.vmem [resolvable:$true] %s68_s23 }
  0x25   :  { %7815 = sst [smem:[#allocation17_spill]] %s7140_s1  ;;  %p6945_p1 = scmp.lt.s32.totalorder %s69_s23, %s69_s23 }
  0x26   :  { %s7145_s10 = sld [smem:[%s7792_s0 + %s6998_s28]]  }
  0x27   :  { %s7150_s16 = sld [smem:[%s7792_s0 + %s6999_s7]]  }
  0x28   :  { %s7155_s20 = sld [smem:[%s7792_s0 + %s7000_s15]]   ;;  %s6940_s15 = scalar_lea.vmem %s69_s23, 16 }
  0x29   :  { %7813 = sst [smem:[#allocation15_spill]] %s7130_s12  ;;  %s7003_s12 = smov 31  }
  0x2a   :  { %s7160_s1 = sld [smem:[%s7792_s0 + %s7001_s27]]   ;;  %p6941_p0 = scmp.ne.s32.totalorder %s69_s23, %s6940_s15 }
  0x2b   :  { %p6946_p2 = scmp.lt.s32.totalorder %s6940_s15, %s6940_s15 }
  0x2c   :  { %7816 = sst [smem:[#allocation18_spill]] %s7145_s10 }
  0x2d   :  { %7817 = sst [smem:[#allocation19_spill]] %s7150_s16  ;;  %p6947_p3 = por %p6946_p2, %p6945_p1 }
  0x2e   :  { %s7165_s10 = sld [smem:[%s7792_s0 + %s7002_s4]]  }
  0x2f   :  { %s7170_s16 = sld [smem:[%s7792_s0 + %s7003_s12]]   ;;  %p6948_p4 = pnand %p6947_p3, %p6941_p0 }
  0x30   :  { %7818 = sst [smem:[#allocation20_spill]] %s7160_s1 }
  0x34   :  { %7819 = sst [smem:[#allocation21_spill]] %s7165_s10 }
  0x35   :  { %7820 = sst [smem:[#allocation22_spill]] %s7170_s16 }
  0x36   :  { %6951 = shalt.err (!%p6948_p4)  }
  0x37   :  { %s7004_s18 = smov [#allocation4]   ;;  %s7005_s27 = smov 1  }
  0x38   :  { %71 = dma.vmem_to_smem %s69_s23, 16, %s7004_s18, [#allocation3] }
  0x39   :  { %s5735_s4 = sld [smem:[%s7792_s0 + %s7005_s27]]  }
  0x3f   :  { %s72_s28 = sshll.u32 %s5735_s4, 4  ;;  %s73_s28 = int_to_ptr.vmem [resolvable:$true] %s72_s28 }
  0x40   :  { %s6952_s2 = scalar_lea.vmem %s73_s28, 16  ;;  %p6957_p6 = scmp.lt.s32.totalorder %s73_s28, %s73_s28 }
  0x41   :  { %p6953_p5 = scmp.ne.s32.totalorder %s73_s28, %s6952_s2  ;;  %p6958_p7 = scmp.lt.s32.totalorder %s6952_s2, %s6952_s2 }
  0x43   :  { %p6959_p8 = por %p6958_p7, %p6957_p6 }
  0x45   :  { %p6960_p9 = pnand %p6959_p8, %p6953_p5 }
  0x47   :  { %6963 = shalt.err (!%p6960_p9)  }
  0x48   :  { %s7006_s5 = smov [#allocation5]  }
  0x49   :  { %75 = dma.vmem_to_smem %s73_s28, 16, %s7006_s5, [#allocation3] }
  0x4a   :  { %6968 = dma.done.wait [#allocation3], 32 }
  0x4b   :  { %6969 = vsyncadd [#allocation3], 4294967264 }
  0x4c   :  { %77 = sfence }
  0x4d   :  { %s7176_s12 = smov 0  }
  0x4e LB: > { %7821 = sst [smem:[#allocation23_spill]] %s6972_s12  ;;  %s7182_s0 = sadd.s32 4294967295, %s6972_s12   ;;  %s6972_s12 = sphi %s7176_s12, %s83_s12  }
  0x4f   : > { %p5770_p10 = scmp.ge.s32.totalorder %s6972_s12, 1  ;;  %p829_p11 = scmp.lt.s32.totalorder %s6972_s12, 3 }
  0x51   : > { %p830_p12 = pnand %p5770_p10, %p829_p11 }
  0x52   : > { %s7187_s7 = sshll.u32 (!%p830_p12), %s7182_s0, 3  ;;  %v912_v0 = vld [vmem:[%s7035_s17] sm:$0x1] (!%p830_p12)  ;;  %v5772_v1 = vld [vmem:[%s7035_s17 + $0x1] sm:$0x1] (!%p830_p12)  ;;  %vm917_vm0 = vcmask (!%p830_p12), 253952  }
  0x53   : > { %833 = sbr.rel (%p830_p12) target bundleno = 6093 (0x17cd), region = 136  ;;  %s908_s11 = sld [smem:[#allocation4 + %s7187_s7]] (!%p830_p12)  ;;  %v5773_v5 = vld [vmem:[%s7035_s17 + $0x2] sm:$0x1] (!%p830_p12)  ;;  %v5774_v8 = vld [vmem:[%s7035_s17 + $0x3] sm:$0x1] (!%p830_p12) }
  0x54   : > { %s909_s23 = sld [smem:[#allocation5 + %s7187_s7]] (!%p830_p12)  ;;  %s919_s15 = sadd.s32 (!%p830_p12), 1, %s7187_s7  ;;  %v5775_v14 = vld [vmem:[%s7035_s17 + $0x4] sm:$0x1] (!%p830_p12)  ;;  %v5776_v25 = vld [vmem:[%s7035_s17 + $0x5] sm:$0x1] (!%p830_p12) }
  0x55   : > { %s931_s18 = sadd.s32 (!%p830_p12), 2, %s7187_s7  ;;  %s920_s27 = sld [smem:[#allocation4 + %s919_s15]] (!%p830_p12)  ;;  %v5777_v28 = vld [vmem:[%s7035_s17 + $0x6] sm:$0x1] (!%p830_p12)  ;;  %v5778_v32 = vld [vmem:[%s7035_s17 + $0x7] sm:$0x1] (!%p830_p12) }
  0x56   : > { %s921_s22 = sld [smem:[#allocation5 + %s919_s15]] (!%p830_p12)  ;;  %s943_s28 = sadd.s32 (!%p830_p12), 3, %s7187_s7  ;;  %vm1006_vm1 = vcmask (!%p830_p12), 261120   ;;  %v1038_v47 = vld [vmem:[%s7055_s3] sm:$0xff] (!%p830_p12)  ;;  %v1039_v48 = vld [vmem:[%s7055_s3 + $0x8] sm:$0xff] (!%p830_p12)  ;;  %v7007_v52 = vmov (!%p830_p12), 0.0|0.0  }
  0x57   : > { %s932_s26 = sld [smem:[#allocation4 + %s931_s18]] (!%p830_p12)  ;;  %s955_s2 = sadd.s32 (!%p830_p12), 4, %s7187_s7  ;;  %v1042_v49 = vld [vmem:[%s7055_s3 + $0x20] sm:$0xff] (!%p830_p12)  ;;  %v6650_v50 = vpack.c.bf16 (!%p830_p12), %v1039_v48, %v1038_v47  ;;  %v1043_v51 = vld [vmem:[%s7055_s3 + $0x28] sm:$0xff] (!%p830_p12)  ;;  %6649 = vmatprep.subr.bf16.mxu0 (!%p830_p12), %v7007_v52  ;;  %6655 = vmatprep.subr.bf16.mxu1 (!%p830_p12), %v7007_v52  ;;  %v1040_v54 = vld [vmem:[%s7055_s3 + $0x10] sm:$0xff] (!%p830_p12)  ;;  %vm7008_vm2 = vmmov (!%p830_p12), 0  }
  0x58   : > { %s933_s4 = sld [smem:[#allocation5 + %s931_s18]] (!%p830_p12)  ;;  %v6656_v53 = vpack.c.bf16 (!%p830_p12), %v1043_v51, %v1042_v49  ;;  %v1041_v55 = vld [vmem:[%s7055_s3 + $0x18] sm:$0xff] (!%p830_p12)  ;;  %v1044_v56 = vld [vmem:[%s7055_s3 + $0x30] sm:$0xff] (!%p830_p12)  ;;  %v7009_v60 = vmov (!%p830_p12), 0.0   ;;  %vm2013_vm3 = vcmask (!%p830_p12), 64512   ;;  %p901_p13 = scmp.lt.s32.totalorder (!%p830_p12), %s7182_s0, 1 }
  0x59   : > { %s7196_s5 = sld [smem:[#allocation4 + %s943_s28]] (!%p830_p12)  ;;  %s910_s10 = scalar_lea.vmem (!%p830_p12), %s7030_s13, %s908_s11  ;;  %6651 = vmatpush3.bf16.msra.mxu0 (!%p830_p12), %v6650_v50  ;;  %v6653_v57 = vpack.c.bf16 (!%p830_p12), %v1041_v55, %v1040_v54  ;;  %v1045_v58 = vld [vmem:[%s7055_s3 + $0x38] sm:$0xff] (!%p830_p12)  ;;  %6184 = vmatprep.mubr.msk.f32.mxu0 (!%p830_p12), %vm7008_vm2, %v7009_v60  ;;  %v1691_v48 = vld [vmem:[%s7075_s24 + $0x10] sm:$0xff] (!%p830_p12)  ;;  %v1697_v55 = vld [vmem:[%s7075_s24 + $0x40] sm:$0xff] (!%p830_p12)  ;;  %vm3117_vm4 = vcmask (!%p830_p12), 523264   ;;  %vm5588_vm5 = vcmask (!%p830_p12), 130048  }
  0x5a   : > { %s7198_s12 = sld [smem:[#allocation5 + %s943_s28]]  ;;  %s914_s1 = scalar_lea.vmem %s7040_s21, %s909_s23  ;;  %v911_v2 = vld [vmem:[%s910_s10] sm:$0x1]  ;;  %6657 = vmatpush3.bf16.msra.mxu1 %v6656_v53  ;;  %6652 = vmatprep.subr.bf16.mxu0 %v7007_v52  ;;  %v6659_v59 = vpack.c.bf16 %v1045_v58, %v1044_v56  ;;  %v1692_v49 = vld [vmem:[%s7075_s24 + $0x18] sm:$0xff]  ;;  %v1695_v50 = vld [vmem:[%s7075_s24 + $0x30] sm:$0xff]  ;;  %vm5667_vm6 = vcmask 516352  }
  0x5b   : > { %v915_v3 = vld [vmem:[%s914_s1] sm:$0x1]  ;;  %s7203_s15 = sld [smem:[#allocation4 + %s955_s2]]  ;;  %v913_v4 = vadd.f32 %v912_v0, %v911_v2  ;;  %s922_s16 = scalar_lea.vmem %s7030_s13, %s920_s27  ;;  %6658 = vmatprep.subr.bf16.mxu1 %v7007_v52  ;;  %6195 = vmatprep.mubr.msk.f32.mxu1 %vm7008_vm2, %v7009_v60  ;;  %v1696_v51 = vld [vmem:[%s7075_s24 + $0x38] sm:$0xff]  ;;  %v6701_v53 = vpack.c.bf16 %v1692_v49, %v1691_v48  ;;  %v1698_v56 = vld [vmem:[%s7075_s24 + $0x48] sm:$0xff]  ;;  %v2323_v49 = vlaneseq  ;;  %vm5673_vm7 = vcmask 647680  }
  0x5c   : > { %s7205_s18 = sld [smem:[#allocation5 + %s955_s2]]  ;;  %s927_s28 = scalar_lea.vmem %s7040_s21, %s921_s22  ;;  %v923_v6 = vld [vmem:[%s922_s16] sm:$0x1]  ;;  %v6707_v54 = vpack.c.bf16 %v1696_v51, %v1695_v50  ;;  %v1702_v58 = vld [vmem:[%s7075_s24 + $0x68] sm:$0xff] }
  0x5d   : > { %v928_v7 = vld [vmem:[%s927_s28] sm:$0x1]  ;;  %s934_s10 = scalar_lea.vmem %s7030_s13, %s932_s26  ;;  %v916_v9 = vadd.f32 %v915_v3, %v913_v4  ;;  %v926_v10 = vadd.f32 %v5772_v1, %v923_v6  ;;  %s967_s11 = sadd.s32 5, %s7187_s7  ;;  %6654 = vmatpush3.bf16.msra.mxu0 %v6653_v57  ;;  %v1047_v4 = vld [vmem:[%s7055_s3 + $0x48] sm:$0xff] }
  0x5e   : > { %s939_s1 = scalar_lea.vmem %s7040_s21, %s933_s4  ;;  %v935_v11 = vld [vmem:[%s934_s10] sm:$0x1]  ;;  %s979_s23 = sadd.s32 6, %s7187_s7  ;;  %6660 = vmatpush3.bf16.msra.mxu1 %v6659_v59  ;;  %6661 = vmatprep.subr.bf16.mxu0 %v7007_v52  ;;  %v1051_v6 = vld [vmem:[%s7055_s3 + $0x68] sm:$0xff]  ;;  %v6710_v59 = vpack.c.bf16 %v1698_v56, %v1697_v55 }
  0x5f   : > { %v940_v12 = vld [vmem:[%s939_s1] sm:$0x1]  ;;  %v938_v13 = vadd.f32 %v5773_v5, %v935_v11  ;;  %s946_s27 = scalar_lea.vmem %s7030_s13, %s7196_s5  ;;  %918 = vst.msk [vmem:[#allocation2] sm:$0x1] %vm917_vm0, %v916_v9  ;;  %v929_v15 = vadd.f32 %v928_v7, %v926_v10  ;;  %s968_s16 = sld [smem:[#allocation4 + %s967_s11]]  ;;  %6667 = vmatprep.subr.bf16.mxu1 %v7007_v52  ;;  %v1048_v11 = vld [vmem:[%s7055_s3 + $0x50] sm:$0xff] }
  0x60   : > { %s951_s22 = scalar_lea.vmem %s7040_s21, %s7198_s12  ;;  %v947_v16 = vld [vmem:[%s946_s27] sm:$0x1]  ;;  %s969_s26 = sld [smem:[#allocation5 + %s967_s11]] }
  0x61   : > { %v952_v17 = vld [vmem:[%s951_s22] sm:$0x1]  ;;  %v941_v18 = vadd.f32 %v940_v12, %v938_v13  ;;  %v950_v19 = vadd.f32 %v5774_v8, %v947_v16  ;;  %s958_s4 = scalar_lea.vmem %s7030_s13, %s7203_s15  ;;  %930 = vst.msk [vmem:[#allocation2 + $0x1] sm:$0x1] %vm917_vm0, %v929_v15  ;;  %s980_s12 = sld [smem:[#allocation4 + %s979_s23]]  ;;  %v1049_v13 = vld [vmem:[%s7055_s3 + $0x58] sm:$0xff] }
  0x62   : > { %s963_s2 = scalar_lea.vmem %s7040_s21, %s7205_s18  ;;  %v959_v20 = vld [vmem:[%s958_s4] sm:$0x1]  ;;  %s981_s5 = sld [smem:[#allocation5 + %s979_s23]]  ;;  %v1053_v15 = vld [vmem:[%s7055_s3 + $0x78] sm:$0xff]  ;;  %v6665_v16 = vpack.c.bf16 %v1049_v13, %v1048_v11 }
  0x63   : > { %v964_v21 = vld [vmem:[%s963_s2] sm:$0x1]  ;;  %942 = vst.msk [vmem:[#allocation2 + $0x2] sm:$0x1] %vm917_vm0, %v941_v18  ;;  %v953_v22 = vadd.f32 %v952_v17, %v950_v19  ;;  %v962_v23 = vadd.f32 %v5775_v14, %v959_v20  ;;  %s991_s28 = sadd.s32 7, %s7187_s7  ;;  %v1052_v14 = vld [vmem:[%s7055_s3 + $0x70] sm:$0xff] }
  0x64   : > { %s992_s10 = sld [smem:[#allocation4 + %s991_s28]]  ;;  %v5779_v1 = vld [vmem:[%s7045_s25] ss:$0 sm:$0xff]  ;;  %v6671_v17 = vpack.c.bf16 %v1053_v15, %v1052_v14  ;;  %v1366_v19 = vld [vmem:[%s7065_s14 + $0x8] sm:$0xff]  ;;  %v5790_v14 = vld [vmem:[%s7070_s19 + $0x1] ss:$0 sm:$0xff] }
  0x65   : > { %s993_s15 = sld [smem:[#allocation5 + %s991_s28]]  ;;  %954 = vst.msk [vmem:[#allocation2 + $0x3] sm:$0x1] %vm917_vm0, %v953_v22  ;;  %v965_v24 = vadd.f32 %v964_v21, %v962_v23  ;;  %s970_s18 = scalar_lea.vmem %s7030_s13, %s968_s16  ;;  %v1046_v2 = vld [vmem:[%s7055_s3 + $0x40] sm:$0xff]  ;;  %v1370_v21 = vld [vmem:[%s7065_s14 + $0x28] sm:$0xff] }
  0x66   : > { %s975_s1 = scalar_lea.vmem %s7040_s21, %s969_s26  ;;  %v971_v26 = vld [vmem:[%s970_s18] sm:$0x1]  ;;  %v6662_v9 = vpack.c.bf16 %v1047_v4, %v1046_v2  ;;  %s7841_s0 = smov (!%p901_p13, %s7182_s0), 1 }
  0x67   : > { %966 = vst.msk [vmem:[#allocation2 + $0x4] sm:$0x1] %vm917_vm0, %v965_v24  ;;  %v976_v27 = vld [vmem:[%s975_s1] sm:$0x1]  ;;  %v974_v29 = vadd.f32 %v5776_v25, %v971_v26  ;;  %s982_s11 = scalar_lea.vmem %s7030_s13, %s980_s12  ;;  %v1367_v24 = vld [vmem:[%s7065_s14 + $0x10] sm:$0xff]  ;;  %v1368_v25 = vld [vmem:[%s7065_s14 + $0x18] sm:$0xff]  ;;  %s903_s22 = scalar_lea.vmem %s7025_s9, %s7841_s0 }
  0x68   : > { %s987_s23 = scalar_lea.vmem %s7040_s21, %s981_s5  ;;  %v983_v30 = vld [vmem:[%s982_s11] sm:$0x1]  ;;  %v1371_v26 = vld [vmem:[%s7065_s14 + $0x30] sm:$0xff]  ;;  %s7822_s16 = sld [smem:[#allocation7_spill]] }
  0x69   : > { %v988_v31 = vld [vmem:[%s987_s23] sm:$0x1]  ;;  %v977_v33 = vadd.f32 %v976_v27, %v974_v29  ;;  %v986_v34 = vadd.f32 %v5777_v28, %v983_v30  ;;  %v1372_v27 = vld [vmem:[%s7065_s14 + $0x38] sm:$0xff]  ;;  %v6677_v28 = vpack.c.bf16 %v1368_v25, %v1367_v24  ;;  %v5791_v25 = vld [vmem:[%s7070_s19 + $0x2] ss:$0 sm:$0xff]  ;;  %s7823_s26 = sld [smem:[#allocation10_spill]] }
  0x6a   : > { %s994_s7 = scalar_lea.vmem %s7030_s13, %s992_s10  ;;  %v1050_v5 = vld [vmem:[%s7055_s3 + $0x60] sm:$0xff]  ;;  %v6683_v29 = vpack.c.bf16 %v1372_v27, %v1371_v26  ;;  %s7824_s4 = sld [smem:[#allocation8_spill]] }
  0x6b   : > { %s999_s27 = scalar_lea.vmem %s7040_s21, %s993_s15  ;;  %v995_v35 = vld [vmem:[%s994_s7] sm:$0x1]  ;;  %978 = vst.msk [vmem:[#allocation2 + $0x5] sm:$0x1] %vm917_vm0, %v977_v33  ;;  %v989_v37 = vadd.f32 %v988_v31, %v986_v34  ;;  %v6668_v10 = vpack.c.bf16 %v1051_v6, %v1050_v5  ;;  %v1374_v31 = vld [vmem:[%s7065_s14 + $0x48] sm:$0xff]  ;;  %s7825_s2 = sld [smem:[#allocation9_spill]] }
  0x6c   : > { %v1000_v36 = vld [vmem:[%s999_s27] sm:$0x1]  ;;  %v998_v38 = vadd.f32 %v5778_v32, %v995_v35  ;;  %v1378_v33 = vld [vmem:[%s7065_s14 + $0x68] sm:$0xff]  ;;  %v5792_v26 = vld [vmem:[%s7070_s19 + $0x3] ss:$0 sm:$0xff]  ;;  %s7826_s12 = sld [smem:[#allocation12_spill]] }
  0x6d   : > { %990 = vst.msk [vmem:[#allocation2 + $0x6] sm:$0x1] %vm917_vm0, %v989_v37  ;;  %v5780_v7 = vld [vmem:[%s7050_s29] ss:$0 sm:$0xff]  ;;  %v1376_v37 = vld [vmem:[%s7065_s14 + $0x58] sm:$0xff]  ;;  %s7828_s28 = sld [smem:[#allocation11_spill]] }
  0x6e   : > { %v1001_v39 = vadd.f32 %v1000_v36, %v998_v38  ;;  %v1365_v18 = vld [vmem:[%s7065_s14] sm:$0xff]  ;;  %v1375_v36 = vld [vmem:[%s7065_s14 + $0x50] sm:$0xff]  ;;  %s7829_s10 = sld [smem:[#allocation13_spill]]  ;;  %s7830_s15 = sld [smem:[#allocation14_spill]] }
  0x6f   : > { %v1369_v20 = vld [vmem:[%s7065_s14 + $0x20] sm:$0xff]  ;;  %v6674_v22 = vpack.c.bf16 %v1366_v19, %v1365_v18  ;;  %v1379_v38 = vld [vmem:[%s7065_s14 + $0x70] sm:$0xff]  ;;  %s7831_s18 = sld [smem:[#allocation15_spill]]  ;;  %s7832_s1 = sld [smem:[#allocation16_spill]] }
  0x70   : > { %1002 = vst.msk [vmem:[#allocation2 + $0x7] sm:$0x1] %vm917_vm0, %v1001_v39  ;;  %v6680_v23 = vpack.c.bf16 %v1370_v21, %v1369_v20  ;;  %v1373_v30 = vld [vmem:[%s7065_s14 + $0x40] sm:$0xff]  ;;  %v1380_v39 = vld [vmem:[%s7065_s14 + $0x78] sm:$0xff]  ;;  %s7833_s11 = sld [smem:[#allocation17_spill]]  ;;  %s7834_s23 = sld [smem:[#allocation22_spill]] }
  0x71   : > { %v1377_v32 = vld [vmem:[%s7065_s14 + $0x60] sm:$0xff]  ;;  %v6686_v34 = vpack.c.bf16 %v1374_v31, %v1373_v30  ;;  %s7835_s7 = sld [smem:[#allocation20_spill]]  ;;  %s7836_s27 = sld [smem:[#allocation18_spill]] }
  0x72   : > { %v6692_v35 = vpack.c.bf16 %v1378_v33, %v1377_v32  ;;  %v1701_v57 = vld [vmem:[%s7075_s24 + $0x60] sm:$0xff]  ;;  %s7827_s5 = smov %s7826_s12 }
  0x73   : > { %v5789_v13 = vld [vmem:[%s7070_s19] ss:$0 sm:$0xff]  ;;  %v5782_v18 = vld [vmem:[%s7060_s8 + $0x1] ss:$0 sm:$0xff]  ;;  %v5784_v30 = vld [vmem:[%s7060_s8 + $0x3] ss:$0 sm:$0xff] }
  0x74   : > { %v1035_v50 = vld [vmem:[%s903_s22] sm:$0x1]  ;;  %s7837_s22 = sld [smem:[#allocation19_spill]] }
  0x75   : > { %v1036_v51 = vsub.f32 1.0, %v1035_v50 }
  0x77   : > { %v1003_v40 = vld [vmem:[#allocation2] sm:$0xff] }
  0x78   : > { %v1007_v41 = vsel %vm1006_vm1, %v1003_v40, 0.0 }
  0x79   : > { %1008 = vadd.xlane.f32.xlu0 %v1007_v41  ;;  %v6695_v41 = vpack.c.bf16 %v1380_v39, %v1379_v38  ;;  %v5798_v38 = vld [vmem:[%s7080_s30 + $0x1] ss:$0 sm:$0xff] }
 0x106   : > { %v1009_v42 = vpop.xlane.xlu0 %1008 }
 0x107   : > { %v1011_v43 = vmul.f32 0.03125, %v1009_v42  ;;  %v1689_v42 = vld [vmem:[%s7075_s24] sm:$0xff] }
 0x109   : > { %v1012_v44 = vsub.f32 %v1003_v40, %v1011_v43  ;;  %v6689_v40 = vpack.c.bf16 %v1376_v37, %v1375_v36  ;;  %v1690_v43 = vld [vmem:[%s7075_s24 + $0x8] sm:$0xff]  ;;  %v5797_v37 = vld [vmem:[%s7080_s30] ss:$0 sm:$0xff] }
 0x10b   : > { %v1013_v45 = vmul.f32 %v1012_v44, %v1012_v44 }
 0x10d   : > { %v1014_v46 = vsel %vm1006_vm1, %v1013_v45, 0.0  ;;  %v1694_v45 = vld [vmem:[%s7075_s24 + $0x28] sm:$0xff] }
 0x10e   : > { %1015 = vadd.xlane.f32.xlu0 %v1014_v46  ;;  %v6698_v46 = vpack.c.bf16 %v1690_v43, %v1689_v42 }
 0x19b   : > { %v1016_v61 = vpop.xlane.xlu0 %1015 }
 0x19c   : > { %v1017_v62 = vmul.f32 0.03125, %v1016_v61  ;;  %v6716_v61 = vpack.c.bf16 %v1702_v58, %v1701_v57 }
 0x19e   : > { %v1018_v63 = vadd.f32 1e-12, %v1017_v62  ;;  %v1699_v62 = vld [vmem:[%s7075_s24 + $0x50] sm:$0xff] }
 0x1a0   : > { %6890 = vrsqrt.f32 %v1018_v63  ;;  %v1700_v63 = vld [vmem:[%s7075_s24 + $0x58] sm:$0xff] }
 0x1a1   : > { %v6713_v2 = vpack.c.bf16 %v1700_v63, %v1699_v62 }
 0x1aa   : > { %v6891_v0 = vpop.eup %6890 }
 0x1ab   : > { %v1020_v3 = vmul.f32 %v6891_v0, %v1012_v44  ;;  %v1693_v44 = vld [vmem:[%s7075_s24 + $0x20] sm:$0xff]  ;;  %v1703_v0 = vld [vmem:[%s7075_s24 + $0x70] sm:$0xff] }
 0x1ac   : > { %v6704_v47 = vpack.c.bf16 %v1694_v45, %v1693_v44 }
 0x1ad   : > { %v1027_v8 = vmul.f32 %v5779_v1, %v1020_v3  ;;  %v1704_v1 = vld [vmem:[%s7075_s24 + $0x78] sm:$0xff] }
 0x1ae   : > { %v6719_v3 = vpack.c.bf16 %v1704_v1, %v1703_v0 }
 0x1af   : > { %v7269_v12 = vadd.f32 %v5780_v7, %v1027_v8 }
 0x1b1   : > { %6185 = vmatmul.mubr.msk.f32.vlgmr.msra.gmra.mrb[0].mxu0 %vm1006_vm1, %v7269_v12  ;;  %6196 = vmatmul.mubr.msk.f32.vlgmr.msra.gmra.mrb[0].mxu1 %vm1006_vm1, %v7269_v12 }
 0x1b2   : > { %6663 = vmatpush3.bf16.msra.mxu0 %v6662_v9  ;;  %6669 = vmatpush3.bf16.msra.mxu1 %v6668_v10 }
 0x1b3   : > { %6664 = vmatprep.subr.bf16.mxu0 %v7007_v52  ;;  %6670 = vmatprep.subr.bf16.mxu1 %v7007_v52 }
 0x1b4   : > { %6206 = vmatprep.mubr.msk.f32.mxu0 %vm7008_vm2, %v7009_v60  ;;  %6217 = vmatprep.mubr.msk.f32.mxu1 %vm7008_vm2, %v7009_v60 }
 0x1b6   : > { %6666 = vmatpush3.bf16.msra.mxu0 %v6665_v16  ;;  %6672 = vmatpush3.bf16.msra.mxu1 %v6671_v17  ;;  %v5781_v17 = vld [vmem:[%s7060_s8] ss:$0 sm:$0xff] }
 0x1b7   : > { %6673 = vmatprep.subr.bf16.mxu0 %v7007_v52  ;;  %6679 = vmatprep.subr.bf16.mxu1 %v7007_v52 }
 0x1b9   : > { %6207 = vmatmul.mubr.msk.f32.vlgmr.msra.gmra.mrb[2].mxu0 %vm1006_vm1, %v7269_v12  ;;  %6218 = vmatmul.mubr.msk.f32.vlgmr.msra.gmra.mrb[2].mxu1 %vm1006_vm1, %v7269_v12 }
 0x1ba   : > { %6675 = vmatpush3.bf16.msra.mxu0 %v6674_v22  ;;  %6681 = vmatpush3.bf16.msra.mxu1 %v6680_v23 }
 0x1bb   : > { %6676 = vmatprep.subr.bf16.mxu0 %v7007_v52  ;;  %6682 = vmatprep.subr.bf16.mxu1 %v7007_v52 }
 0x1bc   : > { %6228 = vmatprep.mubr.msk.f32.mxu0 %vm7008_vm2, %v7009_v60  ;;  %6239 = vmatprep.mubr.msk.f32.mxu1 %vm7008_vm2, %v7009_v60 }
 0x1be   : > { %6678 = vmatpush3.bf16.msra.mxu0 %v6677_v28  ;;  %6684 = vmatpush3.bf16.msra.mxu1 %v6683_v29  ;;  %v5783_v29 = vld [vmem:[%s7060_s8 + $0x2] ss:$0 sm:$0xff] }
 0x1bf   : > { %6685 = vmatprep.subr.bf16.mxu0 %v7007_v52  ;;  %6691 = vmatprep.subr.bf16.mxu1 %v7007_v52 }
 0x1c1   : > { %6229 = vmatmul.mubr.msk.f32.vlgmr.msra.gmra.mrb[4].mxu0 %vm1006_vm1, %v7269_v12  ;;  %6240 = vmatmul.mubr.msk.f32.vlgmr.msra.gmra.mrb[4].mxu1 %vm1006_vm1, %v7269_v12 }
 0x1c2   : > { %6687 = vmatpush3.bf16.msra.mxu0 %v6686_v34  ;;  %6693 = vmatpush3.bf16.msra.mxu1 %v6692_v35 }
 0x1c3   : > { %6688 = vmatprep.subr.bf16.mxu0 %v7007_v52  ;;  %6694 = vmatprep.subr.bf16.mxu1 %v7007_v52 }
 0x1c4   : > { %6250 = vmatprep.mubr.msk.f32.mxu0 %vm7008_vm2, %v7009_v60  ;;  %6261 = vmatprep.mubr.msk.f32.mxu1 %vm7008_vm2, %v7009_v60 }
 0x1c6   : > { %6690 = vmatpush3.bf16.msra.mxu0 %v6689_v40  ;;  %6696 = vmatpush3.bf16.msra.mxu1 %v6695_v41 }
 0x1c7   : > { %6697 = vmatprep.subr.bf16.mxu0 %v7007_v52  ;;  %6703 = vmatprep.subr.bf16.mxu1 %v7007_v52 }
 0x1c9   : > { %6251 = vmatmul.mubr.msk.f32.vlgmr.msra.gmra.mrb[6].mxu0 %vm1006_vm1, %v7269_v12  ;;  %6262 = vmatmul.mubr.msk.f32.vlgmr.msra.gmra.mrb[6].mxu1 %vm1006_vm1, %v7269_v12 }
 0x1ca   : > { %6699 = vmatpush3.bf16.msra.mxu0 %v6698_v46  ;;  %6705 = vmatpush3.bf16.msra.mxu1 %v6704_v47 }
 0x1cb   : > { %6700 = vmatprep.subr.bf16.mxu0 %v7007_v52  ;;  %6706 = vmatprep.subr.bf16.mxu1 %v7007_v52 }
 0x1cc   : > { %6272 = vmatprep.mubr.msk.f32.mxu0 %vm7008_vm2, %v7009_v60  ;;  %6283 = vmatprep.mubr.msk.f32.mxu1 %vm7008_vm2, %v7009_v60 }
 0x1ce   : > { %6702 = vmatpush3.bf16.msra.mxu0 %v6701_v53  ;;  %6708 = vmatpush3.bf16.msra.mxu1 %v6707_v54  ;;  %v2324_v53 = vshrl.u32 %v2323_v49, 7  ;;  %v1037_v54 = vmul.f32 -1e+09, %v1036_v51 }
 0x1cf   : > { %6709 = vmatprep.subr.bf16.mxu0 %v7007_v52  ;;  %6715 = vmatprep.subr.bf16.mxu1 %v7007_v52 }
 0x1d0   : > { %v2325_v55 = vsub.s32 0, %v2324_v53  ;;  %v2669_v53 = vld [vmem:[%s7085_s6 + $0x8] sm:$0xff] }
 0x1d1   : > { %6273 = vmatmul.mubr.msk.f32.vlgmr.msra.gmra.mrb[8].mxu0 %vm1006_vm1, %v7269_v12  ;;  %6284 = vmatmul.mubr.msk.f32.vlgmr.msra.gmra.mrb[8].mxu1 %vm1006_vm1, %v7269_v12 }
 0x1d2   : > { %6711 = vmatpush3.bf16.msra.mxu0 %v6710_v59  ;;  %6717 = vmatpush3.bf16.msra.mxu1 %v6716_v61  ;;  %v7416_v56 = vrot.slane %v1037_v54, %v2325_v55  ;;  %v2670_v54 = vld [vmem:[%s7085_s6 + $0x10] sm:$0xff] }
 0x1d3   : > { %6712 = vmatprep.subr.bf16.mxu0 %v7007_v52  ;;  %6718 = vmatprep.subr.bf16.mxu1 %v7007_v52 }
 0x1d4   : > { %6294 = vmatprep.mubr.msk.f32.mxu0 %vm7008_vm2, %v7009_v60  ;;  %6305 = vmatprep.mubr.msk.f32.mxu1 %vm7008_vm2, %v7009_v60 }
 0x1d6   : > { %6714 = vmatpush3.bf16.msra.mxu0 %v6713_v2  ;;  %6720 = vmatpush3.bf16.msra.mxu1 %v6719_v3 }
 0x1d7   : > { %6308 = vmatprep.subr.mxu0 %v7009_v60  ;;  %6313 = vmatprep.subr.mxu1 %v7009_v60 }
 0x1d9   : > { %6295 = vmatmul.mubr.msk.f32.vlgmr.msra.gmra.mrb[10].mxu0 %vm1006_vm1, %v7269_v12  ;;  %6306 = vmatmul.mubr.msk.f32.vlgmr.msra.gmra.mrb[10].mxu1 %vm1006_vm1, %v7269_v12 }
 0x1da   : > { %6310 = vmatprep.mubr.msk.f32.mxu0 %vm7008_vm2, %v7009_v60  ;;  %6315 = vmatprep.mubr.msk.f32.mxu1 %vm7008_vm2, %v7009_v60 }
 0x284   : > { %v1151_v4 = vpop.f32.mrb[0].mxu0  ;;  %v1221_v5 = vpop.f32.mrb[0].mxu1 }
 0x285   : > { %v6186_v6 = vpop.f32.mrb[1].mxu0  ;;  %v6197_v7 = vpop.f32.mrb[1].mxu1  ;;  %v1152_v23 = vadd.f32 %v5781_v17, %v1151_v4  ;;  %v1222_v24 = vadd.f32 %v5782_v18, %v1221_v5 }
 0x28c   : > { %v1291_v8 = vpop.f32.mrb[2].mxu0  ;;  %v1361_v9 = vpop.f32.mrb[2].mxu1 }
 0x28d   : > { %v6208_v10 = vpop.f32.mrb[3].mxu0  ;;  %v6219_v11 = vpop.f32.mrb[3].mxu1  ;;  %v1292_v35 = vadd.f32 %v5783_v29, %v1291_v8  ;;  %v1362_v36 = vadd.f32 %v5784_v30, %v1361_v9 }
 0x294   : > { %v1475_v15 = vpop.f32.mrb[4].mxu0  ;;  %v1545_v16 = vpop.f32.mrb[4].mxu1 }
 0x295   : > { %v1476_v19 = vadd.f32 %v5789_v13, %v1475_v15  ;;  %v1546_v20 = vadd.f32 %v5790_v14, %v1545_v16  ;;  %v6230_v21 = vpop.f32.mrb[5].mxu0  ;;  %v6241_v22 = vpop.f32.mrb[5].mxu1 }
 0x297   : > { %6309 = vmatpush3.xpose.msk.msra.mxu0 %vm2013_vm3, %v1476_v19  ;;  %6314 = vmatpush3.xpose.msk.msra.mxu1 %vm2013_vm3, %v1546_v20 }
 0x298   : > { %6318 = vmatprep.subr.mxu0 %v7009_v60  ;;  %6323 = vmatprep.subr.mxu1 %v7009_v60 }
 0x29a   : > { %6311 = vmatmul.mubr.msk.f32.vlgmr.msra.gmra.mrb[12].mxu0 %vm2013_vm3, %v1152_v23  ;;  %6316 = vmatmul.mubr.msk.f32.vlgmr.msra.gmra.mrb[12].mxu1 %vm2013_vm3, %v1222_v24 }
 0x29b   : > { %6320 = vmatprep.mubr.msk.f32.mxu0 %vm7008_vm2, %v7009_v60  ;;  %6325 = vmatprep.mubr.msk.f32.mxu1 %vm7008_vm2, %v7009_v60 }
 0x29c   : > { %v1615_v27 = vpop.f32.mrb[6].mxu0  ;;  %v1685_v28 = vpop.f32.mrb[6].mxu1 }
 0x29d   : > { %v1616_v31 = vadd.f32 %v5791_v25, %v1615_v27  ;;  %v1686_v32 = vadd.f32 %v5792_v26, %v1685_v28  ;;  %v6252_v33 = vpop.f32.mrb[7].mxu0  ;;  %v6263_v34 = vpop.f32.mrb[7].mxu1 }
 0x29f   : > { %6319 = vmatpush3.xpose.msk.msra.mxu0 %vm2013_vm3, %v1616_v31  ;;  %6324 = vmatpush3.xpose.msk.msra.mxu1 %vm2013_vm3, %v1686_v32 }
 0x2a0   : > { %6328 = vmatprep.subr.mxu0 %v7009_v60  ;;  %6333 = vmatprep.subr.mxu1 %v7009_v60 }
 0x2a2   : > { %6321 = vmatmul.mubr.msk.f32.vlgmr.msra.gmra.mrb[14].mxu0 %vm2013_vm3, %v1292_v35  ;;  %6326 = vmatmul.mubr.msk.f32.vlgmr.msra.gmra.mrb[14].mxu1 %vm2013_vm3, %v1362_v36 }
 0x2a3   : > { %6330 = vmatprep.mubr.msk.f32.mxu0 %vm7008_vm2, %v7009_v60  ;;  %6335 = vmatprep.mubr.msk.f32.mxu1 %vm7008_vm2, %v7009_v60 }
 0x2a4   : > { %v1799_v39 = vpop.f32.mrb[8].mxu0  ;;  %v1869_v40 = vpop.f32.mrb[8].mxu1 }
 0x2a5   : > { %v1800_v41 = vadd.f32 %v5797_v37, %v1799_v39  ;;  %v1870_v42 = vadd.f32 %v5798_v38, %v1869_v40  ;;  %v6274_v43 = vpop.f32.mrb[9].mxu0  ;;  %v6285_v44 = vpop.f32.mrb[9].mxu1  ;;  %v5799_v39 = vld [vmem:[%s7080_s30 + $0x2] ss:$0 sm:$0xff] }
 0x2a6   : > { %v5800_v43 = vld [vmem:[%s7080_s30 + $0x3] ss:$0 sm:$0xff] }
 0x2a7   : > { %6329 = vmatpush3.msra.mxu0 %v1800_v41  ;;  %6334 = vmatpush3.msra.mxu1 %v1870_v42 }
 0x2a8   : > { %6338 = vmatprep.subr.mxu0 %v7009_v60  ;;  %6343 = vmatprep.subr.mxu1 %v7009_v60 }
 0x2ac   : > { %v7406_v45 = vpop.f32.mrb[10].mxu0  ;;  %v7408_v46 = vpop.f32.mrb[10].mxu1 }
 0x2ad   : > { %v6296_v47 = vpop.f32.mrb[11].mxu0  ;;  %v6307_v48 = vpop.f32.mrb[11].mxu1  ;;  %v1940_v42 = vadd.f32 %v5799_v39, %v7406_v45 }
 0x2ae   : > { %v2010_v48 = vadd.f32 %v5800_v43, %v7408_v46  ;;  %v2668_v46 = vld [vmem:[%s7085_s6] sm:$0xff] }
 0x36d   : > { %v2086_v57 = vpop.f32.mrb[12].mxu0  ;;  %v2162_v58 = vpop.f32.mrb[12].mxu1 }
 0x36e   : > { %v2318_v59 = vmul.f32 0.35355338, %v2086_v57  ;;  %v2319_v61 = vmul.f32 0.35355338, %v2162_v58  ;;  %v6312_v62 = vpop.f32.mrb[13].mxu0  ;;  %v6317_v63 = vpop.f32.mrb[13].mxu1 }
 0x36f   : > { %v2671_v58 = vld [vmem:[%s7085_s6 + $0x18] sm:$0xff] }
 0x370   : > { %v2328_v0 = vadd.f32 %v7416_v56, %v2318_v59  ;;  %v2329_v1 = vadd.f32 %v7416_v56, %v2319_v61 }
 0x372   : > { %v2332_v2 = vsel %vm2013_vm3, %v2328_v0, -inf  ;;  %v2335_v5 = vsel %vm2013_vm3, %v2329_v1, -inf }
 0x373   : > { %2333 = vmax.xlane.f32.xlu1 %v2332_v2 }
 0x375   : > { %v2238_v3 = vpop.f32.mrb[14].mxu0  ;;  %v2314_v4 = vpop.f32.mrb[14].mxu1 }
 0x376   : > { %v2320_v6 = vmul.f32 0.35355338, %v2238_v3  ;;  %v2321_v7 = vmul.f32 0.35355338, %v2314_v4  ;;  %v6322_v8 = vpop.f32.mrb[15].mxu0  ;;  %v6327_v9 = vpop.f32.mrb[15].mxu1 }
 0x377   : > { %2336 = vmax.xlane.f32.xlu1 %v2335_v5 }
 0x378   : > { %v2330_v10 = vadd.f32 %v7416_v56, %v2320_v6  ;;  %v2331_v11 = vadd.f32 %v7416_v56, %v2321_v7 }
 0x37a   : > { %v2338_v13 = vsel %vm2013_vm3, %v2330_v10, -inf  ;;  %v2341_v14 = vsel %vm2013_vm3, %v2331_v11, -inf }
 0x37b   : > { %2339 = vmax.xlane.f32.xlu0 %v2338_v13  ;;  %2342 = vmax.xlane.f32.xlu1 %v2341_v14 }
 0x400   : > { %v2334_v15 = vpop.xlane.xlu1 %2333 }
 0x401   : > { %v2344_v16 = vsub.f32 %v2328_v0, %v2334_v15 }
 0x403   : > { %v2348_v17 = vmul.f32 1.442695, %v2344_v16 }
 0x404   : > { %v2337_v18 = vpop.xlane.xlu1 %2336 }
 0x405   : > { %6892 = vpow2.f32 %v2348_v17  ;;  %v2345_v19 = vsub.f32 %v2329_v1, %v2337_v18  ;;  %v5821_v17 = vld [vmem:[%s7822_s16] ss:$0 sm:$0xff] }
 0x407   : > { %v2350_v20 = vmul.f32 1.442695, %v2345_v19 }
 0x408   : > { %v2340_v21 = vpop.xlane.xlu0 %2339  ;;  %v2343_v22 = vpop.xlane.xlu1 %2342 }
 0x409   : > { %6894 = vpow2.f32 %v2350_v20  ;;  %v2346_v23 = vsub.f32 %v2330_v10, %v2340_v21  ;;  %v2347_v24 = vsub.f32 %v2331_v11, %v2343_v22 }
 0x40b   : > { %v2352_v25 = vmul.f32 1.442695, %v2346_v23  ;;  %v2354_v26 = vmul.f32 1.442695, %v2347_v24 }
 0x40d   : > { %6896 = vpow2.f32 %v2352_v25 }
 0x40e   : > { %6898 = vpow2.f32 %v2354_v26 }
 0x40f   : > { %v6893_v27 = vpop.eup %6892 }
 0x410   : > { %v2356_v28 = vsel %vm2013_vm3, %v6893_v27, 0.0 }
 0x411   : > { %2357 = vadd.xlane.f32.xlu0 %v2356_v28  ;;  %v3010_v28 = vld [vmem:[%s7823_s26 + $0x8] sm:$0xff] }
 0x413   : > { %v6895_v29 = vpop.eup %6894 }
 0x414   : > { %v2359_v30 = vsel %vm2013_vm3, %v6895_v29, 0.0 }
 0x415   : > { %2360 = vadd.xlane.f32.xlu1 %v2359_v30  ;;  %v3011_v30 = vld [vmem:[%s7823_s26 + $0x10] sm:$0xff] }
 0x417   : > { %v6897_v31 = vpop.eup %6896 }
 0x418   : > { %v6899_v32 = vpop.eup %6898  ;;  %v2362_v33 = vsel %vm2013_vm3, %v6897_v31, 0.0 }
 0x419   : > { %2363 = vadd.xlane.f32.xlu0 %v2362_v33  ;;  %v2365_v34 = vsel %vm2013_vm3, %v6899_v32, 0.0 }
 0x41a   : > { %2366 = vadd.xlane.f32.xlu1 %v2365_v34 }
 0x49e   : > { %v2358_v35 = vpop.xlane.xlu0 %2357 }
 0x49f   : > { %6900 = vrcp.f32 %v2358_v35 }
 0x4a2   : > { %v2361_v36 = vpop.xlane.xlu1 %2360 }
 0x4a3   : > { %6902 = vrcp.f32 %v2361_v36  ;;  %v5822_v36 = vld [vmem:[%s7824_s4] ss:$0 sm:$0xff] }
 0x4a6   : > { %v2364_v37 = vpop.xlane.xlu0 %2363 }
 0x4a7   : > { %6904 = vrcp.f32 %v2364_v37  ;;  %v2367_v38 = vpop.xlane.xlu1 %2366 }
 0x4a8   : > { %6906 = vrcp.f32 %v2367_v38  ;;  %v5823_v38 = vld [vmem:[%s7825_s2] ss:$0 sm:$0xff] }
 0x4a9   : > { %v6901_v40 = vpop.eup %6900 }
 0x4aa   : > { %v2369_v41 = vmul.f32 %v6901_v40, %v6893_v27  ;;  %v3009_v27 = vld [vmem:[%s7823_s26] sm:$0xff] }
 0x4ac   : > { %6331 = vmatmul.mubr.msk.f32.vlgmr.msra.gmra.mrb[16].mxu0 %vm2013_vm3, %v2369_v41  ;;  %v3102_v41 = vld [vmem:[%s7826_s12] sm:$0xff]  ;;  %s7775_s12 = scalar_lea.vmem %s7834_s23, %s7841_s0  ;;  %s7010_s0 = smov 32  }
 0x4ad   : > { %v6903_v44 = vpop.eup %6902  ;;  %6339 = vmatpush3.msra.mxu0 %v1940_v42  ;;  %6340 = vmatprep.mubr.msk.f32.mxu0 %vm7008_vm2, %v7009_v60  ;;  %v3103_v42 = vld [vmem:[%s7827_s5 + $0x8] sm:$0xff]  ;;  %5662 = vst [vmem:[%s7775_s12] sm:$0x1] %v7009_v60  ;;  %s7011_s23 = smov 64  }
 0x4ae   : > { %v2371_v47 = vmul.f32 %v6903_v44, %v6895_v29  ;;  %6348 = vmatprep.subr.mxu0 %v7009_v60  ;;  %v6722_v29 = vpack.c.bf16 %v3010_v28, %v3009_v27  ;;  %v6728_v43 = vpack.c.bf16 %v3103_v42, %v3102_v41  ;;  %v3104_v44 = vld [vmem:[%s7827_s5 + $0x10] sm:$0xff]  ;;  %v5841_v27 = vld [vmem:[%s7055_s3 + $0xd8] sm:$0xff] }
 0x4af   : > { %v5836_v42 = vld [vmem:[%s7055_s3 + $0xb0] sm:$0xff] }
 0x4b0   : > { %6336 = vmatmul.mubr.msk.f32.vlgmr.msra.gmra.mrb[16].mxu1 %vm2013_vm3, %v2371_v47  ;;  %v3105_v47 = vld [vmem:[%s7827_s5 + $0x18] sm:$0xff] }
 0x4b1   : > { %v6905_v49 = vpop.eup %6904  ;;  %6344 = vmatpush3.msra.mxu1 %v2010_v48  ;;  %6345 = vmatprep.mubr.msk.f32.mxu1 %vm7008_vm2, %v7009_v60  ;;  %v6731_v48 = vpack.c.bf16 %v3105_v47, %v3104_v44  ;;  %v5837_v44 = vld [vmem:[%s7055_s3 + $0xb8] sm:$0xff]  ;;  %v5860_v47 = vld [vmem:[%s7065_s14 + $0x90] sm:$0xff] }
 0x4b2   : > { %v6907_v45 = vpop.eup %6906  ;;  %v2373_v50 = vmul.f32 %v6905_v49, %v6897_v31  ;;  %6353 = vmatprep.subr.mxu1 %v7009_v60  ;;  %v3012_v31 = vld [vmem:[%s7823_s26 + $0x18] sm:$0xff]  ;;  %v3106_v49 = vld [vmem:[%s7827_s5 + $0x20] sm:$0xff] }
 0x4b3   : > { %v2375_v51 = vmul.f32 %v6907_v45, %v6899_v32  ;;  %v3107_v45 = vld [vmem:[%s7827_s5 + $0x28] sm:$0xff] }
 0x4b4   : > { %6341 = vmatmul.mubr.msk.f32.vlgmr.msra.gmra.mrb[18].mxu0 %vm2013_vm3, %v2373_v50  ;;  %v6734_v50 = vpack.c.bf16 %v3107_v45, %v3106_v49  ;;  %v6749_v49 = vpack.c.bf16 %v5837_v44, %v5836_v42  ;;  %v5850_v44 = vld [vmem:[%s7060_s8 + $0x4] ss:$0 sm:$0xff] }
 0x4b5   : > { %6346 = vmatmul.mubr.msk.f32.vlgmr.msra.gmra.mrb[18].mxu1 %vm2013_vm3, %v2375_v51  ;;  %6350 = vmatprep.mubr.msk.f32.mxu0 %vm7008_vm2, %v7009_v60  ;;  %v3108_v51 = vld [vmem:[%s7827_s5 + $0x30] sm:$0xff] }
 0x4b6   : > { %6355 = vmatprep.mubr.msk.f32.mxu1 %vm7008_vm2, %v7009_v60  ;;  %6349 = vmatpush3.msra.mxu0 %v2668_v46  ;;  %v3109_v46 = vld [vmem:[%s7827_s5 + $0x38] sm:$0xff] }
 0x4b7   : > { %6358 = vmatprep.subr.mxu0 %v7009_v60  ;;  %6354 = vmatpush3.msra.mxu1 %v2669_v53  ;;  %v6737_v53 = vpack.c.bf16 %v3109_v46, %v3108_v51  ;;  %v5843_v51 = vld [vmem:[%s7055_s3 + $0xe8] sm:$0xff]  ;;  %v5866_v46 = vld [vmem:[%s7065_s14 + $0xc0] sm:$0xff] }
 0x4b8   : > { %6363 = vmatprep.subr.mxu1 %v7009_v60 }
 0x57f   : > { %v2445_v55 = vpop.f32.mrb[16].mxu0 }
 0x580   : > { %v6332_v57 = vpop.f32.mrb[17].mxu0  ;;  %6351 = vmatmul.mubr.msk.f32.vlgmr.msra.gmra.mrb[20].mxu0 %vm2013_vm3, %v2445_v55 }
 0x581   : > { %6359 = vmatpush3.msra.mxu0 %v2670_v54  ;;  %6360 = vmatprep.mubr.msk.f32.mxu0 %vm7008_vm2, %v7009_v60  ;;  %v5824_v54 = vld [vmem:[%s7828_s28] ss:$0 sm:$0xff] }
 0x582   : > { %6721 = vmatprep.subr.bf16.mxu0 %v7007_v52 }
 0x583   : > { %v2518_v59 = vpop.f32.mrb[16].mxu1 }
 0x584   : > { %v6337_v61 = vpop.f32.mrb[17].mxu1  ;;  %6356 = vmatmul.mubr.msk.f32.vlgmr.msra.gmra.mrb[20].mxu1 %vm2013_vm3, %v2518_v59 }
 0x585   : > { %6364 = vmatpush3.msra.mxu1 %v2671_v58  ;;  %6365 = vmatprep.mubr.msk.f32.mxu1 %vm7008_vm2, %v7009_v60 }
 0x586   : > { %6727 = vmatprep.subr.bf16.mxu1 %v7007_v52 }
 0x587   : > { %v2591_v62 = vpop.f32.mrb[18].mxu0 }
 0x588   : > { %v2664_v63 = vpop.f32.mrb[18].mxu1  ;;  %v6342_v0 = vpop.f32.mrb[19].mxu0  ;;  %6361 = vmatmul.mubr.msk.f32.vlgmr.msra.gmra.mrb[22].mxu0 %vm2013_vm3, %v2591_v62 }
 0x589   : > { %v6347_v1 = vpop.f32.mrb[19].mxu1  ;;  %6366 = vmatmul.mubr.msk.f32.vlgmr.msra.gmra.mrb[22].mxu1 %vm2013_vm3, %v2664_v63  ;;  %6376 = vmatprep.mubr.msk.f32.mxu0 %vm7008_vm2, %v7009_v60 }
 0x58a   : > { %6395 = vmatprep.mubr.msk.f32.mxu1 %vm7008_vm2, %v7009_v60  ;;  %6723 = vmatpush3.bf16.msra.mxu0 %v6722_v29 }
 0x58b   : > { %6724 = vmatprep.subr.bf16.mxu0 %v7007_v52  ;;  %6729 = vmatpush3.bf16.msra.mxu1 %v6728_v43 }
 0x58c   : > { %6730 = vmatprep.subr.bf16.mxu1 %v7007_v52 }
 0x58f   : > { %6732 = vmatpush3.bf16.msra.mxu1 %v6731_v48  ;;  %v5861_v48 = vld [vmem:[%s7065_s14 + $0x98] sm:$0xff] }
 0x590   : > { %6733 = vmatprep.subr.bf16.mxu1 %v7007_v52  ;;  %v6767_v45 = vpack.c.bf16 %v5861_v48, %v5860_v47 }
 0x593   : > { %6735 = vmatpush3.bf16.msra.mxu1 %v6734_v50  ;;  %v5842_v50 = vld [vmem:[%s7055_s3 + $0xe0] sm:$0xff] }
 0x594   : > { %6736 = vmatprep.subr.bf16.mxu1 %v7007_v52 }
 0x597   : > { %6738 = vmatpush3.bf16.msra.mxu1 %v6737_v53  ;;  %v5867_v53 = vld [vmem:[%s7065_s14 + $0xc8] sm:$0xff] }
 0x598   : > { %6751 = vmatprep.subr.bf16.mxu1 %v7007_v52 }
 0x653   : > { %v2741_v2 = vpop.f32.mrb[20].mxu0 }
 0x654   : > { %v6352_v3 = vpop.f32.mrb[21].mxu0  ;;  %v2964_v5 = vsel %vm1006_vm1, %v2741_v2, 0.0 }
 0x657   : > { %v2814_v4 = vpop.f32.mrb[20].mxu1 }
 0x658   : > { %v2965_v6 = vsel %vm1006_vm1, %v2814_v4, 0.0  ;;  %v6357_v7 = vpop.f32.mrb[21].mxu1 }
 0x659   : > { %v2966_v8 = vadd.f32 %v2965_v6, %v2964_v5  ;;  %v5826_v5 = vld [vmem:[%s7829_s10] ss:$0 sm:$0xff] }
 0x65b   : > { %v2887_v9 = vpop.f32.mrb[22].mxu0 }
 0x65c   : > { %v2967_v10 = vsel %vm1006_vm1, %v2887_v9, 0.0  ;;  %v2960_v11 = vpop.f32.mrb[22].mxu1  ;;  %v6362_v13 = vpop.f32.mrb[23].mxu0 }
 0x65d   : > { %v2968_v14 = vadd.f32 %v2967_v10, %v2966_v8  ;;  %v6367_v15 = vpop.f32.mrb[23].mxu1  ;;  %v2969_v16 = vsel %vm1006_vm1, %v2960_v11, 0.0 }
 0x65f   : > { %v2970_v18 = vadd.f32 %v2969_v16, %v2968_v14 }
 0x661   : > { %v2978_v19 = vadd.f32 %v5821_v17, %v2970_v18  ;;  %v5830_v17 = vld [vmem:[%s7055_s3 + $0x80] sm:$0xff]  ;;  %v5831_v18 = vld [vmem:[%s7055_s3 + $0x88] sm:$0xff] }
 0x663   : > { %v2979_v20 = vadd.f32 %v2978_v19, %v7269_v12  ;;  %v6725_v12 = vpack.c.bf16 %v3012_v31, %v3011_v30  ;;  %v5838_v19 = vld [vmem:[%s7055_s3 + $0xc0] sm:$0xff] }
 0x665   : > { %v2982_v21 = vsel %vm1006_vm1, %v2979_v20, 0.0  ;;  %6726 = vmatpush3.bf16.msra.mxu0 %v6725_v12 }
 0x666   : > { %2983 = vadd.xlane.f32.xlu0 %v2982_v21  ;;  %6739 = vmatprep.subr.bf16.mxu0 %v7007_v52  ;;  %v5839_v21 = vld [vmem:[%s7055_s3 + $0xc8] sm:$0xff] }
 0x6f3   : > { %v2984_v22 = vpop.xlane.xlu0 %2983 }
 0x6f4   : > { %v2985_v23 = vmul.f32 0.03125, %v2984_v22  ;;  %v6752_v22 = vpack.c.bf16 %v5839_v21, %v5838_v19  ;;  %v5872_v19 = vld [vmem:[%s7065_s14 + $0xf0] sm:$0xff] }
 0x6f5   : > { %v5896_v21 = vld [vmem:[%s7075_s24 + $0xd0] sm:$0xff] }
 0x6f6   : > { %v2986_v24 = vsub.f32 %v2979_v20, %v2985_v23  ;;  %v6740_v20 = vpack.c.bf16 %v5831_v18, %v5830_v17  ;;  %v5832_v23 = vld [vmem:[%s7055_s3 + $0x90] sm:$0xff] }
 0x6f8   : > { %v2987_v25 = vmul.f32 %v2986_v24, %v2986_v24 }
 0x6fa   : > { %v2988_v26 = vsel %vm1006_vm1, %v2987_v25, 0.0  ;;  %v5840_v25 = vld [vmem:[%s7055_s3 + $0xd0] sm:$0xff] }
 0x6fb   : > { %2989 = vadd.xlane.f32.xlu1 %v2988_v26  ;;  %v6755_v28 = vpack.c.bf16 %v5841_v27, %v5840_v25  ;;  %v5890_v25 = vld [vmem:[%s7075_s24 + $0xa0] sm:$0xff] }
 0x788   : > { %v2990_v32 = vpop.xlane.xlu1 %2989 }
 0x789   : > { %v2991_v33 = vmul.f32 0.03125, %v2990_v32  ;;  %v5828_v32 = vld [vmem:[%s7830_s15] ss:$0 sm:$0xff] }
 0x78b   : > { %v2992_v34 = vadd.f32 1e-12, %v2991_v33  ;;  %v5834_v33 = vld [vmem:[%s7055_s3 + $0xa0] sm:$0xff] }
 0x78d   : > { %6908 = vrsqrt.f32 %v2992_v34 }
 0x797   : > { %v6909_v35 = vpop.eup %6908 }
 0x798   : > { %v2994_v37 = vmul.f32 %v6909_v35, %v2986_v24  ;;  %v5833_v24 = vld [vmem:[%s7055_s3 + $0x98] sm:$0xff]  ;;  %v5835_v35 = vld [vmem:[%s7055_s3 + $0xa8] sm:$0xff] }
 0x799   : > { %v6743_v26 = vpack.c.bf16 %v5833_v24, %v5832_v23 }
 0x79a   : > { %v3001_v39 = vmul.f32 %v5822_v36, %v2994_v37  ;;  %v5858_v36 = vld [vmem:[%s7065_s14 + $0x80] sm:$0xff]  ;;  %v5859_v37 = vld [vmem:[%s7065_s14 + $0x88] sm:$0xff] }
 0x79b   : > { %v6764_v41 = vpack.c.bf16 %v5859_v37, %v5858_v36 }
 0x79c   : > { %v3008_v40 = vadd.f32 %v5823_v38, %v3001_v39  ;;  %v5829_v38 = vld [vmem:[%s7831_s18] ss:$0 sm:$0xff] }
 0x79e   : > { %6377 = vmatmul.mubr.msk.f32.vlgmr.msra.gmra.mrb[24].mxu0 %vm1006_vm1, %v3008_v40 }
 0x79f   : > { %6406 = vmatprep.mubr.msk.f32.mxu0 %vm7008_vm2, %v7009_v60  ;;  %6741 = vmatpush3.bf16.msra.mxu0 %v6740_v20  ;;  %v5873_v20 = vld [vmem:[%s7065_s14 + $0xf8] sm:$0xff] }
 0x7a0   : > { %6742 = vmatprep.subr.bf16.mxu0 %v7007_v52  ;;  %v6785_v23 = vpack.c.bf16 %v5873_v20, %v5872_v19 }
 0x7a3   : > { %6744 = vmatpush3.bf16.msra.mxu0 %v6743_v26  ;;  %v5891_v26 = vld [vmem:[%s7075_s24 + $0xa8] sm:$0xff] }
 0x7a4   : > { %6745 = vmatprep.subr.bf16.mxu0 %v7007_v52  ;;  %v6794_v27 = vpack.c.bf16 %v5891_v26, %v5890_v25 }
 0x871   : > { %v3089_v55 = vpop.f32.mrb[24].mxu0 }
 0x872   : > { %v3090_v57 = vadd.f32 %v5824_v54, %v3089_v55  ;;  %v6378_v58 = vpop.f32.mrb[25].mxu0  ;;  %v6758_v54 = vpack.c.bf16 %v5843_v51, %v5842_v50  ;;  %v6776_v55 = vpack.c.bf16 %v5867_v53, %v5866_v46  ;;  %v5880_v50 = vld [vmem:[%s7070_s19 + $0x6] ss:$0 sm:$0xff] }
 0x873   : > { %v5845_v58 = vld [vmem:[%s7055_s3 + $0xf8] sm:$0xff]  ;;  %v5852_v53 = vld [vmem:[%s7060_s8 + $0x6] ss:$0 sm:$0xff] }
 0x874   : > { %v3093_v59 = vmul.f32 %v3090_v57, %v3090_v57 }
 0x876   : > { %v3094_v61 = vmul.f32 %v3093_v59, %v3090_v57  ;;  %v5868_v59 = vld [vmem:[%s7065_s14 + $0xd0] sm:$0xff] }
 0x878   : > { %v3095_v62 = vmul.f32 0.044715, %v3094_v61  ;;  %v5869_v61 = vld [vmem:[%s7065_s14 + $0xd8] sm:$0xff] }
 0x87a   : > { %v3096_v63 = vadd.f32 %v3095_v62, %v3090_v57 }
 0x87c   : > { %v3097_v0 = vmul.f32 0.7978846, %v3096_v63  ;;  %v6779_v63 = vpack.c.bf16 %v5869_v61, %v5868_v59  ;;  %v5879_v59 = vld [vmem:[%s7070_s19 + $0x5] ss:$0 sm:$0xff]  ;;  %v5906_v61 = vld [vmem:[%s7080_s30 + $0x4] ss:$0 sm:$0xff] }
 0x87e   : > { %6910 = vtanh.f32 %v3097_v0  ;;  %v5862_v0 = vld [vmem:[%s7065_s14 + $0xa0] sm:$0xff] }
 0x888   : > { %v6911_v1 = vpop.eup %6910 }
 0x889   : > { %v3099_v2 = vadd.f32 1.0, %v6911_v1  ;;  %v5863_v1 = vld [vmem:[%s7065_s14 + $0xa8] sm:$0xff] }
 0x88b   : > { %v3100_v3 = vmul.f32 0.5, %v3099_v2  ;;  %v5886_v2 = vld [vmem:[%s7075_s24 + $0x80] sm:$0xff] }
 0x88d   : > { %v3101_v4 = vmul.f32 %v3100_v3, %v3090_v57  ;;  %v5844_v57 = vld [vmem:[%s7055_s3 + $0xf0] sm:$0xff]  ;;  %v5887_v3 = vld [vmem:[%s7075_s24 + $0x88] sm:$0xff] }
 0x88e   : > { %v6761_v62 = vpack.c.bf16 %v5845_v58, %v5844_v57 }
 0x88f   : > { %6396 = vmatmul.mubr.msk.f32.vlgmr.msra.gmra.mrb[24].mxu1 %vm3117_vm4, %v3101_v4  ;;  %v6770_v4 = vpack.c.bf16 %v5863_v1, %v5862_v0  ;;  %v5851_v0 = vld [vmem:[%s7060_s8 + $0x5] ss:$0 sm:$0xff] }
 0x890   : > { %6428 = vmatprep.mubr.msk.f32.mxu1 %vm7008_vm2, %v7009_v60  ;;  %6753 = vmatpush3.bf16.msra.mxu1 %v6752_v22  ;;  %v5897_v22 = vld [vmem:[%s7075_s24 + $0xd8] sm:$0xff] }
 0x891   : > { %6754 = vmatprep.subr.bf16.mxu1 %v7007_v52  ;;  %v6803_v24 = vpack.c.bf16 %v5897_v22, %v5896_v21 }
 0x894   : > { %6756 = vmatpush3.bf16.msra.mxu1 %v6755_v28  ;;  %v5892_v28 = vld [vmem:[%s7075_s24 + $0xb0] sm:$0xff] }
 0x895   : > { %6763 = vmatprep.subr.bf16.mxu1 %v7007_v52 }
 0x962   : > { %v3187_v6 = vpop.f32.mrb[24].mxu1 }
 0x963   : > { %v3188_v7 = vadd.f32 %v5826_v5, %v3187_v6  ;;  %v6397_v8 = vpop.f32.mrb[25].mxu1  ;;  %v6788_v5 = vpack.c.bf16 %v5887_v3, %v5886_v2  ;;  %v5864_v6 = vld [vmem:[%s7065_s14 + $0xb0] sm:$0xff] }
 0x964   : > { %v5888_v8 = vld [vmem:[%s7075_s24 + $0x90] sm:$0xff] }
 0x965   : > { %v3191_v9 = vadd.f32 %v3188_v7, %v3008_v40  ;;  %v6746_v40 = vpack.c.bf16 %v5835_v35, %v5834_v33  ;;  %v5865_v7 = vld [vmem:[%s7065_s14 + $0xb8] sm:$0xff]  ;;  %v5900_v33 = vld [vmem:[%s7075_s24 + $0xf0] sm:$0xff] }
 0x967   : > { %v3194_v10 = vsel %vm1006_vm1, %v3191_v9, 0.0 }
 0x968   : > { %3195 = vadd.xlane.f32.xlu0 %v3194_v10  ;;  %v6773_v10 = vpack.c.bf16 %v5865_v7, %v5864_v6  ;;  %v5881_v6 = vld [vmem:[%s7070_s19 + $0x7] ss:$0 sm:$0xff] }
 0x9f5   : > { %v3196_v11 = vpop.xlane.xlu0 %3195 }
 0x9f6   : > { %v3197_v13 = vmul.f32 0.03125, %v3196_v11 }
 0x9f8   : > { %v3198_v14 = vsub.f32 %v3191_v9, %v3197_v13  ;;  %v5889_v9 = vld [vmem:[%s7075_s24 + $0x98] sm:$0xff]  ;;  %v5870_v13 = vld [vmem:[%s7065_s14 + $0xe0] sm:$0xff] }
 0x9f9   : > { %v6791_v11 = vpack.c.bf16 %v5889_v9, %v5888_v8  ;;  %v5853_v9 = vld [vmem:[%s7060_s8 + $0x7] ss:$0 sm:$0xff] }
 0x9fa   : > { %v3199_v15 = vmul.f32 %v3198_v14, %v3198_v14 }
 0x9fc   : > { %v3200_v16 = vsel %vm1006_vm1, %v3199_v15, 0.0  ;;  %v5894_v15 = vld [vmem:[%s7075_s24 + $0xc0] sm:$0xff] }
 0x9fd   : > { %3201 = vadd.xlane.f32.xlu1 %v3200_v16  ;;  %v5895_v16 = vld [vmem:[%s7075_s24 + $0xc8] sm:$0xff] }
 0x9fe   : > { %v6800_v18 = vpack.c.bf16 %v5895_v16, %v5894_v15  ;;  %v5907_v15 = vld [vmem:[%s7080_s30 + $0x5] ss:$0 sm:$0xff] }
 0xa8a   : > { %v3202_v29 = vpop.xlane.xlu1 %3201 }
 0xa8b   : > { %v3203_v30 = vmul.f32 0.03125, %v3202_v29  ;;  %v5893_v29 = vld [vmem:[%s7075_s24 + $0xb8] sm:$0xff] }
 0xa8d   : > { %v3204_v31 = vadd.f32 1e-12, %v3203_v30  ;;  %v6797_v30 = vpack.c.bf16 %v5893_v29, %v5892_v28 }
 0xa8f   : > { %6912 = vrsqrt.f32 %v3204_v31  ;;  %v5898_v31 = vld [vmem:[%s7075_s24 + $0xe0] sm:$0xff] }
 0xa99   : > { %v6913_v12 = vpop.eup %6912 }
 0xa9a   : > { %v3206_v34 = vmul.f32 %v6913_v12, %v3198_v14  ;;  %v5871_v14 = vld [vmem:[%s7065_s14 + $0xe8] sm:$0xff] }
 0xa9b   : > { %v6782_v17 = vpack.c.bf16 %v5871_v14, %v5870_v13  ;;  %v5899_v12 = vld [vmem:[%s7075_s24 + $0xe8] sm:$0xff] }
 0xa9c   : > { %v3213_v39 = vmul.f32 %v5828_v32, %v3206_v34  ;;  %v6806_v32 = vpack.c.bf16 %v5899_v12, %v5898_v31  ;;  %v5901_v34 = vld [vmem:[%s7075_s24 + $0xf8] sm:$0xff] }
 0xa9d   : > { %v6809_v35 = vpack.c.bf16 %v5901_v34, %v5900_v33 }
 0xa9e   : > { %v7525_v43 = vadd.f32 %v5829_v38, %v3213_v39 }
 0xaa0   : > { %6407 = vmatmul.mubr.msk.f32.vlgmr.msra.gmra.mrb[26].mxu0 %vm1006_vm1, %v7525_v43  ;;  %6429 = vmatmul.mubr.msk.f32.vlgmr.msra.gmra.mrb[26].mxu1 %vm1006_vm1, %v7525_v43 }
 0xaa1   : > { %6747 = vmatpush3.bf16.msra.mxu0 %v6746_v40  ;;  %6765 = vmatpush3.bf16.msra.mxu1 %v6764_v41  ;;  %v5878_v40 = vld [vmem:[%s7070_s19 + $0x4] ss:$0 sm:$0xff] }
 0xaa2   : > { %6748 = vmatprep.subr.bf16.mxu0 %v7007_v52  ;;  %6766 = vmatprep.subr.bf16.mxu1 %v7007_v52 }
 0xaa3   : > { %6417 = vmatprep.mubr.msk.f32.mxu0 %vm7008_vm2, %v7009_v60  ;;  %6450 = vmatprep.mubr.msk.f32.mxu1 %vm7008_vm2, %v7009_v60 }
 0xaa5   : > { %6750 = vmatpush3.bf16.msra.mxu0 %v6749_v49  ;;  %6768 = vmatpush3.bf16.msra.mxu1 %v6767_v45 }
 0xaa6   : > { %6757 = vmatprep.subr.bf16.mxu0 %v7007_v52  ;;  %6775 = vmatprep.subr.bf16.mxu1 %v7007_v52 }
 0xaa8   : > { %6418 = vmatmul.mubr.msk.f32.vlgmr.msra.gmra.mrb[28].mxu0 %vm1006_vm1, %v7525_v43  ;;  %6451 = vmatmul.mubr.msk.f32.vlgmr.msra.gmra.mrb[28].mxu1 %vm1006_vm1, %v7525_v43 }
 0xaa9   : > { %6759 = vmatpush3.bf16.msra.mxu0 %v6758_v54  ;;  %6777 = vmatpush3.bf16.msra.mxu1 %v6776_v55 }
 0xaaa   : > { %6760 = vmatprep.subr.bf16.mxu0 %v7007_v52  ;;  %6778 = vmatprep.subr.bf16.mxu1 %v7007_v52 }
 0xaab   : > { %6439 = vmatprep.mubr.msk.f32.mxu0 %vm7008_vm2, %v7009_v60  ;;  %6472 = vmatprep.mubr.msk.f32.mxu1 %vm7008_vm2, %v7009_v60 }
 0xaad   : > { %6762 = vmatpush3.bf16.msra.mxu0 %v6761_v62  ;;  %6780 = vmatpush3.bf16.msra.mxu1 %v6779_v63 }
 0xaae   : > { %6769 = vmatprep.subr.bf16.mxu0 %v7007_v52  ;;  %6787 = vmatprep.subr.bf16.mxu1 %v7007_v52 }
 0xab0   : > { %6440 = vmatmul.mubr.msk.f32.vlgmr.msra.gmra.mrb[30].mxu0 %vm1006_vm1, %v7525_v43  ;;  %6473 = vmatmul.mubr.msk.f32.vlgmr.msra.gmra.mrb[30].mxu1 %vm1006_vm1, %v7525_v43 }
 0xab1   : > { %6771 = vmatpush3.bf16.msra.mxu0 %v6770_v4  ;;  %6789 = vmatpush3.bf16.msra.mxu1 %v6788_v5 }
 0xab2   : > { %6772 = vmatprep.subr.bf16.mxu0 %v7007_v52  ;;  %6790 = vmatprep.subr.bf16.mxu1 %v7007_v52 }
 0xab3   : > { %6461 = vmatprep.mubr.msk.f32.mxu0 %vm7008_vm2, %v7009_v60  ;;  %6494 = vmatprep.mubr.msk.f32.mxu1 %vm7008_vm2, %v7009_v60 }
 0xab5   : > { %6774 = vmatpush3.bf16.msra.mxu0 %v6773_v10  ;;  %6792 = vmatpush3.bf16.msra.mxu1 %v6791_v11 }
 0xab6   : > { %6781 = vmatprep.subr.bf16.mxu0 %v7007_v52  ;;  %6799 = vmatprep.subr.bf16.mxu1 %v7007_v52 }
 0xab8   : > { %6462 = vmatmul.mubr.msk.f32.vlgmr.msra.gmra.mrb[32].mxu0 %vm1006_vm1, %v7525_v43  ;;  %6495 = vmatmul.mubr.msk.f32.vlgmr.msra.gmra.mrb[32].mxu1 %vm1006_vm1, %v7525_v43 }
 0xab9   : > { %6783 = vmatpush3.bf16.msra.mxu0 %v6782_v17  ;;  %6801 = vmatpush3.bf16.msra.mxu1 %v6800_v18 }
 0xaba   : > { %6784 = vmatprep.subr.bf16.mxu0 %v7007_v52  ;;  %6802 = vmatprep.subr.bf16.mxu1 %v7007_v52 }
 0xabb   : > { %6483 = vmatprep.mubr.msk.f32.mxu0 %vm7008_vm2, %v7009_v60  ;;  %6516 = vmatprep.mubr.msk.f32.mxu1 %vm7008_vm2, %v7009_v60 }
 0xabd   : > { %6786 = vmatpush3.bf16.msra.mxu0 %v6785_v23  ;;  %6804 = vmatpush3.bf16.msra.mxu1 %v6803_v24 }
 0xabe   : > { %6793 = vmatprep.subr.bf16.mxu0 %v7007_v52  ;;  %6530 = vmatprep.subr.mxu1 %v7009_v60 }
 0xac0   : > { %6484 = vmatmul.mubr.msk.f32.vlgmr.msra.gmra.mrb[34].mxu0 %vm1006_vm1, %v7525_v43  ;;  %6517 = vmatmul.mubr.msk.f32.vlgmr.msra.gmra.mrb[34].mxu1 %vm1006_vm1, %v7525_v43 }
 0xac1   : > { %6795 = vmatpush3.bf16.msra.mxu0 %v6794_v27  ;;  %6505 = vmatprep.mubr.msk.f32.mxu0 %vm7008_vm2, %v7009_v60 }
 0xac2   : > { %6796 = vmatprep.subr.bf16.mxu0 %v7007_v52  ;;  %6532 = vmatprep.mubr.msk.f32.mxu1 %vm7008_vm2, %v7009_v60 }
 0xac5   : > { %6798 = vmatpush3.bf16.msra.mxu0 %v6797_v30 }
 0xac6   : > { %6805 = vmatprep.subr.bf16.mxu0 %v7007_v52 }
 0xac8   : > { %6506 = vmatmul.mubr.msk.f32.vlgmr.msra.gmra.mrb[36].mxu0 %vm1006_vm1, %v7525_v43 }
 0xac9   : > { %6807 = vmatpush3.bf16.msra.mxu0 %v6806_v32  ;;  %6527 = vmatprep.mubr.msk.f32.mxu0 %vm7008_vm2, %v7009_v60 }
 0xaca   : > { %6808 = vmatprep.subr.bf16.mxu0 %v7007_v52 }
 0xacd   : > { %6810 = vmatpush3.bf16.msra.mxu0 %v6809_v35 }
 0xace   : > { %6540 = vmatprep.subr.mxu0 %v7009_v60 }
 0xad0   : > { %6528 = vmatmul.mubr.msk.f32.vlgmr.msra.gmra.mrb[38].mxu0 %vm1006_vm1, %v7525_v43 }
 0xad1   : > { %6542 = vmatprep.mubr.msk.f32.mxu0 %vm7008_vm2, %v7009_v60 }
 0xb73   : > { %v3336_v36 = vpop.f32.mrb[26].mxu0  ;;  %v3476_v37 = vpop.f32.mrb[26].mxu1 }
 0xb74   : > { %v6408_v38 = vpop.f32.mrb[27].mxu0  ;;  %v6430_v39 = vpop.f32.mrb[27].mxu1  ;;  %v3337_v45 = vadd.f32 %v5850_v44, %v3336_v36  ;;  %v3477_v58 = vadd.f32 %v5852_v53, %v3476_v37 }
 0xb7b   : > { %v3406_v41 = vpop.f32.mrb[28].mxu0  ;;  %v3662_v42 = vpop.f32.mrb[28].mxu1 }
 0xb7c   : > { %v3663_v47 = vadd.f32 %v5878_v40, %v3662_v42  ;;  %v6419_v48 = vpop.f32.mrb[29].mxu0  ;;  %v6452_v49 = vpop.f32.mrb[29].mxu1  ;;  %v3407_v5 = vadd.f32 %v5851_v0, %v3406_v41 }
 0xb7e   : > { %6531 = vmatpush3.xpose.msk.msra.mxu1 %vm2013_vm3, %v3663_v47 }
 0xb7f   : > { %6535 = vmatprep.subr.mxu1 %v7009_v60 }
 0xb81   : > { %6533 = vmatmul.mubr.msk.f32.vlgmr.msra.gmra.mrb[36].mxu1 %vm2013_vm3, %v3337_v45 }
 0xb82   : > { %6537 = vmatprep.mubr.msk.f32.mxu1 %vm7008_vm2, %v7009_v60 }
 0xb83   : > { %v3546_v51 = vpop.f32.mrb[30].mxu0  ;;  %v3802_v46 = vpop.f32.mrb[30].mxu1 }
 0xb84   : > { %v3803_v54 = vadd.f32 %v5880_v50, %v3802_v46  ;;  %v6441_v55 = vpop.f32.mrb[31].mxu0  ;;  %v6474_v57 = vpop.f32.mrb[31].mxu1  ;;  %v3547_v14 = vadd.f32 %v5853_v9, %v3546_v51 }
 0xb86   : > { %6541 = vmatpush3.xpose.msk.msra.mxu0 %vm2013_vm3, %v3803_v54 }
 0xb87   : > { %6550 = vmatprep.subr.mxu0 %v7009_v60 }
 0xb89   : > { %6543 = vmatmul.mubr.msk.f32.vlgmr.msra.gmra.mrb[40].mxu0 %vm2013_vm3, %v3477_v58 }
 0xb8a   : > { %6552 = vmatprep.mubr.msk.f32.mxu0 %vm7008_vm2, %v7009_v60 }
 0xb8b   : > { %v3732_v62 = vpop.f32.mrb[32].mxu0  ;;  %v3988_v63 = vpop.f32.mrb[32].mxu1 }
 0xb8c   : > { %v3733_v1 = vadd.f32 %v5879_v59, %v3732_v62  ;;  %v3989_v2 = vadd.f32 %v5906_v61, %v3988_v63  ;;  %v6463_v3 = vpop.f32.mrb[33].mxu0  ;;  %v6496_v4 = vpop.f32.mrb[33].mxu1 }
 0xb8e   : > { %6536 = vmatpush3.xpose.msk.msra.mxu1 %vm2013_vm3, %v3733_v1  ;;  %6551 = vmatpush3.msra.mxu0 %v3989_v2  ;;  %v5908_v1 = vld [vmem:[%s7080_s30 + $0x6] ss:$0 sm:$0xff] }
 0xb8f   : > { %6545 = vmatprep.subr.mxu1 %v7009_v60  ;;  %6560 = vmatprep.subr.mxu0 %v7009_v60 }
 0xb91   : > { %6538 = vmatmul.mubr.msk.f32.vlgmr.msra.gmra.mrb[38].mxu1 %vm2013_vm3, %v3407_v5 }
 0xb92   : > { %6547 = vmatprep.mubr.msk.f32.mxu1 %vm7008_vm2, %v7009_v60 }
 0xb93   : > { %v3872_v7 = vpop.f32.mrb[34].mxu0  ;;  %v7654_v8 = vpop.f32.mrb[34].mxu1 }
 0xb94   : > { %v3873_v10 = vadd.f32 %v5881_v6, %v3872_v7  ;;  %v6485_v11 = vpop.f32.mrb[35].mxu0  ;;  %v6518_v13 = vpop.f32.mrb[35].mxu1  ;;  %v4129_v4 = vadd.f32 %v5908_v1, %v7654_v8  ;;  %v5909_v8 = vld [vmem:[%s7080_s30 + $0x7] ss:$0 sm:$0xff]  ;;  %v5939_v1 = vld [vmem:[%s7825_s2 + $0x1] ss:$0 sm:$0xff] }
 0xb96   : > { %6546 = vmatpush3.xpose.msk.msra.mxu1 %vm2013_vm3, %v3873_v10 }
 0xb97   : > { %6555 = vmatprep.subr.mxu1 %v7009_v60 }
 0xb99   : > { %6548 = vmatmul.mubr.msk.f32.vlgmr.msra.gmra.mrb[40].mxu1 %vm2013_vm3, %v3547_v14 }
 0xb9a   : > { %6557 = vmatprep.mubr.msk.f32.mxu1 %vm7008_vm2, %v7009_v60 }
 0xb9b   : > { %v4058_v16 = vpop.f32.mrb[36].mxu0 }
 0xb9c   : > { %v4059_v17 = vadd.f32 %v5907_v15, %v4058_v16  ;;  %v6507_v18 = vpop.f32.mrb[37].mxu0  ;;  %v5926_v16 = vld [vmem:[%s7085_s6 + $0x20] sm:$0xff] }
 0xb9d   : > { %v5928_v18 = vld [vmem:[%s7085_s6 + $0x30] sm:$0xff] }
 0xb9e   : > { %6556 = vmatpush3.msra.mxu1 %v4059_v17  ;;  %v5927_v17 = vld [vmem:[%s7085_s6 + $0x28] sm:$0xff] }
 0xb9f   : > { %6565 = vmatprep.subr.mxu1 %v7009_v60 }
 0xba3   : > { %v7664_v19 = vpop.f32.mrb[38].mxu0 }
 0xba4   : > { %v6529_v20 = vpop.f32.mrb[39].mxu0  ;;  %v4199_v13 = vadd.f32 %v5909_v8, %v7664_v19 }
 0xc54   : > { %v4274_v21 = vpop.f32.mrb[36].mxu1 }
 0xc55   : > { %v4506_v22 = vmul.f32 0.35355338, %v4274_v21  ;;  %v6534_v23 = vpop.f32.mrb[37].mxu1 }
 0xc56   : > { %v5929_v23 = vld [vmem:[%s7085_s6 + $0x38] sm:$0xff] }
 0xc57   : > { %v4510_v24 = vadd.f32 %v4506_v22, %v7416_v56 }
 0xc59   : > { %v4514_v25 = vsel %vm2013_vm3, %v4510_v24, -inf }
 0xc5a   : > { %4515 = vmax.xlane.f32.xlu0 %v4514_v25 }
 0xc5c   : > { %v4426_v26 = vpop.f32.mrb[40].mxu0 }
 0xc5d   : > { %v4508_v27 = vmul.f32 0.35355338, %v4426_v26  ;;  %v6544_v28 = vpop.f32.mrb[41].mxu0 }
 0xc5f   : > { %v4512_v29 = vadd.f32 %v4508_v27, %v7416_v56 }
 0xc61   : > { %v4520_v30 = vsel %vm2013_vm3, %v4512_v29, -inf }
 0xc62   : > { %4521 = vmax.xlane.f32.xlu0 %v4520_v30 }
 0xc64   : > { %v4350_v31 = vpop.f32.mrb[38].mxu1 }
 0xc65   : > { %v4507_v12 = vmul.f32 0.35355338, %v4350_v31  ;;  %v6539_v32 = vpop.f32.mrb[39].mxu1 }
 0xc67   : > { %v4511_v33 = vadd.f32 %v4507_v12, %v7416_v56 }
 0xc69   : > { %v4517_v34 = vsel %vm2013_vm3, %v4511_v33, -inf }
 0xc6a   : > { %4518 = vmax.xlane.f32.xlu1 %v4517_v34 }
 0xc6c   : > { %v4502_v35 = vpop.f32.mrb[40].mxu1 }
 0xc6d   : > { %v4509_v36 = vmul.f32 0.35355338, %v4502_v35  ;;  %v6549_v37 = vpop.f32.mrb[41].mxu1 }
 0xc6f   : > { %v4513_v38 = vadd.f32 %v4509_v36, %v7416_v56 }
 0xc71   : > { %v4523_v39 = vsel %vm2013_vm3, %v4513_v38, -inf }
 0xc72   : > { %4524 = vmax.xlane.f32.xlu1 %v4523_v39 }
 0xce7   : > { %v4516_v40 = vpop.xlane.xlu0 %4515 }
 0xce8   : > { %v4526_v41 = vsub.f32 %v4510_v24, %v4516_v40  ;;  %v5935_v40 = vld [vmem:[%s7822_s16 + $0x1] ss:$0 sm:$0xff] }
 0xcea   : > { %v4530_v42 = vmul.f32 1.442695, %v4526_v41 }
 0xcec   : > { %6914 = vpow2.f32 %v4530_v42 }
 0xcef   : > { %v4522_v44 = vpop.xlane.xlu0 %4521 }
 0xcf0   : > { %v4528_v47 = vsub.f32 %v4512_v29, %v4522_v44 }
 0xcf2   : > { %v4534_v48 = vmul.f32 1.442695, %v4528_v47 }
 0xcf4   : > { %6916 = vpow2.f32 %v4534_v48 }
 0xcf6   : > { %v6915_v49 = vpop.eup %6914 }
 0xcf7   : > { %v4519_v45 = vpop.xlane.xlu1 %4518  ;;  %v4538_v50 = vsel %vm2013_vm3, %v6915_v49, 0.0 }
 0xcf8   : > { %v4527_v51 = vsub.f32 %v4511_v33, %v4519_v45  ;;  %4539 = vadd.xlane.f32.xlu0 %v4538_v50 }
 0xcfa   : > { %v4532_v46 = vmul.f32 1.442695, %v4527_v51 }
 0xcfc   : > { %6918 = vpow2.f32 %v4532_v46 }
 0xcfe   : > { %v6917_v56 = vpop.eup %6916 }
 0xcff   : > { %v4525_v53 = vpop.xlane.xlu1 %4524  ;;  %v4544_v54 = vsel %vm2013_vm3, %v6917_v56, 0.0 }
 0xd00   : > { %v4529_v55 = vsub.f32 %v4513_v38, %v4525_v53  ;;  %4545 = vadd.xlane.f32.xlu0 %v4544_v54  ;;  %v5941_v53 = vld [vmem:[%s7823_s26 + $0x28] sm:$0xff] }
 0xd02   : > { %v4536_v57 = vmul.f32 1.442695, %v4529_v55  ;;  %v5942_v55 = vld [vmem:[%s7823_s26 + $0x30] sm:$0xff] }
 0xd04   : > { %6920 = vpow2.f32 %v4536_v57  ;;  %v5943_v57 = vld [vmem:[%s7823_s26 + $0x38] sm:$0xff] }
 0xd06   : > { %v6919_v58 = vpop.eup %6918 }
 0xd07   : > { %v4541_v59 = vsel %vm2013_vm3, %v6919_v58, 0.0 }
 0xd08   : > { %4542 = vadd.xlane.f32.xlu1 %v4541_v59 }
 0xd0e   : > { %v6921_v61 = vpop.eup %6920 }
 0xd0f   : > { %v4547_v62 = vsel %vm2013_vm3, %v6921_v61, 0.0 }
 0xd10   : > { %4548 = vadd.xlane.f32.xlu1 %v4547_v62 }
 0xd85   : > { %v4540_v63 = vpop.xlane.xlu0 %4539 }
 0xd86   : > { %6922 = vrcp.f32 %v4540_v63  ;;  %v5938_v63 = vld [vmem:[%s7824_s4 + $0x1] ss:$0 sm:$0xff] }
 0xd8d   : > { %v4546_v0 = vpop.xlane.xlu0 %4545 }
 0xd8e   : > { %6924 = vrcp.f32 %v4546_v0 }
 0xd90   : > { %v6923_v2 = vpop.eup %6922 }
 0xd91   : > { %v4551_v3 = vmul.f32 %v6923_v2, %v6915_v49 }
 0xd93   : > { %6553 = vmatmul.mubr.msk.f32.vlgmr.msra.gmra.mrb[42].mxu0 %vm2013_vm3, %v4551_v3 }
 0xd94   : > { %6561 = vmatpush3.msra.mxu0 %v4129_v4  ;;  %6562 = vmatprep.mubr.msk.f32.mxu0 %vm7008_vm2, %v7009_v60  ;;  %v5947_v4 = vld [vmem:[%s7827_s5 + $0x40] sm:$0xff] }
 0xd95   : > { %v4543_v5 = vpop.xlane.xlu1 %4542  ;;  %6570 = vmatprep.subr.mxu0 %v7009_v60 }
 0xd96   : > { %6926 = vrcp.f32 %v4543_v5  ;;  %v5948_v5 = vld [vmem:[%s7827_s5 + $0x48] sm:$0xff] }
 0xd98   : > { %v6925_v6 = vpop.eup %6924 }
 0xd99   : > { %v4555_v7 = vmul.f32 %v6925_v6, %v6917_v56  ;;  %v5940_v56 = vld [vmem:[%s7823_s26 + $0x20] sm:$0xff]  ;;  %v6818_v6 = vpack.c.bf16 %v5948_v5, %v5947_v4  ;;  %v5509_v5 = vld [vmem:[%s7155_s20 + $0x8] sm:$0xff] }
 0xd9a   : > { %v6812_v54 = vpack.c.bf16 %v5941_v53, %v5940_v56  ;;  %v5961_v53 = vld [vmem:[%s7831_s18 + $0x1] ss:$0 sm:$0xff] }
 0xd9b   : > { %6563 = vmatmul.mubr.msk.f32.vlgmr.msra.gmra.mrb[44].mxu0 %vm2013_vm3, %v4555_v7  ;;  %v5949_v7 = vld [vmem:[%s7827_s5 + $0x50] sm:$0xff]  ;;  %v5508_v4 = vld [vmem:[%s7155_s20] sm:$0xff] }
 0xd9c   : > { %6572 = vmatprep.mubr.msk.f32.mxu0 %vm7008_vm2, %v7009_v60  ;;  %6571 = vmatpush3.msra.mxu0 %v5926_v16 }
 0xd9d   : > { %v4549_v9 = vpop.xlane.xlu1 %4548  ;;  %6580 = vmatprep.subr.mxu0 %v7009_v60 }
 0xd9e   : > { %6928 = vrcp.f32 %v4549_v9  ;;  %v5950_v9 = vld [vmem:[%s7827_s5 + $0x58] sm:$0xff] }
 0xd9f   : > { %v6821_v8 = vpack.c.bf16 %v5950_v9, %v5949_v7  ;;  %v5510_v7 = vld [vmem:[%s7155_s20 + $0x10] sm:$0xff]  ;;  %v5511_v9 = vld [vmem:[%s7155_s20 + $0x18] sm:$0xff] }
 0xda0   : > { %v6927_v10 = vpop.eup %6926 }
 0xda1   : > { %v4553_v11 = vmul.f32 %v6927_v10, %v6919_v58  ;;  %v5951_v10 = vld [vmem:[%s7827_s5 + $0x60] sm:$0xff] }
 0xda3   : > { %6558 = vmatmul.mubr.msk.f32.vlgmr.msra.gmra.mrb[42].mxu1 %vm2013_vm3, %v4553_v11  ;;  %v5952_v11 = vld [vmem:[%s7827_s5 + $0x68] sm:$0xff] }
 0xda4   : > { %6566 = vmatpush3.msra.mxu1 %v4199_v13  ;;  %6567 = vmatprep.mubr.msk.f32.mxu1 %vm7008_vm2, %v7009_v60  ;;  %v6824_v13 = vpack.c.bf16 %v5952_v11, %v5951_v10  ;;  %v5585_v10 = vld [vmem:[%s7835_s7] sm:$0xff]  ;;  %v5586_v11 = vld [vmem:[%s7835_s7 + $0x8] sm:$0xff] }
 0xda5   : > { %6575 = vmatprep.subr.mxu1 %v7009_v60 }
 0xda8   : > { %v6929_v14 = vpop.eup %6928 }
 0xda9   : > { %v4557_v15 = vmul.f32 %v6929_v14, %v6921_v61  ;;  %v5953_v14 = vld [vmem:[%s7827_s5 + $0x70] sm:$0xff] }
 0xdab   : > { %6568 = vmatmul.mubr.msk.f32.vlgmr.msra.gmra.mrb[44].mxu1 %vm2013_vm3, %v4557_v15  ;;  %v5954_v15 = vld [vmem:[%s7827_s5 + $0x78] sm:$0xff] }
 0xdac   : > { %6577 = vmatprep.mubr.msk.f32.mxu1 %vm7008_vm2, %v7009_v60  ;;  %6576 = vmatpush3.msra.mxu1 %v5927_v17  ;;  %v6827_v16 = vpack.c.bf16 %v5954_v15, %v5953_v14  ;;  %v5945_v17 = vld [vmem:[%s7828_s28 + $0x1] ss:$0 sm:$0xff] }
 0xdad   : > { %6585 = vmatprep.subr.mxu1 %v7009_v60 }
 0xe66   : > { %v4627_v19 = vpop.f32.mrb[42].mxu0 }
 0xe67   : > { %v6554_v20 = vpop.f32.mrb[43].mxu0  ;;  %6573 = vmatmul.mubr.msk.f32.vlgmr.msra.gmra.mrb[46].mxu0 %vm2013_vm3, %v4627_v19 }
 0xe68   : > { %6581 = vmatpush3.msra.mxu0 %v5928_v18  ;;  %6582 = vmatprep.mubr.msk.f32.mxu0 %vm7008_vm2, %v7009_v60 }
 0xe69   : > { %6811 = vmatprep.subr.bf16.mxu0 %v7007_v52 }
 0xe6e   : > { %v4773_v21 = vpop.f32.mrb[44].mxu0 }
 0xe6f   : > { %v6564_v22 = vpop.f32.mrb[45].mxu0  ;;  %6583 = vmatmul.mubr.msk.f32.vlgmr.msra.gmra.mrb[48].mxu0 %vm2013_vm3, %v4773_v21 }
 0xe70   : > { %6598 = vmatprep.mubr.msk.f32.mxu0 %vm7008_vm2, %v7009_v60  ;;  %6813 = vmatpush3.bf16.msra.mxu0 %v6812_v54 }
 0xe71   : > { %6814 = vmatprep.subr.bf16.mxu0 %v7007_v52 }
 0xe76   : > { %v4700_v24 = vpop.f32.mrb[42].mxu1 }
 0xe77   : > { %v6559_v25 = vpop.f32.mrb[43].mxu1  ;;  %6578 = vmatmul.mubr.msk.f32.vlgmr.msra.gmra.mrb[46].mxu1 %vm2013_vm3, %v4700_v24 }
 0xe78   : > { %6586 = vmatpush3.msra.mxu1 %v5929_v23  ;;  %6587 = vmatprep.mubr.msk.f32.mxu1 %vm7008_vm2, %v7009_v60 }
 0xe79   : > { %6817 = vmatprep.subr.bf16.mxu1 %v7007_v52 }
 0xe7e   : > { %v4846_v26 = vpop.f32.mrb[44].mxu1 }
 0xe7f   : > { %v6569_v27 = vpop.f32.mrb[45].mxu1  ;;  %6588 = vmatmul.mubr.msk.f32.vlgmr.msra.gmra.mrb[48].mxu1 %vm2013_vm3, %v4846_v26 }
 0xe80   : > { %6617 = vmatprep.mubr.msk.f32.mxu1 %vm7008_vm2, %v7009_v60  ;;  %6819 = vmatpush3.bf16.msra.mxu1 %v6818_v6  ;;  %v6836_v6 = vpack.c.bf16 %v5509_v5, %v5508_v4 }
 0xe81   : > { %6820 = vmatprep.subr.bf16.mxu1 %v7007_v52 }
 0xe84   : > { %6822 = vmatpush3.bf16.msra.mxu1 %v6821_v8  ;;  %v6839_v8 = vpack.c.bf16 %v5511_v9, %v5510_v7 }
 0xe85   : > { %6823 = vmatprep.subr.bf16.mxu1 %v7007_v52 }
 0xe88   : > { %6825 = vmatpush3.bf16.msra.mxu1 %v6824_v13  ;;  %v6842_v13 = vpack.c.bf16 %v5586_v11, %v5585_v10 }
 0xe89   : > { %6826 = vmatprep.subr.bf16.mxu1 %v7007_v52 }
 0xe8c   : > { %6828 = vmatpush3.bf16.msra.mxu1 %v6827_v16 }
 0xe8d   : > { %6841 = vmatprep.subr.bf16.mxu1 %v7007_v52 }
 0xf3a   : > { %v4924_v28 = vpop.f32.mrb[46].mxu0 }
 0xf3b   : > { %v6574_v29 = vpop.f32.mrb[47].mxu0  ;;  %v5147_v32 = vsel %vm1006_vm1, %v4924_v28, 0.0 }
 0xf42   : > { %v5070_v30 = vpop.f32.mrb[48].mxu0 }
 0xf43   : > { %v6584_v31 = vpop.f32.mrb[49].mxu0  ;;  %v5150_v36 = vsel %vm1006_vm1, %v5070_v30, 0.0  ;;  %v5956_v30 = vld [vmem:[%s7829_s10 + $0x1] ss:$0 sm:$0xff] }
 0xf4a   : > { %v4997_v12 = vpop.f32.mrb[46].mxu1 }
 0xf4b   : > { %v5148_v33 = vsel %vm1006_vm1, %v4997_v12, 0.0  ;;  %v6579_v34 = vpop.f32.mrb[47].mxu1 }
 0xf4c   : > { %v5149_v35 = vadd.f32 %v5148_v33, %v5147_v32 }
 0xf4e   : > { %v5151_v37 = vadd.f32 %v5150_v36, %v5149_v35 }
 0xf52   : > { %v5143_v38 = vpop.f32.mrb[48].mxu1 }
 0xf53   : > { %v5152_v39 = vsel %vm1006_vm1, %v5143_v38, 0.0  ;;  %v6589_v41 = vpop.f32.mrb[49].mxu1 }
 0xf54   : > { %v5153_v42 = vadd.f32 %v5152_v39, %v5151_v37  ;;  %v5413_v41 = vld [vmem:[%s7832_s1 + $0x8] sm:$0xff] }
 0xf56   : > { %v5162_v44 = vadd.f32 %v5935_v40, %v5153_v42  ;;  %v5412_v40 = vld [vmem:[%s7832_s1] sm:$0xff] }
 0xf57   : > { %v6830_v42 = vpack.c.bf16 %v5413_v41, %v5412_v40 }
 0xf58   : > { %v5163_v47 = vadd.f32 %v5162_v44, %v7525_v43  ;;  %v6815_v43 = vpack.c.bf16 %v5943_v57, %v5942_v55  ;;  %v5414_v44 = vld [vmem:[%s7832_s1 + $0x10] sm:$0xff]  ;;  %v5416_v57 = vld [vmem:[%s7833_s11] sm:$0x1]  ;;  %s7838_s11 = sld [smem:[#allocation21_spill]] }
 0xf5a   : > { %v5168_v48 = vsel %vm1006_vm1, %v5163_v47, 0.0  ;;  %6816 = vmatpush3.bf16.msra.mxu0 %v6815_v43 }
 0xf5b   : > { %5169 = vadd.xlane.f32.xlu0 %v5168_v48  ;;  %6829 = vmatprep.subr.bf16.mxu0 %v7007_v52 }
 0xfe8   : > { %v5170_v49 = vpop.xlane.xlu0 %5169 }
 0xfe9   : > { %v5171_v45 = vmul.f32 0.03125, %v5170_v49 }
 0xfeb   : > { %v5172_v50 = vsub.f32 %v5163_v47, %v5171_v45  ;;  %v5415_v47 = vld [vmem:[%s7832_s1 + $0x18] sm:$0xff] }
 0xfec   : > { %v6833_v48 = vpack.c.bf16 %v5415_v47, %v5414_v44 }
 0xfed   : > { %v5173_v51 = vmul.f32 %v5172_v50, %v5172_v50 }
 0xfef   : > { %v5174_v46 = vsel %vm1006_vm1, %v5173_v51, 0.0 }
 0xff0   : > { %5175 = vadd.xlane.f32.xlu1 %v5174_v46  ;;  %v5960_v46 = vld [vmem:[%s7830_s15 + $0x1] ss:$0 sm:$0xff] }
0x107d   : > { %v5176_v58 = vpop.xlane.xlu1 %5175 }
0x107e   : > { %v5177_v59 = vmul.f32 0.03125, %v5176_v58 }
0x1080   : > { %v5178_v61 = vadd.f32 1e-12, %v5177_v59 }
0x1082   : > { %6930 = vrsqrt.f32 %v5178_v61 }
0x108c   : > { %v6931_v62 = vpop.eup %6930 }
0x108d   : > { %v5180_v0 = vmul.f32 %v6931_v62, %v5172_v50 }
0x108f   : > { %v5187_v2 = vmul.f32 %v5938_v63, %v5180_v0 }
0x1091   : > { %v5194_v3 = vadd.f32 %v5939_v1, %v5187_v2 }
0x1093   : > { %6599 = vmatmul.mubr.msk.f32.vlgmr.msra.gmra.mrb[50].mxu0 %vm1006_vm1, %v5194_v3 }
0x1094   : > { %6628 = vmatprep.mubr.msk.f32.mxu0 %vm7008_vm2, %v7009_v60  ;;  %6831 = vmatpush3.bf16.msra.mxu0 %v6830_v42 }
0x1095   : > { %6832 = vmatprep.subr.bf16.mxu0 %v7007_v52 }
0x1098   : > { %6834 = vmatpush3.bf16.msra.mxu0 %v6833_v48 }
0x1099   : > { %6835 = vmatprep.subr.bf16.mxu0 %v7007_v52 }
0x1166   : > { %v5277_v18 = vpop.f32.mrb[50].mxu0 }
0x1167   : > { %v5278_v19 = vadd.f32 %v5945_v17, %v5277_v18  ;;  %v6600_v20 = vpop.f32.mrb[51].mxu0 }
0x1169   : > { %v5281_v21 = vmul.f32 %v5278_v19, %v5278_v19 }
0x116b   : > { %v5282_v22 = vmul.f32 %v5281_v21, %v5278_v19 }
0x116d   : > { %v5283_v23 = vmul.f32 0.044715, %v5282_v22 }
0x116f   : > { %v5284_v24 = vadd.f32 %v5283_v23, %v5278_v19 }
0x1171   : > { %v5285_v25 = vmul.f32 0.7978846, %v5284_v24  ;;  %v5587_v24 = vld [vmem:[%s7838_s11] sm:$0x1] }
0x1173   : > { %6932 = vtanh.f32 %v5285_v25 }
0x117d   : > { %v6933_v26 = vpop.eup %6932 }
0x117e   : > { %v5287_v27 = vadd.f32 1.0, %v6933_v26 }
0x1180   : > { %v5288_v28 = vmul.f32 0.5, %v5287_v27 }
0x1182   : > { %v5289_v29 = vmul.f32 %v5288_v28, %v5278_v19  ;;  %v5492_v19 = vld [vmem:[%s7837_s22] sm:$0x1] }
0x1184   : > { %6618 = vmatmul.mubr.msk.f32.vlgmr.msra.gmra.mrb[50].mxu1 %vm3117_vm4, %v5289_v29 }
0x1185   : > { %6646 = vmatprep.mubr.msk.f32.mxu1 %vm7008_vm2, %v7009_v60  ;;  %6843 = vmatpush3.bf16.msra.mxu1 %v6842_v13 }
0x1257   : > { %v5376_v31 = vpop.f32.mrb[50].mxu1 }
0x1258   : > { %v5377_v12 = vadd.f32 %v5956_v30, %v5376_v31  ;;  %v6619_v32 = vpop.f32.mrb[51].mxu1 }
0x125a   : > { %v5380_v33 = vadd.f32 %v5377_v12, %v5194_v3 }
0x125c   : > { %v5385_v34 = vsel %vm1006_vm1, %v5380_v33, 0.0 }
0x125d   : > { %5386 = vadd.xlane.f32.xlu0 %v5385_v34 }
0x12ea   : > { %v5387_v35 = vpop.xlane.xlu0 %5386 }
0x12eb   : > { %v5388_v36 = vmul.f32 0.03125, %v5387_v35 }
0x12ed   : > { %v5389_v37 = vsub.f32 %v5380_v33, %v5388_v36 }
0x12ef   : > { %v5390_v38 = vmul.f32 %v5389_v37, %v5389_v37 }
0x12f1   : > { %v5391_v39 = vsel %vm1006_vm1, %v5390_v38, 0.0 }
0x12f2   : > { %5392 = vadd.xlane.f32.xlu1 %v5391_v39 }
0x137f   : > { %v5393_v49 = vpop.xlane.xlu1 %5392 }
0x1380   : > { %v5394_v45 = vmul.f32 0.03125, %v5393_v49 }
0x1382   : > { %v5395_v50 = vadd.f32 1e-12, %v5394_v45 }
0x1384   : > { %6934 = vrsqrt.f32 %v5395_v50 }
0x138e   : > { %v6935_v51 = vpop.eup %6934 }
0x138f   : > { %v5397_v56 = vmul.f32 %v6935_v51, %v5389_v37 }
0x1391   : > { %v5404_v54 = vmul.f32 %v5960_v46, %v5397_v56 }
0x1393   : > { %v5411_v55 = vadd.f32 %v5961_v53, %v5404_v54 }
0x1395   : > { %6629 = vmatmul.mubr.msk.f32.vlgmr.msra.gmra.mrb[52].mxu0 %vm1006_vm1, %v5411_v55 }
0x1396   : > { %6639 = vmatprep.mubr.msk.f32.mxu0 %vm7008_vm2, %v7009_v60  ;;  %6837 = vmatpush3.bf16.msra.mxu0 %v6836_v6 }
0x1397   : > { %6838 = vmatprep.subr.bf16.mxu0 %v7007_v52  ;;  %v5491_v52 = vld [vmem:[%s7836_s27] sm:$0x1] }
0x139a   : > { %6840 = vmatpush3.bf16.msra.mxu0 %v6839_v8 }
0x1468   : > { %v5486_v43 = vpop.f32.mrb[52].mxu0 }
0x1469   : > { %v5487_v58 = vadd.f32 %v5486_v43, %v5416_v57  ;;  %v6630_v59 = vpop.f32.mrb[53].mxu0 }
0x146b   : > { %6936 = vtanh.f32 %v5487_v58 }
0x1475   : > { %v6937_v61 = vpop.eup %6936 }
0x1476   : > { %v5493_v62 = vsel %vm917_vm0, %v6937_v61, 0.0 }
0x1477   : > { %5494 = vadd.xlane.f32.xlu0 %v5493_v62 }
0x1504   : > { %v5495_v63 = vpop.xlane.xlu0 %5494 }
0x1505   : > { %v5496_v0 = vmul.f32 0.03125, %v5495_v63 }
0x1507   : > { %v5497_v1 = vsub.f32 %v6937_v61, %v5496_v0 }
0x1509   : > { %v5498_v2 = vmul.f32 %v5497_v1, %v5497_v1 }
0x150b   : > { %v5499_v3 = vsel %vm917_vm0, %v5498_v2, 0.0 }
0x150c   : > { %5500 = vadd.xlane.f32.xlu1 %v5499_v3 }
0x1599   : > { %v5501_v14 = vpop.xlane.xlu1 %5500 }
0x159a   : > { %v5502_v15 = vmul.f32 0.03125, %v5501_v14 }
0x159c   : > { %v5503_v16 = vadd.f32 1e-05, %v5502_v15 }
0x159e   : > { %6938 = vrsqrt.f32 %v5503_v16 }
0x15a8   : > { %v6939_v17 = vpop.eup %6938 }
0x15a9   : > { %v5505_v18 = vmul.f32 %v6939_v17, %v5497_v1 }
0x15ab   : > { %v5506_v20 = vmul.f32 %v5505_v18, %v5491_v52 }
0x15ad   : > { %v5507_v21 = vadd.f32 %v5506_v20, %v5492_v19 }
0x15af   : > { %6640 = vmatmul.mubr.msk.f32.vlgmr.msra.gmra.mrb[54].mxu0 %vm1006_vm1, %v5507_v21  ;;  %5663 = vst.msk [vmem:[%s7775_s12] sm:$0x1] %vm917_vm0, %v5507_v21 }
0x1682   : > { %v5581_v60 = vpop.f32.mrb[54].mxu0 }
0x1683   : > { %5664 = vrot.lane.b32.xlu0 %v5581_v60, %s7010_s0  ;;  %v6641_v22 = vpop.f32.mrb[55].mxu0  ;;  %6647 = vmatmul.mubr.msk.f32.vlgmr.msra.gmra.mrb[52].mxu1 %vm5588_vm5, %v5581_v60 }
0x16f5   : > { %v5665_v23 = vpop.permute.xlu0 %5664 }
0x16f6   : > { %5668 = vst.msk [vmem:[%s7775_s12] sm:$0x1] %vm5667_vm6, %v5665_v23 }
0x1756   : > { %v5658_v25 = vpop.f32.mrb[52].mxu1 }
0x1757   : > { %v5659_v26 = vadd.f32 %v5658_v25, %v5587_v24  ;;  %v6648_v27 = vpop.f32.mrb[53].mxu1 }
0x1759   : > { %5670 = vrot.lane.b32.xlu1 %v5659_v26, %s7011_s23 }
0x17cb   : > { %v5671_v28 = vpop.permute.xlu1 %5670 }
0x17cc   : > { %5674 = vst.msk [vmem:[%s7775_s12] sm:$0x1] %vm5673_vm7, %v5671_v28 }
0x17cd PF: > { %s7839_s27 = sld [smem:[#allocation23_spill]] }
0x17d3   : > { %s83_s12 = sadd.s32 1, %s7839_s27  }
0x17d4   : > { %p80_p0 = scmp.ge.s32.totalorder %s83_s12, 4  }
0x17d6   :  { %82 = sbr.rel (!%p80_p0) target bundleno = 78 (0x4e), region = 236 }

</bundles_post_ra>
